<compile_context>
chip_gen: v6e
topology: v6e:2x2x1
jax: 0.10.0
libtpu: 0.0.40
codegen_flags: <defaults>
</compile_context>

<pallas_src>
import functools

import jax
import jax.numpy as jnp
from jax import lax
from jax.experimental import pallas as pl
from jax.experimental.pallas import tpu as pltpu

EPS = 1e-5
LANE = 128        # channels padded to a multiple of the lane width
MM_TM = 512       # row tile for the 1x1-conv matmul kernels (VMEM-safe on v7x)
EPI_TM = 1024     # row tile for the elementwise epilogue kernel


def _round_up(x, m):
    return (x + m - 1) // m * m


# ----------------------------------------------------------------------------
# Kernel 1: 1x1 conv as matmul (+ optional fused producer BN+ReLU on the A
# tile) + per-block partial BN statistics of the output.
# ----------------------------------------------------------------------------
def _mm_stats_kernel(*refs, fuse_input, mask_rows, m_real, tm):
    if fuse_input:
        a_ref, isc_ref, ish_ref, b_ref, y_ref, st_ref = refs
        a = jnp.maximum(a_ref[...] * isc_ref[...] + ish_ref[...], 0.0)
    else:
        a_ref, b_ref, y_ref, st_ref = refs
        a = a_ref[...]
    y = jnp.dot(a.astype(b_ref.dtype), b_ref[...],
                preferred_element_type=jnp.float32)
    y_ref[...] = y
    if mask_rows:
        # Mask out zero-padded rows so they never pollute the BN statistics
        # (only generated when M is not divisible by tm).
        row = lax.broadcasted_iota(jnp.int32, (tm, 1), 0) + pl.program_id(0) * tm
        yv = jnp.where(row < m_real, y, 0.0)
    else:
        yv = y
    # Two separate row stores (no concatenate) into the (1, 2, C) stats block.
    st_ref[0, 0:1, :] = jnp.sum(yv, axis=0, keepdims=True)
    st_ref[0, 1:2, :] = jnp.sum(yv * yv, axis=0, keepdims=True)


def matmul_stats(a, b, in_scale=None, in_shift=None, tm=MM_TM):
    """a:(M,K) @ b:(K,C) -> (y:(M,C) f32, sum:(C,), sumsq:(C,)).

    If in_scale/in_shift are given, relu(a*scale+shift) is applied to the A
    tile inside the kernel (the producer's BatchNorm+ReLU fused into this
    consumer matmul), saving one full HBM round-trip of the activation.
    """
    M, K = a.shape
    C = b.shape[1]
    tm = min(tm, _round_up(M, 8))
    Mp = _round_up(M, tm)
    if Mp != M:
        a = jnp.pad(a, ((0, Mp - M), (0, 0)))
    grid = Mp // tm
    fuse = in_scale is not None
    kernel = functools.partial(_mm_stats_kernel, fuse_input=fuse,
                               mask_rows=(Mp != M), m_real=M, tm=tm)
    vec = pl.BlockSpec((1, C), lambda i: (0, 0))
    in_specs = [pl.BlockSpec((tm, K), lambda i: (i, 0))]
    args = [a]
    if fuse:
        in_specs += [vec, vec]
        args += [in_scale, in_shift]
    in_specs += [pl.BlockSpec((K, C), lambda i: (0, 0))]
    args += [b]
    # TODO(synk): add a K grid axis + f32 VMEM accumulator (K-blocking) for
    # very-large-channel instantiations so the working set stays inside v7x's
    # scoped VMEM; not needed at ResNet channel sizes with tm=512.
    y, st = pl.pallas_call(
        kernel,
        out_shape=(jax.ShapeDtypeStruct((Mp, C), jnp.float32),
                   jax.ShapeDtypeStruct((grid, 2, C), jnp.float32)),
        grid_spec=pltpu.PrefetchScalarGridSpec(
            num_scalar_prefetch=0,
            grid=(grid,),
            in_specs=in_specs,
            out_specs=(pl.BlockSpec((tm, C), lambda i: (i, 0)),
                       pl.BlockSpec((1, 2, C), lambda i: (i, 0, 0)))),
        compiler_params=pltpu.CompilerParams(
            dimension_semantics=("parallel",)),  # per-block stats => race-free
    )(*args)
    return y[:M], st[:, 0, :].sum(axis=0), st[:, 1, :].sum(axis=0)


# ----------------------------------------------------------------------------
# Kernel 2: 3x3 conv (stride s, pad 1) as 9 contiguous phase-window matmuls
# accumulated in f32, one grid step per image, + per-image partial BN stats.
# ----------------------------------------------------------------------------
def _conv3x3_stats_kernel(ph_ref, w_ref, y_ref, st_ref, *, stride, Ho, Wo):
    s = stride
    C = w_ref.shape[-1]
    acc = jnp.zeros((Ho * Wo, C), jnp.float32)
    for kh in range(3):                       # statically unrolled 9 taps
        for kw in range(3):
            phase = (kh % s) * s + (kw % s)
            qh, qw = kh // s, kw // s
            a = ph_ref[0, phase, qh:qh + Ho, qw:qw + Wo, :]      # (Ho, Wo, C)
            acc = acc + jnp.dot(a.reshape(Ho * Wo, C), w_ref[kh * 3 + kw],
                                preferred_element_type=jnp.float32)
    y_ref[0] = acc
    st_ref[0, 0:1, :] = jnp.sum(acc, axis=0, keepdims=True)
    st_ref[0, 1:2, :] = jnp.sum(acc * acc, axis=0, keepdims=True)


def conv3x3_stats(ph, w9, *, stride, Ho, Wo):
    """ph:(N, s*s, Hq, Wq, C) bf16 phase images, w9:(9, C, C) bf16."""
    N, ss, Hq, Wq, C = ph.shape
    kernel = functools.partial(_conv3x3_stats_kernel, stride=stride,
                               Ho=Ho, Wo=Wo)
    # TODO(synk): tile Ho as an extra grid axis for very large images so the
    # per-image VMEM block stays bounded (not needed at ResNet-like sizes).
    y, st = pl.pallas_call(
        kernel,
        out_shape=(jax.ShapeDtypeStruct((N, Ho * Wo, C), jnp.float32),
                   jax.ShapeDtypeStruct((N, 2, C), jnp.float32)),
        grid_spec=pltpu.PrefetchScalarGridSpec(
            num_scalar_prefetch=0,
            grid=(N,),
            in_specs=[pl.BlockSpec((1, ss, Hq, Wq, C),
                                   lambda n: (n, 0, 0, 0, 0)),
                      pl.BlockSpec((9, C, C), lambda n: (0, 0, 0))],
            out_specs=(pl.BlockSpec((1, Ho * Wo, C), lambda n: (n, 0, 0)),
                       pl.BlockSpec((1, 2, C), lambda n: (n, 0, 0)))),
        compiler_params=pltpu.CompilerParams(
            dimension_semantics=("parallel",)),
    )(ph, w9)
    return y, st


# ----------------------------------------------------------------------------
# Kernel 3: fused epilogue  out = relu(bn3(y3) + bn_sc(y_sc))
# ----------------------------------------------------------------------------
def _bn_add_relu_kernel(y_ref, sc_ref, sh_ref, ys_ref, ssc_ref, ssh_ref, o_ref):
    main = y_ref[...] * sc_ref[...] + sh_ref[...]
    short = ys_ref[...] * ssc_ref[...] + ssh_ref[...]
    o_ref[...] = jnp.maximum(main + short, 0.0)


def bn_add_relu(y, sc, sh, ys, ssc, ssh, tm=EPI_TM):
    M, C = y.shape
    tm = min(tm, _round_up(M, 8))
    Mp = _round_up(M, tm)
    if Mp != M:
        pad = ((0, Mp - M), (0, 0))
        y, ys = jnp.pad(y, pad), jnp.pad(ys, pad)
    vec = pl.BlockSpec((1, C), lambda i: (0, 0))
    out = pl.pallas_call(
        _bn_add_relu_kernel,
        out_shape=jax.ShapeDtypeStruct((Mp, C), jnp.float32),
        grid_spec=pltpu.PrefetchScalarGridSpec(
            num_scalar_prefetch=0,
            grid=(Mp // tm,),
            in_specs=[pl.BlockSpec((tm, C), lambda i: (i, 0)), vec, vec,
                      pl.BlockSpec((tm, C), lambda i: (i, 0)), vec, vec],
            out_specs=pl.BlockSpec((tm, C), lambda i: (i, 0))),
        compiler_params=pltpu.CompilerParams(
            dimension_semantics=("parallel",)),
    )(y, sc, sh, ys, ssc, ssh)
    return out[:M]


# ----------------------------------------------------------------------------
# JAX glue: channel padding, weight layout, stride-phase shuffle, BN affine.
# ----------------------------------------------------------------------------
def bn_affine_from_stats(ssum, ssq, m_rows, gamma, beta, eps=EPS):
    """Training-mode BN: batch mean / biased var -> per-channel scale/shift."""
    mean = ssum / m_rows
    var = jnp.maximum(ssq / m_rows - mean * mean, 0.0)   # guard cancellation
    inv = gamma / jnp.sqrt(var + eps)
    return inv.reshape(1, -1), (beta - mean * inv).reshape(1, -1)


def _pad_vec(v, c):
    return jnp.pad(v, (0, c - v.shape[0]))


def w1x1_to_mat(w, kin, kout):           # (Cout,Cin,1,1) -> (kin, kout) padded
    m = jnp.transpose(w[:, :, 0, 0], (1, 0))
    return jnp.pad(m, ((0, kin - m.shape[0]), (0, kout - m.shape[1])))


def w3x3_to_taps(w, kin, kout):          # (Cout,Cin,3,3) -> (9, kin, kout)
    cout, cin = w.shape[0], w.shape[1]
    m = jnp.transpose(w, (2, 3, 1, 0)).reshape(9, cin, cout)  # tap = kh*3 + kw
    return jnp.pad(m, ((0, 0), (0, kin - cin), (0, kout - cout)))


# ----------------------------------------------------------------------------
# ConvBlock forward (Pallas)
# ----------------------------------------------------------------------------
@functools.partial(jax.jit, static_argnames=("stride",))
def conv_block_forward(x_nchw, params, stride):
    f32, bf16 = jnp.float32, jnp.bfloat16
    x = jnp.transpose(x_nchw, (0, 2, 3, 1)).astype(f32)          # NHWC
    N, H, W, Cin = x.shape
    Cmid = params["w1"].shape[0]
    Cout = params["w3"].shape[0]
    Cin_p, Cmid_p, Cout_p = (_round_up(c, LANE) for c in (Cin, Cmid, Cout))
    s = stride
    Ho = (H + 2 - 3) // s + 1
    Wo = (W + 2 - 3) // s + 1

    xp = jnp.pad(x, ((0, 0), (0, 0), (0, 0), (0, Cin_p - Cin)))

    # weights in matmul layout, channel-padded, bf16 (MXU native)
    w1 = w1x1_to_mat(params["w1"], Cin_p, Cmid_p).astype(bf16)
    w2 = w3x3_to_taps(params["w2"], Cmid_p, Cmid_p).astype(bf16)
    w3 = w1x1_to_mat(params["w3"], Cmid_p, Cout_p).astype(bf16)
    wsc = w1x1_to_mat(params["w_sc"], Cin_p, Cout_p).astype(bf16)
    # BN params padded with zeros => padded channels stay exactly zero.
    g1, b1 = _pad_vec(params["g1"], Cmid_p), _pad_vec(params["b1"], Cmid_p)
    g2, b2 = _pad_vec(params["g2"], Cmid_p), _pad_vec(params["b2"], Cmid_p)
    g3, b3 = _pad_vec(params["g3"], Cout_p), _pad_vec(params["b3"], Cout_p)
    gsc, bsc = _pad_vec(params["g_sc"], Cout_p), _pad_vec(params["b_sc"], Cout_p)

    # ---- conv1 (1x1) + BN stats ---------------------------------------------
    M1 = N * H * W
    a1 = xp.reshape(M1, Cin_p).astype(bf16)
    y1, sum1, ssq1 = matmul_stats(a1, w1)
    sc1, sh1 = bn_affine_from_stats(sum1, ssq1, M1, g1, b1)

    # ---- shortcut: 1x1 conv (stride s) + BN stats ----------------------------
    Msc = N * Ho * Wo
    asc = xp[:, ::s, ::s, :].reshape(Msc, Cin_p).astype(bf16)
    ysc, sums, ssqs = matmul_stats(asc, wsc)
    scs, shs = bn_affine_from_stats(sums, ssqs, Msc, gsc, bsc)

    # ---- bn1 + ReLU + spatial zero-pad + stride-phase shuffle (XLA glue) -----
    # TODO(synk): this layout pass (affine+relu+pad+phase-transpose) has no
    # clean BlockSpec expression because the conv's zero padding must follow
    # the ReLU; XLA fuses it into a single read of y1 / write of the bf16
    # phase tensor, which is the same HBM traffic an in-kernel fusion would do.
    h1 = jnp.maximum(y1 * sc1 + sh1, 0.0).reshape(N, H, W, Cmid_p)
    # Per-phase extents: each of the 9 taps reads a window at offset kh//s,
    # kw//s, so the phase image needs Ho + (2 // s) rows (and similarly cols).
    Hq, Wq = Ho + 2 // s, Wo + 2 // s
    hp = jnp.pad(h1, ((0, 0), (1, s * Hq - H - 1), (1, s * Wq - W - 1), (0, 0)))
    ph = hp.reshape(N, Hq, s, Wq, s, Cmid_p)
    ph = jnp.transpose(ph, (0, 2, 4, 1, 3, 5))
    ph = ph.reshape(N, s * s, Hq, Wq, Cmid_p).astype(bf16)

    # ---- conv2 (3x3, stride s, pad 1) + BN stats -----------------------------
    y2, st2 = conv3x3_stats(ph, w2, stride=s, Ho=Ho, Wo=Wo)
    M2 = N * Ho * Wo
    sc2, sh2 = bn_affine_from_stats(st2[:, 0, :].sum(0), st2[:, 1, :].sum(0),
                                    M2, g2, b2)
    y2f = y2.reshape(M2, Cmid_p)

    # ---- conv3 (1x1) with bn2+ReLU fused onto the A tile, + BN stats ---------
    y3, sum3, ssq3 = matmul_stats(y2f, w3, in_scale=sc2, in_shift=sh2)
    sc3, sh3 = bn_affine_from_stats(sum3, ssq3, M2, g3, b3)

    # ---- bn3 + bn_shortcut + residual add + ReLU (single fused epilogue) -----
    out = bn_add_relu(y3, sc3, sh3, ysc, scs, shs)
    out = out.reshape(N, Ho, Wo, Cout_p)[:, :, :, :Cout]
    return jnp.transpose(out, (0, 3, 1, 2))                      # back to NCHW


# ----------------------------------------------------------------------------
# Pure-JAX reference (lax conv + training-mode BN).  Conv inputs are quantized
# to bf16 at the same points as the kernels so the comparison isolates
# implementation correctness from the bf16 compute dtype.
# ----------------------------------------------------------------------------
def reference_forward(x, p, stride):
    bf16 = jnp.bfloat16

    def conv(h, w, s, pad):
        return lax.conv_general_dilated(
            h.astype(bf16), w.astype(bf16), (s, s), [(pad, pad), (pad, pad)],
            dimension_numbers=("NCHW", "OIHW", "NCHW"),
            preferred_element_type=jnp.float32)

    def bn(h, g, b):
        mean = h.mean(axis=(0, 2, 3), keepdims=True)
        var = h.var(axis=(0, 2, 3), keepdims=True)
        return (h - mean) / jnp.sqrt(var + EPS) * g.reshape(1, -1, 1, 1) \
            + b.reshape(1, -1, 1, 1)

    sc = bn(conv(x, p["w_sc"], stride, 0), p["g_sc"], p["b_sc"])
    h = jax.nn.relu(bn(conv(x, p["w1"], 1, 0), p["g1"], p["b1"]))
    h = jax.nn.relu(bn(conv(h, p["w2"], stride, 1), p["g2"], p["b2"]))
    h = bn(conv(h, p["w3"], 1, 0), p["g3"], p["b3"])
    return jax.nn.relu(h + sc)


# ----------------------------------------------------------------------------
if __name__ == "__main__":
    # ConvBlock(in=4, mid=4, stride=2) at small shapes.
    N, Cin, H, W = 2, 4, 16, 16
    Cmid, stride = 4, 2
    Cout = Cmid * 4                                   # expansion = 4

    key = jax.random.PRNGKey(0)
    ks = jax.random.split(key, 11)
    params = {
        "w1":   0.5 * jax.random.normal(ks[0], (Cmid, Cin, 1, 1), jnp.float32),
        "w2":   0.5 * jax.random.normal(ks[1], (Cmid, Cmid, 3, 3), jnp.float32),
        "w3":   0.5 * jax.random.normal(ks[2], (Cout, Cmid, 1, 1), jnp.float32),
        "w_sc": 0.5 * jax.random.normal(ks[3], (Cout, Cin, 1, 1), jnp.float32),
        "g1": 1.0 + 0.1 * jax.random.normal(ks[4], (Cmid,), jnp.float32),
        "b1": 0.1 * jax.random.normal(ks[5], (Cmid,), jnp.float32),
        "g2": 1.0 + 0.1 * jax.random.normal(ks[6], (Cmid,), jnp.float32),
        "b2": 0.1 * jax.random.normal(ks[7], (Cmid,), jnp.float32),
        "g3": 1.0 + 0.1 * jax.random.normal(ks[8], (Cout,), jnp.float32),
        "b3": 0.1 * jax.random.normal(ks[9], (Cout,), jnp.float32),
        "g_sc": jnp.ones((Cout,), jnp.float32),
        "b_sc": jnp.zeros((Cout,), jnp.float32),
    }
    x = jax.random.normal(ks[10], (N, Cin, H, W), jnp.float32)

    out = jax.block_until_ready(conv_block_forward(x, params, stride))
    assert out.shape == (N, Cout, H // stride, W // stride), out.shape

    ref = reference_forward(x, params, stride)
    diff = jnp.abs(out - ref)
    err_mean = float(jnp.mean(diff))
    err_max = float(jnp.max(diff))
    # bf16 matmul operands: train-mode BN divides by the batch std, which can
    # amplify a 1-ulp bf16 rounding difference on a handful of elements, so we
    # bound the mean error tightly and the max error loosely.
    assert err_mean < 3e-3 and err_max < 1e-1, (err_mean, err_max)

    print("KERNEL_OK")
</pallas_src>

<mosaic_0001>
module attributes {stable_mosaic.version = 11 : i64} {
  func.func @_mm_stats_kernel(%arg0: i32, %arg1: memref<512x128xbf16, #tpu.memory_space<vmem>>, %arg2: memref<128x128xbf16, #tpu.memory_space<vmem>>, %arg3: memref<512x128xf32, #tpu.memory_space<vmem>>, %arg4: memref<1x2x128xf32, #tpu.memory_space<vmem>>) attributes {dimension_semantics = [#tpu.dimension_semantics<parallel>], iteration_bounds = array<i64: 1>, scalar_prefetch = 0 : i64, scratch_operands = 0 : i64, tpu.core_type = #tpu.core_type<tc>, window_params = [{transform_indices = @transform_0, window_bounds = array<i64: 512, 128>}, {pipeline_mode = #tpu.pipeline_mode<synchronous>, transform_indices = @transform_1, window_bounds = array<i64: 128, 128>}, {transform_indices = @transform_2, window_bounds = array<i64: 512, 128>}, {transform_indices = @transform_3, window_bounds = array<i64: 1, 2, 128>}]} {
    %c0 = arith.constant 0 : index
    %c0_0 = arith.constant 0 : index
    %0 = vector.load %arg1[%c0, %c0_0] : memref<512x128xbf16, #tpu.memory_space<vmem>>, vector<512x128xbf16>
    %c0_1 = arith.constant 0 : index
    %c0_2 = arith.constant 0 : index
    %1 = vector.load %arg2[%c0_1, %c0_2] : memref<128x128xbf16, #tpu.memory_space<vmem>>, vector<128x128xbf16>
    %cst = arith.constant dense<0.000000e+00> : vector<512x128xf32>
    %2 = tpu.matmul %0, %1, %cst {dimension_numbers = #tpu.dot_dimension_numbers<[1], [0], [0], [1], [0, 0, 1, 1], [], []>} : vector<512x128xbf16>, vector<128x128xbf16>, vector<512x128xf32> -> vector<512x128xf32>
    %c0_3 = arith.constant 0 : index
    %c0_4 = arith.constant 0 : index
    %3 = vector.load %arg3[%c0_3, %c0_4] : memref<512x128xf32, #tpu.memory_space<vmem>>, vector<512x128xf32>
    tpu.vector_store %arg3[%c0_3, %c0_4], %2 {strides = array<i32>} : memref<512x128xf32, #tpu.memory_space<vmem>>, vector<512x128xf32>,
    %cst_5 = arith.constant dense<0.000000e+00> : vector<128xf32>
    %4 = vector.multi_reduction <add>, %2, %cst_5 [0] : vector<512x128xf32> to vector<128xf32>
    %5 = vector.shape_cast %4 : vector<128xf32> to vector<1x128xf32>
    %c0_6 = arith.constant 0 : index
    %c0_7 = arith.constant 0 : index
    %c0_8 = arith.constant 0 : index
    %6 = vector.load %arg4[%c0_6, %c0_7, %c0_8] : memref<1x2x128xf32, #tpu.memory_space<vmem>>, vector<1x1x128xf32>
    %7 = vector.shape_cast %6 : vector<1x1x128xf32> to vector<1x128xf32>
    %8 = vector.shape_cast %5 : vector<1x128xf32> to vector<1x1x128xf32>
    tpu.vector_store %arg4[%c0_6, %c0_7, %c0_8], %8 {strides = array<i32>} : memref<1x2x128xf32, #tpu.memory_space<vmem>>, vector<1x1x128xf32>,
    %9 = arith.mulf %2, %2 : vector<512x128xf32>
    %cst_9 = arith.constant dense<0.000000e+00> : vector<128xf32>
    %10 = vector.multi_reduction <add>, %9, %cst_9 [0] : vector<512x128xf32> to vector<128xf32>
    %11 = vector.shape_cast %10 : vector<128xf32> to vector<1x128xf32>
    %c0_10 = arith.constant 0 : index
    %c1 = arith.constant 1 : index
    %c0_11 = arith.constant 0 : index
    %12 = vector.load %arg4[%c0_10, %c1, %c0_11] : memref<1x2x128xf32, #tpu.memory_space<vmem>>, vector<1x1x128xf32>
    %13 = vector.shape_cast %12 : vector<1x1x128xf32> to vector<1x128xf32>
    %14 = vector.shape_cast %11 : vector<1x128xf32> to vector<1x1x128xf32>
    tpu.vector_store %arg4[%c0_10, %c1, %c0_11], %14 {strides = array<i32>} : memref<1x2x128xf32, #tpu.memory_space<vmem>>, vector<1x1x128xf32>,
    return
  }
  func.func @transform_0(%arg0: i32) -> (i32, i32) {
    %c0_i32 = arith.constant 0 : i32
    %c0_i32_0 = arith.constant 0 : i32
    return %arg0, %c0_i32 : i32, i32
  }
  func.func @transform_1(%arg0: i32) -> (i32, i32) {
    %c0_i32 = arith.constant 0 : i32
    %c0_i32_0 = arith.constant 0 : i32
    %c0_i32_1 = arith.constant 0 : i32
    return %c0_i32, %c0_i32_0 : i32, i32
  }
  func.func @transform_2(%arg0: i32) -> (i32, i32) {
    %c0_i32 = arith.constant 0 : i32
    %c0_i32_0 = arith.constant 0 : i32
    return %arg0, %c0_i32 : i32, i32
  }
  func.func @transform_3(%arg0: i32) -> (i32, i32, i32) {
    %c0_i32 = arith.constant 0 : i32
    %c0_i32_0 = arith.constant 0 : i32
    %c0_i32_1 = arith.constant 0 : i32
    return %arg0, %c0_i32, %c0_i32_0 : i32, i32, i32
  }
}

module attributes {stable_mosaic.version = 11 : i64} {
  func.func @_conv3x3_stats_kernel(%arg0: i32, %arg1: memref<1x4x9x9x128xbf16, #tpu.memory_space<vmem>>, %arg2: memref<9x128x128xbf16, #tpu.memory_space<vmem>>, %arg3: memref<1x64x128xf32, #tpu.memory_space<vmem>>, %arg4: memref<1x2x128xf32, #tpu.memory_space<vmem>>) attributes {dimension_semantics = [#tpu.dimension_semantics<parallel>], iteration_bounds = array<i64: 2>, scalar_prefetch = 0 : i64, scratch_operands = 0 : i64, tpu.core_type = #tpu.core_type<tc>, window_params = [{transform_indices = @transform_0, window_bounds = array<i64: 1, 4, 9, 9, 128>}, {pipeline_mode = #tpu.pipeline_mode<synchronous>, transform_indices = @transform_1, window_bounds = array<i64: 9, 128, 128>}, {transform_indices = @transform_2, window_bounds = array<i64: 1, 64, 128>}, {transform_indices = @transform_3, window_bounds = array<i64: 1, 2, 128>}]} {
    %cst = arith.constant 0.000000e+00 : f32
    %0 = vector.broadcast %cst : f32 to vector<64x128xf32>
    %c0 = arith.constant 0 : index
    %c0_0 = arith.constant 0 : index
    %c0_1 = arith.constant 0 : index
    %c0_2 = arith.constant 0 : index
    %c0_3 = arith.constant 0 : index
    %1 = vector.load %arg1[%c0, %c0_0, %c0_1, %c0_2, %c0_3] : memref<1x4x9x9x128xbf16, #tpu.memory_space<vmem>>, vector<1x1x8x8x128xbf16>
    %2 = vector.shape_cast %1 : vector<1x1x8x8x128xbf16> to vector<8x8x128xbf16>
    %3 = vector.shape_cast %2 : vector<8x8x128xbf16> to vector<64x128xbf16>
    %c0_4 = arith.constant 0 : index
    %c0_5 = arith.constant 0 : index
    %c0_6 = arith.constant 0 : index
    %4 = vector.load %arg2[%c0_4, %c0_5, %c0_6] : memref<9x128x128xbf16, #tpu.memory_space<vmem>>, vector<1x128x128xbf16>
    %5 = vector.shape_cast %4 : vector<1x128x128xbf16> to vector<128x128xbf16>
    %cst_7 = arith.constant dense<0.000000e+00> : vector<64x128xf32>
    %6 = tpu.matmul %3, %5, %cst_7 {dimension_numbers = #tpu.dot_dimension_numbers<[1], [0], [0], [1], [0, 0, 1, 1], [], []>} : vector<64x128xbf16>, vector<128x128xbf16>, vector<64x128xf32> -> vector<64x128xf32>
    %7 = arith.addf %0, %6 : vector<64x128xf32>
    %c0_8 = arith.constant 0 : index
    %c1 = arith.constant 1 : index
    %c0_9 = arith.constant 0 : index
    %c0_10 = arith.constant 0 : index
    %c0_11 = arith.constant 0 : index
    %8 = vector.load %arg1[%c0_8, %c1, %c0_9, %c0_10, %c0_11] : memref<1x4x9x9x128xbf16, #tpu.memory_space<vmem>>, vector<1x1x8x8x128xbf16>
    %9 = vector.shape_cast %8 : vector<1x1x8x8x128xbf16> to vector<8x8x128xbf16>
    %10 = vector.shape_cast %9 : vector<8x8x128xbf16> to vector<64x128xbf16>
    %c1_12 = arith.constant 1 : index
    %c0_13 = arith.constant 0 : index
    %c0_14 = arith.constant 0 : index
    %11 = vector.load %arg2[%c1_12, %c0_13, %c0_14] : memref<9x128x128xbf16, #tpu.memory_space<vmem>>, vector<1x128x128xbf16>
    %12 = vector.shape_cast %11 : vector<1x128x128xbf16> to vector<128x128xbf16>
    %cst_15 = arith.constant dense<0.000000e+00> : vector<64x128xf32>
    %13 = tpu.matmul %10, %12, %cst_15 {dimension_numbers = #tpu.dot_dimension_numbers<[1], [0], [0], [1], [0, 0, 1, 1], [], []>} : vector<64x128xbf16>, vector<128x128xbf16>, vector<64x128xf32> -> vector<64x128xf32>
    %14 = arith.addf %7, %13 : vector<64x128xf32>
    %c0_16 = arith.constant 0 : index
    %c0_17 = arith.constant 0 : index
    %c0_18 = arith.constant 0 : index
    %c1_19 = arith.constant 1 : index
    %c0_20 = arith.constant 0 : index
    %15 = vector.load %arg1[%c0_16, %c0_17, %c0_18, %c1_19, %c0_20] : memref<1x4x9x9x128xbf16, #tpu.memory_space<vmem>>, vector<1x1x8x8x128xbf16>
    %16 = vector.shape_cast %15 : vector<1x1x8x8x128xbf16> to vector<8x8x128xbf16>
    %17 = vector.shape_cast %16 : vector<8x8x128xbf16> to vector<64x128xbf16>
    %c2 = arith.constant 2 : index
    %c0_21 = arith.constant 0 : index
    %c0_22 = arith.constant 0 : index
    %18 = vector.load %arg2[%c2, %c0_21, %c0_22] : memref<9x128x128xbf16, #tpu.memory_space<vmem>>, vector<1x128x128xbf16>
    %19 = vector.shape_cast %18 : vector<1x128x128xbf16> to vector<128x128xbf16>
    %cst_23 = arith.constant dense<0.000000e+00> : vector<64x128xf32>
    %20 = tpu.matmul %17, %19, %cst_23 {dimension_numbers = #tpu.dot_dimension_numbers<[1], [0], [0], [1], [0, 0, 1, 1], [], []>} : vector<64x128xbf16>, vector<128x128xbf16>, vector<64x128xf32> -> vector<64x128xf32>
    %21 = arith.addf %14, %20 : vector<64x128xf32>
    %c0_24 = arith.constant 0 : index
    %c2_25 = arith.constant 2 : index
    %c0_26 = arith.constant 0 : index
    %c0_27 = arith.constant 0 : index
    %c0_28 = arith.constant 0 : index
    %22 = vector.load %arg1[%c0_24, %c2_25, %c0_26, %c0_27, %c0_28] : memref<1x4x9x9x128xbf16, #tpu.memory_space<vmem>>, vector<1x1x8x8x128xbf16>
    %23 = vector.shape_cast %22 : vector<1x1x8x8x128xbf16> to vector<8x8x128xbf16>
    %24 = vector.shape_cast %23 : vector<8x8x128xbf16> to vector<64x128xbf16>
    %c3 = arith.constant 3 : index
    %c0_29 = arith.constant 0 : index
    %c0_30 = arith.constant 0 : index
    %25 = vector.load %arg2[%c3, %c0_29, %c0_30] : memref<9x128x128xbf16, #tpu.memory_space<vmem>>, vector<1x128x128xbf16>
    %26 = vector.shape_cast %25 : vector<1x128x128xbf16> to vector<128x128xbf16>
    %cst_31 = arith.constant dense<0.000000e+00> : vector<64x128xf32>
    %27 = tpu.matmul %24, %26, %cst_31 {dimension_numbers = #tpu.dot_dimension_numbers<[1], [0], [0], [1], [0, 0, 1, 1], [], []>} : vector<64x128xbf16>, vector<128x128xbf16>, vector<64x128xf32> -> vector<64x128xf32>
    %28 = arith.addf %21, %27 : vector<64x128xf32>
    %c0_32 = arith.constant 0 : index
    %c3_33 = arith.constant 3 : index
    %c0_34 = arith.constant 0 : index
    %c0_35 = arith.constant 0 : index
    %c0_36 = arith.constant 0 : index
    %29 = vector.load %arg1[%c0_32, %c3_33, %c0_34, %c0_35, %c0_36] : memref<1x4x9x9x128xbf16, #tpu.memory_space<vmem>>, vector<1x1x8x8x128xbf16>
    %30 = vector.shape_cast %29 : vector<1x1x8x8x128xbf16> to vector<8x8x128xbf16>
    %31 = vector.shape_cast %30 : vector<8x8x128xbf16> to vector<64x128xbf16>
    %c4 = arith.constant 4 : index
    %c0_37 = arith.constant 0 : index
    %c0_38 = arith.constant 0 : index
    %32 = vector.load %arg2[%c4, %c0_37, %c0_38] : memref<9x128x128xbf16, #tpu.memory_space<vmem>>, vector<1x128x128xbf16>
    %33 = vector.shape_cast %32 : vector<1x128x128xbf16> to vector<128x128xbf16>
    %cst_39 = arith.constant dense<0.000000e+00> : vector<64x128xf32>
    %34 = tpu.matmul %31, %33, %cst_39 {dimension_numbers = #tpu.dot_dimension_numbers<[1], [0], [0], [1], [0, 0, 1, 1], [], []>} : vector<64x128xbf16>, vector<128x128xbf16>, vector<64x128xf32> -> vector<64x128xf32>
    %35 = arith.addf %28, %34 : vector<64x128xf32>
    %c0_40 = arith.constant 0 : index
    %c2_41 = arith.constant 2 : index
    %c0_42 = arith.constant 0 : index
    %c1_43 = arith.constant 1 : index
    %c0_44 = arith.constant 0 : index
    %36 = vector.load %arg1[%c0_40, %c2_41, %c0_42, %c1_43, %c0_44] : memref<1x4x9x9x128xbf16, #tpu.memory_space<vmem>>, vector<1x1x8x8x128xbf16>
    %37 = vector.shape_cast %36 : vector<1x1x8x8x128xbf16> to vector<8x8x128xbf16>
    %38 = vector.shape_cast %37 : vector<8x8x128xbf16> to vector<64x128xbf16>
    %c5 = arith.constant 5 : index
    %c0_45 = arith.constant 0 : index
    %c0_46 = arith.constant 0 : index
    %39 = vector.load %arg2[%c5, %c0_45, %c0_46] : memref<9x128x128xbf16, #tpu.memory_space<vmem>>, vector<1x128x128xbf16>
    %40 = vector.shape_cast %39 : vector<1x128x128xbf16> to vector<128x128xbf16>
    %cst_47 = arith.constant dense<0.000000e+00> : vector<64x128xf32>
    %41 = tpu.matmul %38, %40, %cst_47 {dimension_numbers = #tpu.dot_dimension_numbers<[1], [0], [0], [1], [0, 0, 1, 1], [], []>} : vector<64x128xbf16>, vector<128x128xbf16>, vector<64x128xf32> -> vector<64x128xf32>
    %42 = arith.addf %35, %41 : vector<64x128xf32>
    %c0_48 = arith.constant 0 : index
    %c0_49 = arith.constant 0 : index
    %c1_50 = arith.constant 1 : index
    %c0_51 = arith.constant 0 : index
    %c0_52 = arith.constant 0 : index
    %43 = vector.load %arg1[%c0_48, %c0_49, %c1_50, %c0_51, %c0_52] : memref<1x4x9x9x128xbf16, #tpu.memory_space<vmem>>, vector<1x1x8x8x128xbf16>
    %44 = vector.shape_cast %43 : vector<1x1x8x8x128xbf16> to vector<8x8x128xbf16>
    %45 = vector.shape_cast %44 : vector<8x8x128xbf16> to vector<64x128xbf16>
    %c6 = arith.constant 6 : index
    %c0_53 = arith.constant 0 : index
    %c0_54 = arith.constant 0 : index
    %46 = vector.load %arg2[%c6, %c0_53, %c0_54] : memref<9x128x128xbf16, #tpu.memory_space<vmem>>, vector<1x128x128xbf16>
    %47 = vector.shape_cast %46 : vector<1x128x128xbf16> to vector<128x128xbf16>
    %cst_55 = arith.constant dense<0.000000e+00> : vector<64x128xf32>
    %48 = tpu.matmul %45, %47, %cst_55 {dimension_numbers = #tpu.dot_dimension_numbers<[1], [0], [0], [1], [0, 0, 1, 1], [], []>} : vector<64x128xbf16>, vector<128x128xbf16>, vector<64x128xf32> -> vector<64x128xf32>
    %49 = arith.addf %42, %48 : vector<64x128xf32>
    %c0_56 = arith.constant 0 : index
    %c1_57 = arith.constant 1 : index
    %c1_58 = arith.constant 1 : index
    %c0_59 = arith.constant 0 : index
    %c0_60 = arith.constant 0 : index
    %50 = vector.load %arg1[%c0_56, %c1_57, %c1_58, %c0_59, %c0_60] : memref<1x4x9x9x128xbf16, #tpu.memory_space<vmem>>, vector<1x1x8x8x128xbf16>
    %51 = vector.shape_cast %50 : vector<1x1x8x8x128xbf16> to vector<8x8x128xbf16>
    %52 = vector.shape_cast %51 : vector<8x8x128xbf16> to vector<64x128xbf16>
    %c7 = arith.constant 7 : index
    %c0_61 = arith.constant 0 : index
    %c0_62 = arith.constant 0 : index
    %53 = vector.load %arg2[%c7, %c0_61, %c0_62] : memref<9x128x128xbf16, #tpu.memory_space<vmem>>, vector<1x128x128xbf16>
    %54 = vector.shape_cast %53 : vector<1x128x128xbf16> to vector<128x128xbf16>
    %cst_63 = arith.constant dense<0.000000e+00> : vector<64x128xf32>
    %55 = tpu.matmul %52, %54, %cst_63 {dimension_numbers = #tpu.dot_dimension_numbers<[1], [0], [0], [1], [0, 0, 1, 1], [], []>} : vector<64x128xbf16>, vector<128x128xbf16>, vector<64x128xf32> -> vector<64x128xf32>
    %56 = arith.addf %49, %55 : vector<64x128xf32>
    %c0_64 = arith.constant 0 : index
    %c0_65 = arith.constant 0 : index
    %c1_66 = arith.constant 1 : index
    %c1_67 = arith.constant 1 : index
    %c0_68 = arith.constant 0 : index
    %57 = vector.load %arg1[%c0_64, %c0_65, %c1_66, %c1_67, %c0_68] : memref<1x4x9x9x128xbf16, #tpu.memory_space<vmem>>, vector<1x1x8x8x128xbf16>
    %58 = vector.shape_cast %57 : vector<1x1x8x8x128xbf16> to vector<8x8x128xbf16>
    %59 = vector.shape_cast %58 : vector<8x8x128xbf16> to vector<64x128xbf16>
    %c8 = arith.constant 8 : index
    %c0_69 = arith.constant 0 : index
    %c0_70 = arith.constant 0 : index
    %60 = vector.load %arg2[%c8, %c0_69, %c0_70] : memref<9x128x128xbf16, #tpu.memory_space<vmem>>, vector<1x128x128xbf16>
    %61 = vector.shape_cast %60 : vector<1x128x128xbf16> to vector<128x128xbf16>
    %cst_71 = arith.constant dense<0.000000e+00> : vector<64x128xf32>
    %62 = tpu.matmul %59, %61, %cst_71 {dimension_numbers = #tpu.dot_dimension_numbers<[1], [0], [0], [1], [0, 0, 1, 1], [], []>} : vector<64x128xbf16>, vector<128x128xbf16>, vector<64x128xf32> -> vector<64x128xf32>
    %63 = arith.addf %56, %62 : vector<64x128xf32>
    %c0_72 = arith.constant 0 : index
    %c0_73 = arith.constant 0 : index
    %c0_74 = arith.constant 0 : index
    %64 = vector.load %arg3[%c0_72, %c0_73, %c0_74] : memref<1x64x128xf32, #tpu.memory_space<vmem>>, vector<1x64x128xf32>
    %65 = vector.shape_cast %64 : vector<1x64x128xf32> to vector<64x128xf32>
    %66 = vector.shape_cast %63 : vector<64x128xf32> to vector<1x64x128xf32>
    tpu.vector_store %arg3[%c0_72, %c0_73, %c0_74], %66 {strides = array<i32>} : memref<1x64x128xf32, #tpu.memory_space<vmem>>, vector<1x64x128xf32>,
    %cst_75 = arith.constant dense<0.000000e+00> : vector<128xf32>
    %67 = vector.multi_reduction <add>, %63, %cst_75 [0] : vector<64x128xf32> to vector<128xf32>
    %68 = vector.shape_cast %67 : vector<128xf32> to vector<1x128xf32>
    %c0_76 = arith.constant 0 : index
    %c0_77 = arith.constant 0 : index
    %c0_78 = arith.constant 0 : index
    %69 = vector.load %arg4[%c0_76, %c0_77, %c0_78] : memref<1x2x128xf32, #tpu.memory_space<vmem>>, vector<1x1x128xf32>
    %70 = vector.shape_cast %69 : vector<1x1x128xf32> to vector<1x128xf32>
    %71 = vector.shape_cast %68 : vector<1x128xf32> to vector<1x1x128xf32>
    tpu.vector_store %arg4[%c0_76, %c0_77, %c0_78], %71 {strides = array<i32>} : memref<1x2x128xf32, #tpu.memory_space<vmem>>, vector<1x1x128xf32>,
    %72 = arith.mulf %63, %63 : vector<64x128xf32>
    %cst_79 = arith.constant dense<0.000000e+00> : vector<128xf32>
    %73 = vector.multi_reduction <add>, %72, %cst_79 [0] : vector<64x128xf32> to vector<128xf32>
    %74 = vector.shape_cast %73 : vector<128xf32> to vector<1x128xf32>
    %c0_80 = arith.constant 0 : index
    %c1_81 = arith.constant 1 : index
    %c0_82 = arith.constant 0 : index
    %75 = vector.load %arg4[%c0_80, %c1_81, %c0_82] : memref<1x2x128xf32, #tpu.memory_space<vmem>>, vector<1x1x128xf32>
    %76 = vector.shape_cast %75 : vector<1x1x128xf32> to vector<1x128xf32>
    %77 = vector.shape_cast %74 : vector<1x128xf32> to vector<1x1x128xf32>
    tpu.vector_store %arg4[%c0_80, %c1_81, %c0_82], %77 {strides = array<i32>} : memref<1x2x128xf32, #tpu.memory_space<vmem>>, vector<1x1x128xf32>,
    return
  }
  func.func @transform_0(%arg0: i32) -> (i32, i32, i32, i32, i32) {
    %c0_i32 = arith.constant 0 : i32
    %c0_i32_0 = arith.constant 0 : i32
    %c0_i32_1 = arith.constant 0 : i32
    %c0_i32_2 = arith.constant 0 : i32
    %c0_i32_3 = arith.constant 0 : i32
    return %arg0, %c0_i32, %c0_i32_0, %c0_i32_1, %c0_i32_2 : i32, i32, i32, i32, i32
  }
  func.func @transform_1(%arg0: i32) -> (i32, i32, i32) {
    %c0_i32 = arith.constant 0 : i32
    %c0_i32_0 = arith.constant 0 : i32
    %c0_i32_1 = arith.constant 0 : i32
    %c0_i32_2 = arith.constant 0 : i32
    return %c0_i32, %c0_i32_0, %c0_i32_1 : i32, i32, i32
  }
  func.func @transform_2(%arg0: i32) -> (i32, i32, i32) {
    %c0_i32 = arith.constant 0 : i32
    %c0_i32_0 = arith.constant 0 : i32
    %c0_i32_1 = arith.constant 0 : i32
    return %arg0, %c0_i32, %c0_i32_0 : i32, i32, i32
  }
  func.func @transform_3(%arg0: i32) -> (i32, i32, i32) {
    %c0_i32 = arith.constant 0 : i32
    %c0_i32_0 = arith.constant 0 : i32
    %c0_i32_1 = arith.constant 0 : i32
    return %arg0, %c0_i32, %c0_i32_0 : i32, i32, i32
  }
}

module attributes {stable_mosaic.version = 11 : i64} {
  func.func @_mm_stats_kernel(%arg0: i32, %arg1: memref<128x128xf32, #tpu.memory_space<vmem>>, %arg2: memref<1x128xf32, #tpu.memory_space<vmem>>, %arg3: memref<1x128xf32, #tpu.memory_space<vmem>>, %arg4: memref<128x128xbf16, #tpu.memory_space<vmem>>, %arg5: memref<128x128xf32, #tpu.memory_space<vmem>>, %arg6: memref<1x2x128xf32, #tpu.memory_space<vmem>>) attributes {dimension_semantics = [#tpu.dimension_semantics<parallel>], iteration_bounds = array<i64: 1>, scalar_prefetch = 0 : i64, scratch_operands = 0 : i64, tpu.core_type = #tpu.core_type<tc>, window_params = [{transform_indices = @transform_0, window_bounds = array<i64: 128, 128>}, {pipeline_mode = #tpu.pipeline_mode<synchronous>, transform_indices = @transform_1, window_bounds = array<i64: 1, 128>}, {pipeline_mode = #tpu.pipeline_mode<synchronous>, transform_indices = @transform_2, window_bounds = array<i64: 1, 128>}, {pipeline_mode = #tpu.pipeline_mode<synchronous>, transform_indices = @transform_3, window_bounds = array<i64: 128, 128>}, {transform_indices = @transform_4, window_bounds = array<i64: 128, 128>}, {transform_indices = @transform_5, window_bounds = array<i64: 1, 2, 128>}]} {
    %c0 = arith.constant 0 : index
    %c0_0 = arith.constant 0 : index
    %0 = vector.load %arg1[%c0, %c0_0] : memref<128x128xf32, #tpu.memory_space<vmem>>, vector<128x128xf32>
    %c0_1 = arith.constant 0 : index
    %c0_2 = arith.constant 0 : index
    %1 = vector.load %arg2[%c0_1, %c0_2] : memref<1x128xf32, #tpu.memory_space<vmem>>, vector<1x128xf32>
    %2 = vector.broadcast %1 : vector<1x128xf32> to vector<128x128xf32>
    %3 = arith.mulf %0, %2 : vector<128x128xf32>
    %c0_3 = arith.constant 0 : index
    %c0_4 = arith.constant 0 : index
    %4 = vector.load %arg3[%c0_3, %c0_4] : memref<1x128xf32, #tpu.memory_space<vmem>>, vector<1x128xf32>
    %5 = vector.broadcast %4 : vector<1x128xf32> to vector<128x128xf32>
    %6 = arith.addf %3, %5 : vector<128x128xf32>
    %cst = arith.constant 0.000000e+00 : f32
    %7 = vector.broadcast %cst : f32 to vector<128x128xf32>
    %8 = arith.maximumf %6, %7 : vector<128x128xf32>
    %9 = arith.truncf %8 : vector<128x128xf32> to vector<128x128xbf16>
    %c0_5 = arith.constant 0 : index
    %c0_6 = arith.constant 0 : index
    %10 = vector.load %arg4[%c0_5, %c0_6] : memref<128x128xbf16, #tpu.memory_space<vmem>>, vector<128x128xbf16>
    %cst_7 = arith.constant dense<0.000000e+00> : vector<128x128xf32>
    %11 = tpu.matmul %9, %10, %cst_7 {dimension_numbers = #tpu.dot_dimension_numbers<[1], [0], [0], [1], [0, 0, 1, 1], [], []>} : vector<128x128xbf16>, vector<128x128xbf16>, vector<128x128xf32> -> vector<128x128xf32>
    %c0_8 = arith.constant 0 : index
    %c0_9 = arith.constant 0 : index
    %12 = vector.load %arg5[%c0_8, %c0_9] : memref<128x128xf32, #tpu.memory_space<vmem>>, vector<128x128xf32>
    tpu.vector_store %arg5[%c0_8, %c0_9], %11 {strides = array<i32>} : memref<128x128xf32, #tpu.memory_space<vmem>>, vector<128x128xf32>,
    %cst_10 = arith.constant dense<0.000000e+00> : vector<128xf32>
    %13 = vector.multi_reduction <add>, %11, %cst_10 [0] : vector<128x128xf32> to vector<128xf32>
    %14 = vector.shape_cast %13 : vector<128xf32> to vector<1x128xf32>
    %c0_11 = arith.constant 0 : index
    %c0_12 = arith.constant 0 : index
    %c0_13 = arith.constant 0 : index
    %15 = vector.load %arg6[%c0_11, %c0_12, %c0_13] : memref<1x2x128xf32, #tpu.memory_space<vmem>>, vector<1x1x128xf32>
    %16 = vector.shape_cast %15 : vector<1x1x128xf32> to vector<1x128xf32>
    %17 = vector.shape_cast %14 : vector<1x128xf32> to vector<1x1x128xf32>
    tpu.vector_store %arg6[%c0_11, %c0_12, %c0_13], %17 {strides = array<i32>} : memref<1x2x128xf32, #tpu.memory_space<vmem>>, vector<1x1x128xf32>,
    %18 = arith.mulf %11, %11 : vector<128x128xf32>
    %cst_14 = arith.constant dense<0.000000e+00> : vector<128xf32>
    %19 = vector.multi_reduction <add>, %18, %cst_14 [0] : vector<128x128xf32> to vector<128xf32>
    %20 = vector.shape_cast %19 : vector<128xf32> to vector<1x128xf32>
    %c0_15 = arith.constant 0 : index
    %c1 = arith.constant 1 : index
    %c0_16 = arith.constant 0 : index
    %21 = vector.load %arg6[%c0_15, %c1, %c0_16] : memref<1x2x128xf32, #tpu.memory_space<vmem>>, vector<1x1x128xf32>
    %22 = vector.shape_cast %21 : vector<1x1x128xf32> to vector<1x128xf32>
    %23 = vector.shape_cast %20 : vector<1x128xf32> to vector<1x1x128xf32>
    tpu.vector_store %arg6[%c0_15, %c1, %c0_16], %23 {strides = array<i32>} : memref<1x2x128xf32, #tpu.memory_space<vmem>>, vector<1x1x128xf32>,
    return
  }
  func.func @transform_0(%arg0: i32) -> (i32, i32) {
    %c0_i32 = arith.constant 0 : i32
    %c0_i32_0 = arith.constant 0 : i32
    return %arg0, %c0_i32 : i32, i32
  }
  func.func @transform_1(%arg0: i32) -> (i32, i32) {
    %c0_i32 = arith.constant 0 : i32
    %c0_i32_0 = arith.constant 0 : i32
    %c0_i32_1 = arith.constant 0 : i32
    return %c0_i32, %c0_i32_0 : i32, i32
  }
  func.func @transform_2(%arg0: i32) -> (i32, i32) {
    %c0_i32 = arith.constant 0 : i32
    %c0_i32_0 = arith.constant 0 : i32
    %c0_i32_1 = arith.constant 0 : i32
    return %c0_i32, %c0_i32_0 : i32, i32
  }
  func.func @transform_3(%arg0: i32) -> (i32, i32) {
    %c0_i32 = arith.constant 0 : i32
    %c0_i32_0 = arith.constant 0 : i32
    %c0_i32_1 = arith.constant 0 : i32
    return %c0_i32, %c0_i32_0 : i32, i32
  }
  func.func @transform_4(%arg0: i32) -> (i32, i32) {
    %c0_i32 = arith.constant 0 : i32
    %c0_i32_0 = arith.constant 0 : i32
    return %arg0, %c0_i32 : i32, i32
  }
  func.func @transform_5(%arg0: i32) -> (i32, i32, i32) {
    %c0_i32 = arith.constant 0 : i32
    %c0_i32_0 = arith.constant 0 : i32
    %c0_i32_1 = arith.constant 0 : i32
    return %arg0, %c0_i32, %c0_i32_0 : i32, i32, i32
  }
}

module attributes {stable_mosaic.version = 11 : i64} {
  func.func @_mm_stats_kernel(%arg0: i32, %arg1: memref<128x128xbf16, #tpu.memory_space<vmem>>, %arg2: memref<128x128xbf16, #tpu.memory_space<vmem>>, %arg3: memref<128x128xf32, #tpu.memory_space<vmem>>, %arg4: memref<1x2x128xf32, #tpu.memory_space<vmem>>) attributes {dimension_semantics = [#tpu.dimension_semantics<parallel>], iteration_bounds = array<i64: 1>, scalar_prefetch = 0 : i64, scratch_operands = 0 : i64, tpu.core_type = #tpu.core_type<tc>, window_params = [{transform_indices = @transform_0, window_bounds = array<i64: 128, 128>}, {pipeline_mode = #tpu.pipeline_mode<synchronous>, transform_indices = @transform_1, window_bounds = array<i64: 128, 128>}, {transform_indices = @transform_2, window_bounds = array<i64: 128, 128>}, {transform_indices = @transform_3, window_bounds = array<i64: 1, 2, 128>}]} {
    %c0 = arith.constant 0 : index
    %c0_0 = arith.constant 0 : index
    %0 = vector.load %arg1[%c0, %c0_0] : memref<128x128xbf16, #tpu.memory_space<vmem>>, vector<128x128xbf16>
    %c0_1 = arith.constant 0 : index
    %c0_2 = arith.constant 0 : index
    %1 = vector.load %arg2[%c0_1, %c0_2] : memref<128x128xbf16, #tpu.memory_space<vmem>>, vector<128x128xbf16>
    %cst = arith.constant dense<0.000000e+00> : vector<128x128xf32>
    %2 = tpu.matmul %0, %1, %cst {dimension_numbers = #tpu.dot_dimension_numbers<[1], [0], [0], [1], [0, 0, 1, 1], [], []>} : vector<128x128xbf16>, vector<128x128xbf16>, vector<128x128xf32> -> vector<128x128xf32>
    %c0_3 = arith.constant 0 : index
    %c0_4 = arith.constant 0 : index
    %3 = vector.load %arg3[%c0_3, %c0_4] : memref<128x128xf32, #tpu.memory_space<vmem>>, vector<128x128xf32>
    tpu.vector_store %arg3[%c0_3, %c0_4], %2 {strides = array<i32>} : memref<128x128xf32, #tpu.memory_space<vmem>>, vector<128x128xf32>,
    %cst_5 = arith.constant dense<0.000000e+00> : vector<128xf32>
    %4 = vector.multi_reduction <add>, %2, %cst_5 [0] : vector<128x128xf32> to vector<128xf32>
    %5 = vector.shape_cast %4 : vector<128xf32> to vector<1x128xf32>
    %c0_6 = arith.constant 0 : index
    %c0_7 = arith.constant 0 : index
    %c0_8 = arith.constant 0 : index
    %6 = vector.load %arg4[%c0_6, %c0_7, %c0_8] : memref<1x2x128xf32, #tpu.memory_space<vmem>>, vector<1x1x128xf32>
    %7 = vector.shape_cast %6 : vector<1x1x128xf32> to vector<1x128xf32>
    %8 = vector.shape_cast %5 : vector<1x128xf32> to vector<1x1x128xf32>
    tpu.vector_store %arg4[%c0_6, %c0_7, %c0_8], %8 {strides = array<i32>} : memref<1x2x128xf32, #tpu.memory_space<vmem>>, vector<1x1x128xf32>,
    %9 = arith.mulf %2, %2 : vector<128x128xf32>
    %cst_9 = arith.constant dense<0.000000e+00> : vector<128xf32>
    %10 = vector.multi_reduction <add>, %9, %cst_9 [0] : vector<128x128xf32> to vector<128xf32>
    %11 = vector.shape_cast %10 : vector<128xf32> to vector<1x128xf32>
    %c0_10 = arith.constant 0 : index
    %c1 = arith.constant 1 : index
    %c0_11 = arith.constant 0 : index
    %12 = vector.load %arg4[%c0_10, %c1, %c0_11] : memref<1x2x128xf32, #tpu.memory_space<vmem>>, vector<1x1x128xf32>
    %13 = vector.shape_cast %12 : vector<1x1x128xf32> to vector<1x128xf32>
    %14 = vector.shape_cast %11 : vector<1x128xf32> to vector<1x1x128xf32>
    tpu.vector_store %arg4[%c0_10, %c1, %c0_11], %14 {strides = array<i32>} : memref<1x2x128xf32, #tpu.memory_space<vmem>>, vector<1x1x128xf32>,
    return
  }
  func.func @transform_0(%arg0: i32) -> (i32, i32) {
    %c0_i32 = arith.constant 0 : i32
    %c0_i32_0 = arith.constant 0 : i32
    return %arg0, %c0_i32 : i32, i32
  }
  func.func @transform_1(%arg0: i32) -> (i32, i32) {
    %c0_i32 = arith.constant 0 : i32
    %c0_i32_0 = arith.constant 0 : i32
    %c0_i32_1 = arith.constant 0 : i32
    return %c0_i32, %c0_i32_0 : i32, i32
  }
  func.func @transform_2(%arg0: i32) -> (i32, i32) {
    %c0_i32 = arith.constant 0 : i32
    %c0_i32_0 = arith.constant 0 : i32
    return %arg0, %c0_i32 : i32, i32
  }
  func.func @transform_3(%arg0: i32) -> (i32, i32, i32) {
    %c0_i32 = arith.constant 0 : i32
    %c0_i32_0 = arith.constant 0 : i32
    %c0_i32_1 = arith.constant 0 : i32
    return %arg0, %c0_i32, %c0_i32_0 : i32, i32, i32
  }
}

module attributes {stable_mosaic.version = 11 : i64} {
  func.func @_bn_add_relu_kernel(%arg0: i32, %arg1: memref<128x128xf32, #tpu.memory_space<vmem>>, %arg2: memref<1x128xf32, #tpu.memory_space<vmem>>, %arg3: memref<1x128xf32, #tpu.memory_space<vmem>>, %arg4: memref<128x128xf32, #tpu.memory_space<vmem>>, %arg5: memref<1x128xf32, #tpu.memory_space<vmem>>, %arg6: memref<1x128xf32, #tpu.memory_space<vmem>>, %arg7: memref<128x128xf32, #tpu.memory_space<vmem>>) attributes {dimension_semantics = [#tpu.dimension_semantics<parallel>], iteration_bounds = array<i64: 1>, scalar_prefetch = 0 : i64, scratch_operands = 0 : i64, tpu.core_type = #tpu.core_type<tc>, window_params = [{transform_indices = @transform_0, window_bounds = array<i64: 128, 128>}, {pipeline_mode = #tpu.pipeline_mode<synchronous>, transform_indices = @transform_1, window_bounds = array<i64: 1, 128>}, {pipeline_mode = #tpu.pipeline_mode<synchronous>, transform_indices = @transform_2, window_bounds = array<i64: 1, 128>}, {transform_indices = @transform_3, window_bounds = array<i64: 128, 128>}, {pipeline_mode = #tpu.pipeline_mode<synchronous>, transform_indices = @transform_4, window_bounds = array<i64: 1, 128>}, {pipeline_mode = #tpu.pipeline_mode<synchronous>, transform_indices = @transform_5, window_bounds = array<i64: 1, 128>}, {transform_indices = @transform_6, window_bounds = array<i64: 128, 128>}]} {
    %c0 = arith.constant 0 : index
    %c0_0 = arith.constant 0 : index
    %0 = vector.load %arg1[%c0, %c0_0] : memref<128x128xf32, #tpu.memory_space<vmem>>, vector<128x128xf32>
    %c0_1 = arith.constant 0 : index
    %c0_2 = arith.constant 0 : index
    %1 = vector.load %arg2[%c0_1, %c0_2] : memref<1x128xf32, #tpu.memory_space<vmem>>, vector<1x128xf32>
    %2 = vector.broadcast %1 : vector<1x128xf32> to vector<128x128xf32>
    %3 = arith.mulf %0, %2 : vector<128x128xf32>
    %c0_3 = arith.constant 0 : index
    %c0_4 = arith.constant 0 : index
    %4 = vector.load %arg3[%c0_3, %c0_4] : memref<1x128xf32, #tpu.memory_space<vmem>>, vector<1x128xf32>
    %5 = vector.broadcast %4 : vector<1x128xf32> to vector<128x128xf32>
    %6 = arith.addf %3, %5 : vector<128x128xf32>
    %c0_5 = arith.constant 0 : index
    %c0_6 = arith.constant 0 : index
    %7 = vector.load %arg4[%c0_5, %c0_6] : memref<128x128xf32, #tpu.memory_space<vmem>>, vector<128x128xf32>
    %c0_7 = arith.constant 0 : index
    %c0_8 = arith.constant 0 : index
    %8 = vector.load %arg5[%c0_7, %c0_8] : memref<1x128xf32, #tpu.memory_space<vmem>>, vector<1x128xf32>
    %9 = vector.broadcast %8 : vector<1x128xf32> to vector<128x128xf32>
    %10 = arith.mulf %7, %9 : vector<128x128xf32>
    %c0_9 = arith.constant 0 : index
    %c0_10 = arith.constant 0 : index
    %11 = vector.load %arg6[%c0_9, %c0_10] : memref<1x128xf32, #tpu.memory_space<vmem>>, vector<1x128xf32>
    %12 = vector.broadcast %11 : vector<1x128xf32> to vector<128x128xf32>
    %13 = arith.addf %10, %12 : vector<128x128xf32>
    %14 = arith.addf %6, %13 : vector<128x128xf32>
    %cst = arith.constant 0.000000e+00 : f32
    %15 = vector.broadcast %cst : f32 to vector<128x128xf32>
    %16 = arith.maximumf %14, %15 : vector<128x128xf32>
    %c0_11 = arith.constant 0 : index
    %c0_12 = arith.constant 0 : index
    %17 = vector.load %arg7[%c0_11, %c0_12] : memref<128x128xf32, #tpu.memory_space<vmem>>, vector<128x128xf32>
    tpu.vector_store %arg7[%c0_11, %c0_12], %16 {strides = array<i32>} : memref<128x128xf32, #tpu.memory_space<vmem>>, vector<128x128xf32>,
    return
  }
  func.func @transform_0(%arg0: i32) -> (i32, i32) {
    %c0_i32 = arith.constant 0 : i32
    %c0_i32_0 = arith.constant 0 : i32
    return %arg0, %c0_i32 : i32, i32
  }
  func.func @transform_1(%arg0: i32) -> (i32, i32) {
    %c0_i32 = arith.constant 0 : i32
    %c0_i32_0 = arith.constant 0 : i32
    %c0_i32_1 = arith.constant 0 : i32
    return %c0_i32, %c0_i32_0 : i32, i32
  }
  func.func @transform_2(%arg0: i32) -> (i32, i32) {
    %c0_i32 = arith.constant 0 : i32
    %c0_i32_0 = arith.constant 0 : i32
    %c0_i32_1 = arith.constant 0 : i32
    return %c0_i32, %c0_i32_0 : i32, i32
  }
  func.func @transform_3(%arg0: i32) -> (i32, i32) {
    %c0_i32 = arith.constant 0 : i32
    %c0_i32_0 = arith.constant 0 : i32
    return %arg0, %c0_i32 : i32, i32
  }
  func.func @transform_4(%arg0: i32) -> (i32, i32) {
    %c0_i32 = arith.constant 0 : i32
    %c0_i32_0 = arith.constant 0 : i32
    %c0_i32_1 = arith.constant 0 : i32
    return %c0_i32, %c0_i32_0 : i32, i32
  }
  func.func @transform_5(%arg0: i32) -> (i32, i32) {
    %c0_i32 = arith.constant 0 : i32
    %c0_i32_0 = arith.constant 0 : i32
    %c0_i32_1 = arith.constant 0 : i32
    return %c0_i32, %c0_i32_0 : i32, i32
  }
  func.func @transform_6(%arg0: i32) -> (i32, i32) {
    %c0_i32 = arith.constant 0 : i32
    %c0_i32_0 = arith.constant 0 : i32
    return %arg0, %c0_i32 : i32, i32
  }
}

</mosaic_0001>

<bundles_post_ra>
// kernel: conv_block_forward.5
= control target key start
LH: loop header
LB: loop body
LE: loop exit
PB: predicated region body
PF: predicated region fallthrough
CT: control target
= control target key end

     0   :  { %s1645_s1 = inlined_call_operand.vmem [shape: bf16[128,128], index: 1, kind: input, shape index: {}]   ;;  %s1646_s0 = inlined_call_operand.vmem [shape: bf16[512,128], index: 0, kind: input, shape index: {}]   ;;  %s1647_s2 = inlined_call_operand.vmem [shape: f32[512,128], index: 2, kind: output, shape index: {0}]   ;;  %s1648_s3 = inlined_call_operand.vmem [shape: f32[1,2,128], index: 3, kind: output, shape index: {1}]  }
   0x1   :  { %v1075_v0 = vld [vmem:[%s1645_s1 + $0x38] sm:$0xff]   ;;  %v1076_v1 = vld [vmem:[%s1645_s1 + $0x30] sm:$0xff]   ;;  %v1077_v2 = vld [vmem:[%s1645_s1 + $0x28] sm:$0xff]  }
   0x2   :  { %979 = vmatprep.subr.bf16.mxu0 %v1075_v0  ;;  %1059 = vmatprep.subr.bf16.mxu1 %v1075_v0  ;;  %v1078_v3 = vld [vmem:[%s1645_s1 + $0x20] sm:$0xff]   ;;  %v1079_v5 = vld [vmem:[%s1645_s1 + $0x18] sm:$0xff]   ;;  %v1080_v6 = vld [vmem:[%s1645_s1 + $0x10] sm:$0xff]  }
   0x3   :  { %980 = vmatpush3.bf16.msra.mxu0 %v1075_v0  ;;  %1067 = vmatpush3.bf16.msra.mxu1 %v1075_v0  ;;  %v1083_v4 = vld [vmem:[%s1646_s0] sm:$0xff]   ;;  %v1081_v7 = vld [vmem:[%s1645_s1 + $0x8] sm:$0xff]   ;;  %v1085_v11 = vld [vmem:[%s1646_s0 + $0x10] sm:$0xff]  }
   0x4   :  { %981 = vmatprep.subr.bf16.mxu0 %v1076_v1  ;;  %1060 = vmatprep.subr.bf16.mxu1 %v1076_v1  ;;  %v1082_v8 = vld [vmem:[%s1645_s1] sm:$0xff]   ;;  %v1084_v10 = vld [vmem:[%s1646_s0 + $0x8] sm:$0xff]   ;;  %v1101_v13 = vld [vmem:[%s1646_s0 + $0x90] sm:$0xff]  }
   0x5   :  { %995 = vmatprep.mubr.bf16.mxu0 %v1083_v4  ;;  %v1099_v9 = vld [vmem:[%s1646_s0 + $0x80] sm:$0xff]   ;;  %v1100_v12 = vld [vmem:[%s1646_s0 + $0x88] sm:$0xff]   ;;  %v1086_v14 = vld [vmem:[%s1646_s0 + $0x18] sm:$0xff]  }
   0x6   :  { %1027 = vmatprep.mubr.bf16.mxu1 %v1099_v9  ;;  %v1087_v15 = vld [vmem:[%s1646_s0 + $0x20] sm:$0xff]   ;;  %v1102_v16 = vld [vmem:[%s1646_s0 + $0x98] sm:$0xff]   ;;  %v1088_v18 = vld [vmem:[%s1646_s0 + $0x28] sm:$0xff]  }
   0x7   :  { %982 = vmatpush3.bf16.msra.mxu0 %v1076_v1  ;;  %1068 = vmatpush3.bf16.msra.mxu1 %v1076_v1  ;;  %v1103_v17 = vld [vmem:[%s1646_s0 + $0xa0] sm:$0xff]   ;;  %v1104_v19 = vld [vmem:[%s1646_s0 + $0xa8] sm:$0xff]   ;;  %v1089_v20 = vld [vmem:[%s1646_s0 + $0x30] sm:$0xff]  }
   0x8   :  { %983 = vmatprep.subr.bf16.mxu0 %v1077_v2  ;;  %1061 = vmatprep.subr.bf16.mxu1 %v1077_v2  ;;  %v1105_v21 = vld [vmem:[%s1646_s0 + $0xb0] sm:$0xff]   ;;  %v1090_v22 = vld [vmem:[%s1646_s0 + $0x38] sm:$0xff]   ;;  %v1091_v24 = vld [vmem:[%s1646_s0 + $0x40] sm:$0xff]  }
   0x9   :  { %v1106_v23 = vld [vmem:[%s1646_s0 + $0xb8] sm:$0xff]   ;;  %v1107_v25 = vld [vmem:[%s1646_s0 + $0xc0] sm:$0xff]   ;;  %v1092_v26 = vld [vmem:[%s1646_s0 + $0x48] sm:$0xff]  }
   0xa   :  { %v1108_v27 = vld [vmem:[%s1646_s0 + $0xc8] sm:$0xff]   ;;  %v1093_v28 = vld [vmem:[%s1646_s0 + $0x50] sm:$0xff]   ;;  %v1094_v30 = vld [vmem:[%s1646_s0 + $0x58] sm:$0xff]  }
   0xb   :  { %984 = vmatpush3.bf16.msra.mxu0 %v1077_v2  ;;  %1069 = vmatpush3.bf16.msra.mxu1 %v1077_v2  ;;  %v1109_v29 = vld [vmem:[%s1646_s0 + $0xd0] sm:$0xff]   ;;  %v1110_v31 = vld [vmem:[%s1646_s0 + $0xd8] sm:$0xff]   ;;  %v1095_v32 = vld [vmem:[%s1646_s0 + $0x60] sm:$0xff]  }
   0xc   :  { %985 = vmatprep.subr.bf16.mxu0 %v1078_v3  ;;  %1062 = vmatprep.subr.bf16.mxu1 %v1078_v3  ;;  %v1111_v33 = vld [vmem:[%s1646_s0 + $0xe0] sm:$0xff]   ;;  %v1096_v34 = vld [vmem:[%s1646_s0 + $0x68] sm:$0xff]   ;;  %v1097_v36 = vld [vmem:[%s1646_s0 + $0x70] sm:$0xff]  }
   0xd   :  { %v1112_v35 = vld [vmem:[%s1646_s0 + $0xe8] sm:$0xff]   ;;  %v1113_v37 = vld [vmem:[%s1646_s0 + $0xf0] sm:$0xff]   ;;  %v1098_v38 = vld [vmem:[%s1646_s0 + $0x78] sm:$0xff]  }
   0xe   :  { %v1114_v39 = vld [vmem:[%s1646_s0 + $0xf8] sm:$0xff]  }
   0xf   :  { %986 = vmatpush3.bf16.msra.mxu0 %v1078_v3  ;;  %1070 = vmatpush3.bf16.msra.mxu1 %v1078_v3 }
  0x10   :  { %987 = vmatprep.subr.bf16.mxu0 %v1079_v5  ;;  %1063 = vmatprep.subr.bf16.mxu1 %v1079_v5 }
  0x13   :  { %988 = vmatpush3.bf16.msra.mxu0 %v1079_v5  ;;  %1071 = vmatpush3.bf16.msra.mxu1 %v1079_v5 }
  0x14   :  { %989 = vmatprep.subr.bf16.mxu0 %v1080_v6  ;;  %1064 = vmatprep.subr.bf16.mxu1 %v1080_v6 }
  0x17   :  { %990 = vmatpush3.bf16.msra.mxu0 %v1080_v6  ;;  %1072 = vmatpush3.bf16.msra.mxu1 %v1080_v6 }
  0x18   :  { %991 = vmatprep.subr.bf16.mxu0 %v1081_v7  ;;  %1065 = vmatprep.subr.bf16.mxu1 %v1081_v7 }
  0x1b   :  { %992 = vmatpush3.bf16.msra.mxu0 %v1081_v7  ;;  %1073 = vmatpush3.bf16.msra.mxu1 %v1081_v7 }
  0x1c   :  { %993 = vmatprep.subr.bf16.mxu0 %v1082_v8  ;;  %1066 = vmatprep.subr.bf16.mxu1 %v1082_v8 }
  0x1f   :  { %994 = vmatpush3.bf16.msra.mxu0 %v1082_v8  ;;  %1074 = vmatpush3.bf16.msra.mxu1 %v1082_v8 }
  0x22   :  { %996 = vmatmul.mubr.bf16.vlgmr.msra.gmra.mxu0 %v1084_v10  ;;  %1028 = vmatmul.mubr.bf16.vlgmr.msra.gmra.mxu1 %v1100_v12 }
  0x23   :  { %999 = vmatprep.mubr.bf16.mxu0 %v1085_v11  ;;  %1031 = vmatprep.mubr.bf16.mxu1 %v1101_v13 }
  0x2a   :  { %1000 = vmatmul.mubr.bf16.gmra.mxu0 %v1086_v14  ;;  %1032 = vmatmul.mubr.bf16.gmra.mxu1 %v1102_v16 }
  0x2b   :  { %1003 = vmatprep.mubr.bf16.mxu0 %v1087_v15  ;;  %1035 = vmatprep.mubr.bf16.mxu1 %v1103_v17 }
  0x32   :  { %1004 = vmatmul.mubr.bf16.gmra.mxu0 %v1088_v18  ;;  %1036 = vmatmul.mubr.bf16.gmra.mxu1 %v1104_v19 }
  0x33   :  { %1007 = vmatprep.mubr.bf16.mxu0 %v1089_v20  ;;  %1039 = vmatprep.mubr.bf16.mxu1 %v1105_v21 }
  0x3a   :  { %1008 = vmatmul.mubr.bf16.gmra.mxu0 %v1090_v22  ;;  %1040 = vmatmul.mubr.bf16.gmra.mxu1 %v1106_v23 }
  0x3b   :  { %1011 = vmatprep.mubr.bf16.mxu0 %v1091_v24  ;;  %1043 = vmatprep.mubr.bf16.mxu1 %v1107_v25 }
  0x42   :  { %1012 = vmatmul.mubr.bf16.gmra.mxu0 %v1092_v26  ;;  %1044 = vmatmul.mubr.bf16.gmra.mxu1 %v1108_v27 }
  0x43   :  { %1015 = vmatprep.mubr.bf16.mxu0 %v1093_v28  ;;  %1047 = vmatprep.mubr.bf16.mxu1 %v1109_v29 }
  0x4a   :  { %1016 = vmatmul.mubr.bf16.gmra.mxu0 %v1094_v30  ;;  %1048 = vmatmul.mubr.bf16.gmra.mxu1 %v1110_v31 }
  0x4b   :  { %1019 = vmatprep.mubr.bf16.mxu0 %v1095_v32  ;;  %1051 = vmatprep.mubr.bf16.mxu1 %v1111_v33 }
  0x52   :  { %1020 = vmatmul.mubr.bf16.gmra.mxu0 %v1096_v34  ;;  %1052 = vmatmul.mubr.bf16.gmra.mxu1 %v1112_v35 }
  0x53   :  { %1023 = vmatprep.mubr.bf16.mxu0 %v1097_v36  ;;  %1055 = vmatprep.mubr.bf16.mxu1 %v1113_v37 }
  0x5a   :  { %1024 = vmatmul.mubr.bf16.gmra.mxu0 %v1098_v38  ;;  %1056 = vmatmul.mubr.bf16.gmra.mxu1 %v1114_v39 }
  0xe2   :  { %v997_v40 = vpop.f32.mrf.mxu0  ;;  %v1255_v41 = vpop.f32.mrf.mxu1 }
  0xe3   :  { %625 = vst [vmem:[%s1647_s2 + $0x10] sm:$0xff] %v997_v40  ;;  %657 = vst [vmem:[%s1647_s2 + $0x110] sm:$0xff] %v1255_v41  ;;  %v759_v53 = vmul.f32 %v997_v40, %v997_v40 }
  0xe4   :  { %v368_v42 = vpop.f32.mrf.mxu0  ;;  %v1264_v43 = vpop.f32.mrf.mxu1 }
  0xe5   :  { %623 = vst [vmem:[%s1647_s2] sm:$0xff] %v368_v42  ;;  %655 = vst [vmem:[%s1647_s2 + $0x100] sm:$0xff] %v1264_v43  ;;  %v757_v48 = vmul.f32 %v368_v42, %v368_v42 }
  0xe6   :  { %v998_v44 = vpop.f32.mrf.mxu0  ;;  %v1273_v45 = vpop.f32.mrf.mxu1 }
  0xe7   :  { %626 = vst [vmem:[%s1647_s2 + $0x18] sm:$0xff] %v998_v44  ;;  %658 = vst [vmem:[%s1647_s2 + $0x118] sm:$0xff] %v1273_v45  ;;  %v760_v58 = vmul.f32 %v998_v44, %v998_v44 }
  0xe8   :  { %v371_v46 = vpop.f32.mrf.mxu0  ;;  %v1282_v47 = vpop.f32.mrf.mxu1 }
  0xe9   :  { %624 = vst [vmem:[%s1647_s2 + $0x8] sm:$0xff] %v371_v46  ;;  %v687_v49 = vadd.f32 %v371_v46, %v368_v42  ;;  %v758_v50 = vmul.f32 %v371_v46, %v371_v46  ;;  %656 = vst [vmem:[%s1647_s2 + $0x108] sm:$0xff] %v1282_v47 }
  0xea   :  { %v1001_v51 = vpop.f32.mrf.mxu0  ;;  %v1291_v52 = vpop.f32.mrf.mxu1 }
  0xeb   :  { %v688_v54 = vadd.f32 %v997_v40, %v687_v49  ;;  %v821_v55 = vadd.f32 %v758_v50, %v757_v48  ;;  %629 = vst [vmem:[%s1647_s2 + $0x30] sm:$0xff] %v1001_v51  ;;  %661 = vst [vmem:[%s1647_s2 + $0x130] sm:$0xff] %v1291_v52  ;;  %v763_v9 = vmul.f32 %v1001_v51, %v1001_v51 }
  0xec   :  { %v384_v56 = vpop.f32.mrf.mxu0  ;;  %v1300_v57 = vpop.f32.mrf.mxu1 }
  0xed   :  { %v822_v59 = vadd.f32 %v821_v55, %v759_v53  ;;  %627 = vst [vmem:[%s1647_s2 + $0x20] sm:$0xff] %v384_v56  ;;  %v689_v60 = vadd.f32 %v998_v44, %v688_v54  ;;  %659 = vst [vmem:[%s1647_s2 + $0x120] sm:$0xff] %v1300_v57  ;;  %v761_v0 = vmul.f32 %v384_v56, %v384_v56 }
  0xee   :  { %v1002_v61 = vpop.f32.mrf.mxu0  ;;  %v1309_v62 = vpop.f32.mrf.mxu1 }
  0xef   :  { %v690_v63 = vadd.f32 %v689_v60, %v384_v56  ;;  %v823_v1 = vadd.f32 %v822_v59, %v760_v58  ;;  %630 = vst [vmem:[%s1647_s2 + $0x38] sm:$0xff] %v1002_v61  ;;  %662 = vst [vmem:[%s1647_s2 + $0x138] sm:$0xff] %v1309_v62  ;;  %v764_v14 = vmul.f32 %v1002_v61, %v1002_v61 }
  0xf0   :  { %v387_v2 = vpop.f32.mrf.mxu0  ;;  %v1318_v3 = vpop.f32.mrf.mxu1 }
  0xf1   :  { %v824_v4 = vadd.f32 %v823_v1, %v761_v0  ;;  %628 = vst [vmem:[%s1647_s2 + $0x28] sm:$0xff] %v387_v2  ;;  %v691_v5 = vadd.f32 %v690_v63, %v387_v2  ;;  %v762_v6 = vmul.f32 %v387_v2, %v387_v2  ;;  %660 = vst [vmem:[%s1647_s2 + $0x128] sm:$0xff] %v1318_v3 }
  0xf2   :  { %v1005_v7 = vpop.f32.mrf.mxu0  ;;  %v1327_v8 = vpop.f32.mrf.mxu1 }
  0xf3   :  { %v692_v10 = vadd.f32 %v1001_v51, %v691_v5  ;;  %v825_v11 = vadd.f32 %v824_v4, %v762_v6  ;;  %633 = vst [vmem:[%s1647_s2 + $0x50] sm:$0xff] %v1005_v7  ;;  %665 = vst [vmem:[%s1647_s2 + $0x150] sm:$0xff] %v1327_v8  ;;  %v767_v29 = vmul.f32 %v1005_v7, %v1005_v7 }
  0xf4   :  { %v400_v12 = vpop.f32.mrf.mxu0  ;;  %v1336_v13 = vpop.f32.mrf.mxu1 }
  0xf5   :  { %v826_v15 = vadd.f32 %v825_v11, %v763_v9  ;;  %631 = vst [vmem:[%s1647_s2 + $0x40] sm:$0xff] %v400_v12  ;;  %v693_v16 = vadd.f32 %v1002_v61, %v692_v10  ;;  %663 = vst [vmem:[%s1647_s2 + $0x140] sm:$0xff] %v1336_v13  ;;  %v765_v20 = vmul.f32 %v400_v12, %v400_v12 }
  0xf6   :  { %v1006_v17 = vpop.f32.mrf.mxu0  ;;  %v1345_v18 = vpop.f32.mrf.mxu1 }
  0xf7   :  { %v694_v19 = vadd.f32 %v693_v16, %v400_v12  ;;  %v827_v21 = vadd.f32 %v826_v15, %v764_v14  ;;  %634 = vst [vmem:[%s1647_s2 + $0x58] sm:$0xff] %v1006_v17  ;;  %666 = vst [vmem:[%s1647_s2 + $0x158] sm:$0xff] %v1345_v18  ;;  %v768_v34 = vmul.f32 %v1006_v17, %v1006_v17 }
  0xf8   :  { %v403_v22 = vpop.f32.mrf.mxu0  ;;  %v1354_v23 = vpop.f32.mrf.mxu1 }
  0xf9   :  { %v828_v24 = vadd.f32 %v827_v21, %v765_v20  ;;  %632 = vst [vmem:[%s1647_s2 + $0x48] sm:$0xff] %v403_v22  ;;  %v695_v25 = vadd.f32 %v694_v19, %v403_v22  ;;  %v766_v26 = vmul.f32 %v403_v22, %v403_v22  ;;  %664 = vst [vmem:[%s1647_s2 + $0x148] sm:$0xff] %v1354_v23 }
  0xfa   :  { %v1009_v27 = vpop.f32.mrf.mxu0  ;;  %v1363_v28 = vpop.f32.mrf.mxu1 }
  0xfb   :  { %v696_v30 = vadd.f32 %v1005_v7, %v695_v25  ;;  %v829_v31 = vadd.f32 %v828_v24, %v766_v26  ;;  %637 = vst [vmem:[%s1647_s2 + $0x70] sm:$0xff] %v1009_v27  ;;  %669 = vst [vmem:[%s1647_s2 + $0x170] sm:$0xff] %v1363_v28  ;;  %v771_v54 = vmul.f32 %v1009_v27, %v1009_v27 }
  0xfc   :  { %v416_v32 = vpop.f32.mrf.mxu0  ;;  %v1372_v33 = vpop.f32.mrf.mxu1 }
  0xfd   :  { %v830_v35 = vadd.f32 %v829_v31, %v767_v29  ;;  %635 = vst [vmem:[%s1647_s2 + $0x60] sm:$0xff] %v416_v32  ;;  %v697_v36 = vadd.f32 %v1006_v17, %v696_v30  ;;  %667 = vst [vmem:[%s1647_s2 + $0x160] sm:$0xff] %v1372_v33  ;;  %v769_v40 = vmul.f32 %v416_v32, %v416_v32 }
  0xfe   :  { %v1010_v37 = vpop.f32.mrf.mxu0  ;;  %v1381_v38 = vpop.f32.mrf.mxu1 }
  0xff   :  { %v698_v39 = vadd.f32 %v697_v36, %v416_v32  ;;  %v831_v42 = vadd.f32 %v830_v35, %v768_v34  ;;  %638 = vst [vmem:[%s1647_s2 + $0x78] sm:$0xff] %v1010_v37  ;;  %670 = vst [vmem:[%s1647_s2 + $0x178] sm:$0xff] %v1381_v38  ;;  %v772_v60 = vmul.f32 %v1010_v37, %v1010_v37 }
 0x100   :  { %v419_v44 = vpop.f32.mrf.mxu0  ;;  %v1390_v46 = vpop.f32.mrf.mxu1 }
 0x101   :  { %v832_v48 = vadd.f32 %v831_v42, %v769_v40  ;;  %636 = vst [vmem:[%s1647_s2 + $0x68] sm:$0xff] %v419_v44  ;;  %v699_v49 = vadd.f32 %v698_v39, %v419_v44  ;;  %v770_v50 = vmul.f32 %v419_v44, %v419_v44  ;;  %668 = vst [vmem:[%s1647_s2 + $0x168] sm:$0xff] %v1390_v46 }
 0x102   :  { %v1013_v51 = vpop.f32.mrf.mxu0  ;;  %v1399_v53 = vpop.f32.mrf.mxu1 }
 0x103   :  { %v700_v55 = vadd.f32 %v1009_v27, %v699_v49  ;;  %v833_v56 = vadd.f32 %v832_v48, %v770_v50  ;;  %641 = vst [vmem:[%s1647_s2 + $0x90] sm:$0xff] %v1013_v51  ;;  %673 = vst [vmem:[%s1647_s2 + $0x190] sm:$0xff] %v1399_v53  ;;  %v775_v15 = vmul.f32 %v1013_v51, %v1013_v51 }
 0x104   :  { %v432_v58 = vpop.f32.mrf.mxu0  ;;  %v1408_v59 = vpop.f32.mrf.mxu1 }
 0x105   :  { %v834_v61 = vadd.f32 %v833_v56, %v771_v54  ;;  %639 = vst [vmem:[%s1647_s2 + $0x80] sm:$0xff] %v432_v58  ;;  %v701_v63 = vadd.f32 %v1010_v37, %v700_v55  ;;  %671 = vst [vmem:[%s1647_s2 + $0x180] sm:$0xff] %v1408_v59  ;;  %v773_v4 = vmul.f32 %v432_v58, %v432_v58 }
 0x106   :  { %v1014_v0 = vpop.f32.mrf.mxu0  ;;  %v1417_v1 = vpop.f32.mrf.mxu1 }
 0x107   :  { %v702_v2 = vadd.f32 %v701_v63, %v432_v58  ;;  %v835_v5 = vadd.f32 %v834_v61, %v772_v60  ;;  %642 = vst [vmem:[%s1647_s2 + $0x98] sm:$0xff] %v1014_v0  ;;  %674 = vst [vmem:[%s1647_s2 + $0x198] sm:$0xff] %v1417_v1  ;;  %v776_v21 = vmul.f32 %v1014_v0, %v1014_v0 }
 0x108   :  { %v435_v6 = vpop.f32.mrf.mxu0  ;;  %v1426_v7 = vpop.f32.mrf.mxu1 }
 0x109   :  { %v836_v9 = vadd.f32 %v835_v5, %v773_v4  ;;  %640 = vst [vmem:[%s1647_s2 + $0x88] sm:$0xff] %v435_v6  ;;  %v703_v10 = vadd.f32 %v702_v2, %v435_v6  ;;  %v774_v11 = vmul.f32 %v435_v6, %v435_v6  ;;  %672 = vst [vmem:[%s1647_s2 + $0x188] sm:$0xff] %v1426_v7 }
 0x10a   :  { %v1017_v12 = vpop.f32.mrf.mxu0  ;;  %v1435_v14 = vpop.f32.mrf.mxu1 }
 0x10b   :  { %v704_v16 = vadd.f32 %v1013_v51, %v703_v10  ;;  %v837_v17 = vadd.f32 %v836_v9, %v774_v11  ;;  %645 = vst [vmem:[%s1647_s2 + $0xb0] sm:$0xff] %v1017_v12  ;;  %677 = vst [vmem:[%s1647_s2 + $0x1b0] sm:$0xff] %v1435_v14  ;;  %v779_v40 = vmul.f32 %v1017_v12, %v1017_v12 }
 0x10c   :  { %v448_v19 = vpop.f32.mrf.mxu0  ;;  %v1444_v20 = vpop.f32.mrf.mxu1 }
 0x10d   :  { %v838_v22 = vadd.f32 %v837_v17, %v775_v15  ;;  %643 = vst [vmem:[%s1647_s2 + $0xa0] sm:$0xff] %v448_v19  ;;  %v705_v24 = vadd.f32 %v1014_v0, %v704_v16  ;;  %675 = vst [vmem:[%s1647_s2 + $0x1a0] sm:$0xff] %v1444_v20  ;;  %v777_v29 = vmul.f32 %v448_v19, %v448_v19 }
 0x10e   :  { %v1018_v25 = vpop.f32.mrf.mxu0  ;;  %v1453_v26 = vpop.f32.mrf.mxu1 }
 0x10f   :  { %v706_v27 = vadd.f32 %v705_v24, %v448_v19  ;;  %v839_v30 = vadd.f32 %v838_v22, %v776_v21  ;;  %646 = vst [vmem:[%s1647_s2 + $0xb8] sm:$0xff] %v1018_v25  ;;  %678 = vst [vmem:[%s1647_s2 + $0x1b8] sm:$0xff] %v1453_v26  ;;  %v780_v50 = vmul.f32 %v1018_v25, %v1018_v25 }
 0x110   :  { %v451_v31 = vpop.f32.mrf.mxu0  ;;  %v1462_v32 = vpop.f32.mrf.mxu1 }
 0x111   :  { %v840_v34 = vadd.f32 %v839_v30, %v777_v29  ;;  %644 = vst [vmem:[%s1647_s2 + $0xa8] sm:$0xff] %v451_v31  ;;  %v707_v35 = vadd.f32 %v706_v27, %v451_v31  ;;  %v778_v36 = vmul.f32 %v451_v31, %v451_v31  ;;  %676 = vst [vmem:[%s1647_s2 + $0x1a8] sm:$0xff] %v1462_v32 }
 0x112   :  { %v1021_v37 = vpop.f32.mrf.mxu0  ;;  %v1471_v39 = vpop.f32.mrf.mxu1 }
 0x113   :  { %v708_v42 = vadd.f32 %v1017_v12, %v707_v35  ;;  %v841_v44 = vadd.f32 %v840_v34, %v778_v36  ;;  %649 = vst [vmem:[%s1647_s2 + $0xd0] sm:$0xff] %v1021_v37  ;;  %681 = vst [vmem:[%s1647_s2 + $0x1d0] sm:$0xff] %v1471_v39  ;;  %v783_v10 = vmul.f32 %v1021_v37, %v1021_v37 }
 0x114   :  { %v464_v48 = vpop.f32.mrf.mxu0  ;;  %v1480_v49 = vpop.f32.mrf.mxu1 }
 0x115   :  { %v842_v51 = vadd.f32 %v841_v44, %v779_v40  ;;  %647 = vst [vmem:[%s1647_s2 + $0xc0] sm:$0xff] %v464_v48  ;;  %v709_v54 = vadd.f32 %v1018_v25, %v708_v42  ;;  %679 = vst [vmem:[%s1647_s2 + $0x1c0] sm:$0xff] %v1480_v49  ;;  %v781_v60 = vmul.f32 %v464_v48, %v464_v48 }
 0x116   :  { %v1022_v55 = vpop.f32.mrf.mxu0  ;;  %v1489_v56 = vpop.f32.mrf.mxu1 }
 0x117   :  { %v710_v58 = vadd.f32 %v709_v54, %v464_v48  ;;  %v843_v61 = vadd.f32 %v842_v51, %v780_v50  ;;  %650 = vst [vmem:[%s1647_s2 + $0xd8] sm:$0xff] %v1022_v55  ;;  %682 = vst [vmem:[%s1647_s2 + $0x1d8] sm:$0xff] %v1489_v56  ;;  %v784_v17 = vmul.f32 %v1022_v55, %v1022_v55 }
 0x118   :  { %v467_v63 = vpop.f32.mrf.mxu0  ;;  %v1498_v0 = vpop.f32.mrf.mxu1  ;;  %v789_v51 = vmul.f32 %v1264_v43, %v1264_v43 }
 0x119   :  { %v844_v2 = vadd.f32 %v843_v61, %v781_v60  ;;  %648 = vst [vmem:[%s1647_s2 + $0xc8] sm:$0xff] %v467_v63  ;;  %v711_v4 = vadd.f32 %v710_v58, %v467_v63  ;;  %v782_v5 = vmul.f32 %v467_v63, %v467_v63  ;;  %680 = vst [vmem:[%s1647_s2 + $0x1c8] sm:$0xff] %v1498_v0 }
 0x11a   :  { %v1025_v6 = vpop.f32.mrf.mxu0  ;;  %v1507_v9 = vpop.f32.mrf.mxu1  ;;  %v790_v60 = vmul.f32 %v1282_v47, %v1282_v47  ;;  %v791_v63 = vmul.f32 %v1255_v41, %v1255_v41 }
 0x11b   :  { %v712_v11 = vadd.f32 %v1021_v37, %v711_v4  ;;  %v845_v12 = vadd.f32 %v844_v2, %v782_v5  ;;  %653 = vst [vmem:[%s1647_s2 + $0xf0] sm:$0xff] %v1025_v6  ;;  %685 = vst [vmem:[%s1647_s2 + $0x1f0] sm:$0xff] %v1507_v9  ;;  %v787_v37 = vmul.f32 %v1025_v6, %v1025_v6 }
 0x11c   :  { %v480_v15 = vpop.f32.mrf.mxu0  ;;  %v1516_v16 = vpop.f32.mrf.mxu1  ;;  %v792_v5 = vmul.f32 %v1273_v45, %v1273_v45 }
 0x11d   :  { %v846_v19 = vadd.f32 %v845_v12, %v783_v10  ;;  %651 = vst [vmem:[%s1647_s2 + $0xe0] sm:$0xff] %v480_v15  ;;  %v713_v21 = vadd.f32 %v1022_v55, %v712_v11  ;;  %683 = vst [vmem:[%s1647_s2 + $0x1e0] sm:$0xff] %v1516_v16  ;;  %v785_v27 = vmul.f32 %v480_v15, %v480_v15 }
 0x11e   :  { %v1026_v22 = vpop.f32.mrf.mxu0  ;;  %v1525_v24 = vpop.f32.mrf.mxu1  ;;  %v793_v11 = vmul.f32 %v1300_v57, %v1300_v57 }
 0x11f   :  { %v714_v25 = vadd.f32 %v713_v21, %v480_v15  ;;  %v847_v29 = vadd.f32 %v846_v19, %v784_v17  ;;  %654 = vst [vmem:[%s1647_s2 + $0xf8] sm:$0xff] %v1026_v22  ;;  %686 = vst [vmem:[%s1647_s2 + $0x1f8] sm:$0xff] %v1525_v24  ;;  %v788_v44 = vmul.f32 %v1026_v22, %v1026_v22 }
 0x120   :  { %v483_v30 = vpop.f32.mrf.mxu0  ;;  %v1534_v31 = vpop.f32.mrf.mxu1  ;;  %v794_v17 = vmul.f32 %v1318_v3, %v1318_v3 }
 0x121   :  { %v848_v34 = vadd.f32 %v847_v29, %v785_v27  ;;  %652 = vst [vmem:[%s1647_s2 + $0xe8] sm:$0xff] %v483_v30  ;;  %v715_v35 = vadd.f32 %v714_v25, %v483_v30  ;;  %v786_v36 = vmul.f32 %v483_v30, %v483_v30  ;;  %684 = vst [vmem:[%s1647_s2 + $0x1e8] sm:$0xff] %v1534_v31 }
 0x122   :  { %v797_v27 = vmul.f32 %v1336_v13, %v1336_v13 }
 0x123   :  { %v716_v40 = vadd.f32 %v1025_v6, %v715_v35  ;;  %v849_v42 = vadd.f32 %v848_v34, %v786_v36  ;;  %v798_v34 = vmul.f32 %v1354_v23, %v1354_v23 }
 0x125   :  { %v717_v48 = vadd.f32 %v1026_v22, %v716_v40  ;;  %v850_v50 = vadd.f32 %v849_v42, %v787_v37  ;;  %v801_v42 = vmul.f32 %v1372_v33, %v1372_v33 }
 0x127   :  { %v851_v54 = vadd.f32 %v850_v50, %v788_v44  ;;  %v718_v55 = vadd.f32 %v717_v48, %v1264_v43  ;;  %v802_v50 = vmul.f32 %v1390_v46, %v1390_v46 }
 0x129   :  { %v719_v58 = vadd.f32 %v718_v55, %v1282_v47  ;;  %v852_v61 = vadd.f32 %v851_v54, %v789_v51 }
 0x12b   :  { %v720_v2 = vadd.f32 %v1255_v41, %v719_v58  ;;  %v853_v4 = vadd.f32 %v852_v61, %v790_v60  ;;  %v795_v41 = vmul.f32 %v1291_v52, %v1291_v52  ;;  %v805_v60 = vmul.f32 %v1408_v59, %v1408_v59 }
 0x12d   :  { %v854_v6 = vadd.f32 %v853_v4, %v791_v63  ;;  %v721_v10 = vadd.f32 %v1273_v45, %v720_v2  ;;  %v796_v45 = vmul.f32 %v1309_v62, %v1309_v62  ;;  %v806_v2 = vmul.f32 %v1426_v7, %v1426_v7 }
 0x12f   :  { %v722_v43 = vadd.f32 %v721_v10, %v1300_v57  ;;  %v855_v12 = vadd.f32 %v854_v6, %v792_v5 }
 0x131   :  { %v856_v47 = vadd.f32 %v855_v12, %v793_v11  ;;  %v723_v15 = vadd.f32 %v722_v43, %v1318_v3  ;;  %v809_v43 = vmul.f32 %v1444_v20, %v1444_v20 }
 0x133   :  { %v724_v19 = vadd.f32 %v1291_v52, %v723_v15  ;;  %v857_v21 = vadd.f32 %v856_v47, %v794_v17  ;;  %v799_v52 = vmul.f32 %v1327_v8, %v1327_v8  ;;  %v810_v47 = vmul.f32 %v1462_v32, %v1462_v32 }
 0x135   :  { %v858_v22 = vadd.f32 %v857_v21, %v795_v41  ;;  %v725_v25 = vadd.f32 %v1309_v62, %v724_v19  ;;  %v800_v62 = vmul.f32 %v1345_v18, %v1345_v18  ;;  %v813_v21 = vmul.f32 %v1480_v49, %v1480_v49 }
 0x137   :  { %v726_v57 = vadd.f32 %v725_v25, %v1336_v13  ;;  %v859_v29 = vadd.f32 %v858_v22, %v796_v45  ;;  %v814_v25 = vmul.f32 %v1498_v0, %v1498_v0 }
 0x139   :  { %v860_v30 = vadd.f32 %v859_v29, %v797_v27  ;;  %v727_v3 = vadd.f32 %v726_v57, %v1354_v23 }
 0x13b   :  { %v728_v35 = vadd.f32 %v1327_v8, %v727_v3  ;;  %v861_v36 = vadd.f32 %v860_v30, %v798_v34  ;;  %v803_v8 = vmul.f32 %v1363_v28, %v1363_v28  ;;  %v817_v3 = vmul.f32 %v1516_v16, %v1516_v16 }
 0x13d   :  { %v862_v37 = vadd.f32 %v861_v36, %v799_v52  ;;  %v729_v40 = vadd.f32 %v1345_v18, %v728_v35  ;;  %v804_v18 = vmul.f32 %v1381_v38, %v1381_v38  ;;  %v818_v35 = vmul.f32 %v1534_v31, %v1534_v31 }
 0x13f   :  { %v730_v13 = vadd.f32 %v729_v40, %v1372_v33  ;;  %v863_v44 = vadd.f32 %v862_v37, %v800_v62 }
 0x141   :  { %v864_v48 = vadd.f32 %v863_v44, %v801_v42  ;;  %v731_v23 = vadd.f32 %v730_v13, %v1390_v46 }
 0x143   :  { %v732_v51 = vadd.f32 %v1363_v28, %v731_v23  ;;  %v865_v54 = vadd.f32 %v864_v48, %v802_v50  ;;  %v807_v28 = vmul.f32 %v1399_v53, %v1399_v53 }
 0x145   :  { %v866_v55 = vadd.f32 %v865_v54, %v803_v8  ;;  %v733_v58 = vadd.f32 %v1381_v38, %v732_v51  ;;  %v808_v38 = vmul.f32 %v1417_v1, %v1417_v1 }
 0x147   :  { %v734_v33 = vadd.f32 %v733_v58, %v1408_v59  ;;  %v867_v61 = vadd.f32 %v866_v55, %v804_v18 }
 0x149   :  { %v868_v63 = vadd.f32 %v867_v61, %v805_v60  ;;  %v735_v46 = vadd.f32 %v734_v33, %v1426_v7 }
 0x14b   :  { %v736_v4 = vadd.f32 %v1399_v53, %v735_v46  ;;  %v869_v5 = vadd.f32 %v868_v63, %v806_v2  ;;  %v811_v53 = vmul.f32 %v1435_v14, %v1435_v14 }
 0x14d   :  { %v870_v6 = vadd.f32 %v869_v5, %v807_v28  ;;  %v737_v10 = vadd.f32 %v1417_v1, %v736_v4  ;;  %v812_v1 = vmul.f32 %v1453_v26, %v1453_v26 }
 0x14f   :  { %v738_v59 = vadd.f32 %v737_v10, %v1444_v20  ;;  %v871_v11 = vadd.f32 %v870_v6, %v808_v38 }
 0x151   :  { %v872_v12 = vadd.f32 %v871_v11, %v809_v43  ;;  %v739_v7 = vadd.f32 %v738_v59, %v1462_v32 }
 0x153   :  { %v740_v15 = vadd.f32 %v1435_v14, %v739_v7  ;;  %v873_v17 = vadd.f32 %v872_v12, %v810_v47  ;;  %v815_v14 = vmul.f32 %v1471_v39, %v1471_v39 }
 0x155   :  { %v874_v41 = vadd.f32 %v873_v17, %v811_v53  ;;  %v741_v19 = vadd.f32 %v1453_v26, %v740_v15  ;;  %v816_v26 = vmul.f32 %v1489_v56, %v1489_v56 }
 0x157   :  { %v742_v20 = vadd.f32 %v741_v19, %v1480_v49  ;;  %v875_v45 = vadd.f32 %v874_v41, %v812_v1 }
 0x159   :  { %v876_v22 = vadd.f32 %v875_v45, %v813_v21  ;;  %v743_v32 = vadd.f32 %v742_v20, %v1498_v0 }
 0x15b   :  { %v744_v57 = vadd.f32 %v1471_v39, %v743_v32  ;;  %v877_v27 = vadd.f32 %v876_v22, %v814_v25  ;;  %v819_v39 = vmul.f32 %v1507_v9, %v1507_v9 }
 0x15d   :  { %v878_v29 = vadd.f32 %v877_v27, %v815_v14  ;;  %v745_v30 = vadd.f32 %v1489_v56, %v744_v57  ;;  %v820_v56 = vmul.f32 %v1525_v24, %v1525_v24 }
 0x15f   :  { %v746_v49 = vadd.f32 %v745_v30, %v1516_v16  ;;  %v879_v34 = vadd.f32 %v878_v29, %v816_v26 }
 0x161   :  { %v880_v52 = vadd.f32 %v879_v34, %v817_v3  ;;  %v747_v0 = vadd.f32 %v746_v49, %v1534_v31 }
 0x163   :  { %v748_v36 = vadd.f32 %v1507_v9, %v747_v0  ;;  %v881_v62 = vadd.f32 %v880_v52, %v818_v35 }
 0x165   :  { %v749_v37 = vadd.f32 %v1525_v24, %v748_v36  ;;  %v882_v40 = vadd.f32 %v881_v62, %v819_v39 }
 0x167   :  { %v750_v16 = vrot.slane %v749_v37, 4  ;;  %v883_v13 = vadd.f32 %v882_v40, %v820_v56 }
 0x169   :  { %v751_v42 = vadd.f32 %v750_v16, %v749_v37  ;;  %v884_v44 = vrot.slane %v883_v13, 4 }
 0x16b   :  { %v752_v48 = vrot.slane %v751_v42, 2  ;;  %v885_v23 = vadd.f32 %v884_v44, %v883_v13 }
 0x16d   :  { %v753_v50 = vadd.f32 %v752_v48, %v751_v42  ;;  %v886_v31 = vrot.slane %v885_v23, 2 }
 0x16f   :  { %v754_v8 = vrot.slane %v753_v50, 1  ;;  %v887_v51 = vadd.f32 %v886_v31, %v885_v23 }
 0x171   :  { %v755_v54 = vadd.f32 %v754_v8, %v753_v50  ;;  %v888_v18 = vrot.slane %v887_v51, 1 }
 0x173   :  { %756 = vst [vmem:[%s1648_s3] sm:$0x1] %v755_v54  ;;  %v889_v9 = vadd.f32 %v888_v18, %v887_v51 }
 0x175   :  { %890 = vst [vmem:[%s1648_s3 + $0x1] sm:$0x1] %v889_v9 }

// kernel: conv_block_forward.8
= control target key start
LH: loop header
LB: loop body
LE: loop exit
PB: predicated region body
PF: predicated region fallthrough
CT: control target
= control target key end

     0   :  { %s631_s3 = inlined_call_operand.vmem [shape: bf16[128,128], index: 3, kind: input, shape index: {}]   ;;  %s632_s0 = inlined_call_operand.vmem [shape: f32[128,128], index: 0, kind: input, shape index: {}]   ;;  %s633_s1 = inlined_call_operand.vmem [shape: f32[1,128], index: 1, kind: input, shape index: {}]   ;;  %s634_s2 = inlined_call_operand.vmem [shape: f32[1,128], index: 2, kind: input, shape index: {}]   ;;  %s635_s4 = inlined_call_operand.vmem [shape: f32[128,128], index: 4, kind: output, shape index: {0}]   ;;  %s636_s5 = inlined_call_operand.vmem [shape: f32[1,2,128], index: 5, kind: output, shape index: {1}]  }
   0x1   :  { %v425_v0 = vld [vmem:[%s631_s3 + $0x38] sm:$0xff]   ;;  %v426_v1 = vld [vmem:[%s631_s3 + $0x30] sm:$0xff]   ;;  %v427_v2 = vld [vmem:[%s631_s3 + $0x28] sm:$0xff]  }
   0x2   :  { %377 = vmatprep.subr.bf16.mxu0 %v425_v0  ;;  %409 = vmatprep.subr.bf16.mxu1 %v425_v0  ;;  %v428_v3 = vld [vmem:[%s631_s3 + $0x20] sm:$0xff]   ;;  %v21_v5 = vld [vmem:[%s632_s0 + $0x8] sm:$0xff]  ;;  %v429_v12 = vld [vmem:[%s631_s3 + $0x18] sm:$0xff]  }
   0x3   :  { %378 = vmatpush3.bf16.msra.mxu0 %v425_v0  ;;  %417 = vmatpush3.bf16.msra.mxu1 %v425_v0  ;;  %v20_v4 = vld [vmem:[%s632_s0] sm:$0xff]  ;;  %v29_v16 = vld [vmem:[%s632_s0 + $0x48] sm:$0xff]  ;;  %v430_v17 = vld [vmem:[%s631_s3 + $0x10] sm:$0xff]  }
   0x4   :  { %379 = vmatprep.subr.bf16.mxu0 %v426_v1  ;;  %410 = vmatprep.subr.bf16.mxu1 %v426_v1  ;;  %v484_v6 = vld [vmem:[%s633_s1] ss:$0 sm:$0xff]  ;;  %v22_v18 = vld [vmem:[%s632_s0 + $0x10] sm:$0xff]  ;;  %v23_v19 = vld [vmem:[%s632_s0 + $0x18] sm:$0xff] }
   0x5   :  { %v43_v7 = vmul.f32 %v484_v6, %v20_v4  ;;  %v44_v8 = vmul.f32 %v484_v6, %v21_v5  ;;  %v491_v9 = vld [vmem:[%s634_s2] ss:$0 sm:$0xff]  ;;  %v30_v23 = vld [vmem:[%s632_s0 + $0x50] sm:$0xff]  ;;  %v31_v24 = vld [vmem:[%s632_s0 + $0x58] sm:$0xff]  ;;  %v52_v26 = vmul.f32 %v484_v6, %v29_v16  ;;  %v45_v29 = vmul.f32 %v484_v6, %v22_v18 }
   0x6   :  { %v28_v13 = vld [vmem:[%s632_s0 + $0x40] sm:$0xff]  ;;  %v25_v25 = vld [vmem:[%s632_s0 + $0x28] sm:$0xff]  ;;  %v46_v30 = vmul.f32 %v484_v6, %v23_v19  ;;  %v53_v34 = vmul.f32 %v484_v6, %v30_v23  ;;  %v54_v35 = vmul.f32 %v484_v6, %v31_v24  ;;  %v26_v45 = vld [vmem:[%s632_s0 + $0x30] sm:$0xff] }
   0x7   :  { %380 = vmatpush3.bf16.msra.mxu0 %v426_v1  ;;  %418 = vmatpush3.bf16.msra.mxu1 %v426_v1  ;;  %v66_v10 = vadd.f32 %v491_v9, %v43_v7  ;;  %v67_v11 = vadd.f32 %v491_v9, %v44_v8  ;;  %v24_v21 = vld [vmem:[%s632_s0 + $0x20] sm:$0xff]  ;;  %v51_v22 = vmul.f32 %v484_v6, %v28_v13  ;;  %v33_v28 = vld [vmem:[%s632_s0 + $0x68] sm:$0xff]  ;;  %v27_v46 = vld [vmem:[%s632_s0 + $0x38] sm:$0xff] }
   0x8   :  { %381 = vmatprep.subr.bf16.mxu0 %v427_v2  ;;  %411 = vmatprep.subr.bf16.mxu1 %v427_v2  ;;  %v32_v27 = vld [vmem:[%s632_s0 + $0x60] sm:$0xff]  ;;  %v47_v32 = vmul.f32 %v484_v6, %v24_v21  ;;  %v75_v33 = vadd.f32 %v491_v9, %v52_v26  ;;  %v48_v36 = vmul.f32 %v484_v6, %v25_v25  ;;  %v431_v40 = vld [vmem:[%s631_s3 + $0x8] sm:$0xff]   ;;  %v34_v53 = vld [vmem:[%s632_s0 + $0x70] sm:$0xff] }
   0x9   :  { %v82_v14 = vmax.f32 %v66_v10, 0.0  ;;  %v83_v15 = vmax.f32 %v67_v11, 0.0  ;;  %v74_v31 = vadd.f32 %v491_v9, %v51_v22  ;;  %v55_v38 = vmul.f32 %v484_v6, %v32_v27  ;;  %v35_v54 = vld [vmem:[%s632_s0 + $0x78] sm:$0xff]  ;;  %v432_v55 = vld [vmem:[%s631_s3] sm:$0xff]  }
   0xa   :  { %v56_v39 = vmul.f32 %v484_v6, %v33_v28  ;;  %v91_v41 = vmax.f32 %v75_v33, 0.0  ;;  %v68_v42 = vadd.f32 %v491_v9, %v45_v29  ;;  %v69_v43 = vadd.f32 %v491_v9, %v46_v30 }
   0xb   :  { %382 = vmatpush3.bf16.msra.mxu0 %v427_v2  ;;  %419 = vmatpush3.bf16.msra.mxu1 %v427_v2  ;;  %v98_v20 = vpack.c.bf16 %v83_v15, %v82_v14  ;;  %v90_v37 = vmax.f32 %v74_v31, 0.0  ;;  %v70_v44 = vadd.f32 %v491_v9, %v47_v32  ;;  %v76_v48 = vadd.f32 %v491_v9, %v53_v34 }
   0xc   :  { %383 = vmatprep.subr.bf16.mxu0 %v428_v3  ;;  %412 = vmatprep.subr.bf16.mxu1 %v428_v3  ;;  %v77_v49 = vadd.f32 %v491_v9, %v54_v35  ;;  %v71_v50 = vadd.f32 %v491_v9, %v48_v36  ;;  %v78_v51 = vadd.f32 %v491_v9, %v55_v38  ;;  %v84_v56 = vmax.f32 %v68_v42, 0.0 }
   0xd   :  { %393 = vmatprep.mubr.bf16.mxu0 %v98_v20  ;;  %v102_v47 = vpack.c.bf16 %v91_v41, %v90_v37  ;;  %v79_v52 = vadd.f32 %v491_v9, %v56_v39  ;;  %v85_v57 = vmax.f32 %v69_v43, 0.0  ;;  %v49_v58 = vmul.f32 %v484_v6, %v26_v45 }
   0xe   :  { %v50_v59 = vmul.f32 %v484_v6, %v27_v46  ;;  %v92_v60 = vmax.f32 %v76_v48, 0.0  ;;  %v93_v61 = vmax.f32 %v77_v49, 0.0  ;;  %v57_v62 = vmul.f32 %v484_v6, %v34_v53 }
   0xf   :  { %384 = vmatpush3.bf16.msra.mxu0 %v428_v3  ;;  %420 = vmatpush3.bf16.msra.mxu1 %v428_v3  ;;  %v58_v63 = vmul.f32 %v484_v6, %v35_v54  ;;  %v86_v0 = vmax.f32 %v70_v44, 0.0  ;;  %v87_v1 = vmax.f32 %v71_v50, 0.0  ;;  %v94_v2 = vmax.f32 %v78_v51, 0.0 }
  0x10   :  { %385 = vmatprep.subr.bf16.mxu0 %v429_v12  ;;  %413 = vmatprep.subr.bf16.mxu1 %v429_v12  ;;  %v95_v3 = vmax.f32 %v79_v52, 0.0  ;;  %v99_v4 = vpack.c.bf16 %v85_v57, %v84_v56  ;;  %v72_v5 = vadd.f32 %v491_v9, %v49_v58  ;;  %v73_v7 = vadd.f32 %v491_v9, %v50_v59 }
  0x11   :  { %401 = vmatprep.mubr.bf16.mxu1 %v102_v47  ;;  %v103_v8 = vpack.c.bf16 %v93_v61, %v92_v60  ;;  %v80_v10 = vadd.f32 %v491_v9, %v57_v62  ;;  %v81_v11 = vadd.f32 %v491_v9, %v58_v63  ;;  %v100_v6 = vpack.c.bf16 %v87_v1, %v86_v0 }
  0x12   :  { %v88_v13 = vmax.f32 %v72_v5, 0.0  ;;  %v89_v14 = vmax.f32 %v73_v7, 0.0 }
  0x13   :  { %386 = vmatpush3.bf16.msra.mxu0 %v429_v12  ;;  %421 = vmatpush3.bf16.msra.mxu1 %v429_v12  ;;  %v104_v12 = vpack.c.bf16 %v95_v3, %v94_v2  ;;  %v96_v15 = vmax.f32 %v80_v10, 0.0  ;;  %v97_v16 = vmax.f32 %v81_v11, 0.0 }
  0x14   :  { %387 = vmatprep.subr.bf16.mxu0 %v430_v17  ;;  %414 = vmatprep.subr.bf16.mxu1 %v430_v17 }
  0x15   :  { %v105_v18 = vpack.c.bf16 %v97_v16, %v96_v15 }
  0x17   :  { %388 = vmatpush3.bf16.msra.mxu0 %v430_v17  ;;  %422 = vmatpush3.bf16.msra.mxu1 %v430_v17  ;;  %v101_v17 = vpack.c.bf16 %v89_v14, %v88_v13 }
  0x18   :  { %389 = vmatprep.subr.bf16.mxu0 %v431_v40  ;;  %415 = vmatprep.subr.bf16.mxu1 %v431_v40 }
  0x1b   :  { %390 = vmatpush3.bf16.msra.mxu0 %v431_v40  ;;  %423 = vmatpush3.bf16.msra.mxu1 %v431_v40 }
  0x1c   :  { %391 = vmatprep.subr.bf16.mxu0 %v432_v55  ;;  %416 = vmatprep.subr.bf16.mxu1 %v432_v55 }
  0x1f   :  { %392 = vmatpush3.bf16.msra.mxu0 %v432_v55  ;;  %424 = vmatpush3.bf16.msra.mxu1 %v432_v55 }
  0x22   :  { %394 = vmatmul.mubr.bf16.vlgmr.msra.gmra.mxu0 %v99_v4  ;;  %402 = vmatmul.mubr.bf16.vlgmr.msra.gmra.mxu1 %v103_v8 }
  0x23   :  { %397 = vmatprep.mubr.bf16.mxu0 %v100_v6  ;;  %405 = vmatprep.mubr.bf16.mxu1 %v104_v12 }
  0x2a   :  { %398 = vmatmul.mubr.bf16.gmra.mxu0 %v101_v17  ;;  %406 = vmatmul.mubr.bf16.gmra.mxu1 %v105_v18 }
  0xe2   :  { %v395_v19 = vpop.f32.mrf.mxu0  ;;  %v403_v20 = vpop.f32.mrf.mxu1 }
  0xe3   :  { %269 = vst [vmem:[%s635_s4 + $0x10] sm:$0xff] %v395_v19  ;;  %277 = vst [vmem:[%s635_s4 + $0x50] sm:$0xff] %v403_v20  ;;  %v307_v31 = vmul.f32 %v395_v19, %v395_v19  ;;  %v315_v61 = vmul.f32 %v403_v20, %v403_v20 }
  0xe4   :  { %v204_v9 = vpop.f32.mrf.mxu0  ;;  %v236_v21 = vpop.f32.mrf.mxu1 }
  0xe5   :  { %267 = vst [vmem:[%s635_s4] sm:$0xff] %v204_v9  ;;  %275 = vst [vmem:[%s635_s4 + $0x40] sm:$0xff] %v236_v21  ;;  %v305_v26 = vmul.f32 %v204_v9, %v204_v9  ;;  %v313_v55 = vmul.f32 %v236_v21, %v236_v21 }
  0xe6   :  { %v396_v22 = vpop.f32.mrf.mxu0  ;;  %v404_v23 = vpop.f32.mrf.mxu1 }
  0xe7   :  { %270 = vst [vmem:[%s635_s4 + $0x18] sm:$0xff] %v396_v22  ;;  %278 = vst [vmem:[%s635_s4 + $0x58] sm:$0xff] %v404_v23  ;;  %v308_v36 = vmul.f32 %v396_v22, %v396_v22  ;;  %v316_v0 = vmul.f32 %v404_v23, %v404_v23 }
  0xe8   :  { %v207_v24 = vpop.f32.mrf.mxu0  ;;  %v239_v25 = vpop.f32.mrf.mxu1 }
  0xe9   :  { %268 = vst [vmem:[%s635_s4 + $0x8] sm:$0xff] %v207_v24  ;;  %v283_v27 = vadd.f32 %v207_v24, %v204_v9  ;;  %v306_v28 = vmul.f32 %v207_v24, %v207_v24  ;;  %276 = vst [vmem:[%s635_s4 + $0x48] sm:$0xff] %v239_v25  ;;  %v314_v59 = vmul.f32 %v239_v25, %v239_v25 }
  0xea   :  { %v399_v29 = vpop.f32.mrf.mxu0  ;;  %v407_v30 = vpop.f32.mrf.mxu1 }
  0xeb   :  { %v284_v32 = vadd.f32 %v395_v19, %v283_v27  ;;  %v321_v33 = vadd.f32 %v306_v28, %v305_v26  ;;  %273 = vst [vmem:[%s635_s4 + $0x30] sm:$0xff] %v399_v29  ;;  %281 = vst [vmem:[%s635_s4 + $0x70] sm:$0xff] %v407_v30  ;;  %v311_v49 = vmul.f32 %v399_v29, %v399_v29 }
  0xec   :  { %v220_v34 = vpop.f32.mrf.mxu0  ;;  %v252_v35 = vpop.f32.mrf.mxu1  ;;  %v319_v11 = vmul.f32 %v407_v30, %v407_v30 }
  0xed   :  { %v322_v37 = vadd.f32 %v321_v33, %v307_v31  ;;  %271 = vst [vmem:[%s635_s4 + $0x20] sm:$0xff] %v220_v34  ;;  %v285_v38 = vadd.f32 %v396_v22, %v284_v32  ;;  %279 = vst [vmem:[%s635_s4 + $0x60] sm:$0xff] %v252_v35  ;;  %v309_v42 = vmul.f32 %v220_v34, %v220_v34 }
  0xee   :  { %v400_v39 = vpop.f32.mrf.mxu0  ;;  %v408_v40 = vpop.f32.mrf.mxu1  ;;  %v317_v4 = vmul.f32 %v252_v35, %v252_v35 }
  0xef   :  { %v286_v41 = vadd.f32 %v285_v38, %v220_v34  ;;  %v323_v43 = vadd.f32 %v322_v37, %v308_v36  ;;  %274 = vst [vmem:[%s635_s4 + $0x38] sm:$0xff] %v400_v39  ;;  %282 = vst [vmem:[%s635_s4 + $0x78] sm:$0xff] %v408_v40  ;;  %v312_v52 = vmul.f32 %v400_v39, %v400_v39 }
  0xf0   :  { %v223_v44 = vpop.f32.mrf.mxu0  ;;  %v255_v45 = vpop.f32.mrf.mxu1  ;;  %v320_v13 = vmul.f32 %v408_v40, %v408_v40 }
  0xf1   :  { %v324_v46 = vadd.f32 %v323_v43, %v309_v42  ;;  %272 = vst [vmem:[%s635_s4 + $0x28] sm:$0xff] %v223_v44  ;;  %v287_v47 = vadd.f32 %v286_v41, %v223_v44  ;;  %v310_v48 = vmul.f32 %v223_v44, %v223_v44  ;;  %280 = vst [vmem:[%s635_s4 + $0x68] sm:$0xff] %v255_v45 }
  0xf2   :  { %v318_v10 = vmul.f32 %v255_v45, %v255_v45 }
  0xf3   :  { %v288_v50 = vadd.f32 %v399_v29, %v287_v47  ;;  %v325_v51 = vadd.f32 %v324_v46, %v310_v48 }
  0xf5   :  { %v289_v53 = vadd.f32 %v400_v39, %v288_v50  ;;  %v326_v54 = vadd.f32 %v325_v51, %v311_v49 }
  0xf7   :  { %v327_v56 = vadd.f32 %v326_v54, %v312_v52  ;;  %v290_v57 = vadd.f32 %v289_v53, %v236_v21 }
  0xf9   :  { %v291_v58 = vadd.f32 %v290_v57, %v239_v25  ;;  %v328_v60 = vadd.f32 %v327_v56, %v313_v55 }
  0xfb   :  { %v292_v62 = vadd.f32 %v403_v20, %v291_v58  ;;  %v329_v63 = vadd.f32 %v328_v60, %v314_v59 }
  0xfd   :  { %v330_v1 = vadd.f32 %v329_v63, %v315_v61  ;;  %v293_v2 = vadd.f32 %v404_v23, %v292_v62 }
  0xff   :  { %v294_v3 = vadd.f32 %v293_v2, %v252_v35  ;;  %v331_v5 = vadd.f32 %v330_v1, %v316_v0 }
 0x101   :  { %v332_v7 = vadd.f32 %v331_v5, %v317_v4  ;;  %v295_v8 = vadd.f32 %v294_v3, %v255_v45 }
 0x103   :  { %v296_v6 = vadd.f32 %v407_v30, %v295_v8  ;;  %v333_v12 = vadd.f32 %v332_v7, %v318_v10 }
 0x105   :  { %v297_v14 = vadd.f32 %v408_v40, %v296_v6  ;;  %v334_v15 = vadd.f32 %v333_v12, %v319_v11 }
 0x107   :  { %v298_v16 = vrot.slane %v297_v14, 4  ;;  %v335_v17 = vadd.f32 %v334_v15, %v320_v13 }
 0x109   :  { %v299_v18 = vadd.f32 %v298_v16, %v297_v14  ;;  %v336_v19 = vrot.slane %v335_v17, 4 }
 0x10b   :  { %v300_v20 = vrot.slane %v299_v18, 2  ;;  %v337_v9 = vadd.f32 %v336_v19, %v335_v17 }
 0x10d   :  { %v301_v21 = vadd.f32 %v300_v20, %v299_v18  ;;  %v338_v22 = vrot.slane %v337_v9, 2 }
 0x10f   :  { %v302_v23 = vrot.slane %v301_v21, 1  ;;  %v339_v24 = vadd.f32 %v338_v22, %v337_v9 }
 0x111   :  { %v303_v25 = vadd.f32 %v302_v23, %v301_v21  ;;  %v340_v26 = vrot.slane %v339_v24, 1 }
 0x113   :  { %304 = vst [vmem:[%s636_s5] sm:$0x1] %v303_v25  ;;  %v341_v27 = vadd.f32 %v340_v26, %v339_v24 }
 0x115   :  { %342 = vst [vmem:[%s636_s5 + $0x1] sm:$0x1] %v341_v27 }

// kernel: conv_block_forward.7
= control target key start
LH: loop header
LB: loop body
LE: loop exit
PB: predicated region body
PF: predicated region fallthrough
CT: control target
= control target key end

     0   :  { %s2963_s12 = smov 0   ;;  %s3366_s0 = inlined_call_operand.vmem [shape: bf16[2,4,9,9,128], index: 0, kind: input, shape index: {}]   ;;  %s3367_s1 = inlined_call_operand.vmem [shape: bf16[9,128,128], index: 1, kind: input, shape index: {}]   ;;  %s3368_s2 = inlined_call_operand.vmem [shape: f32[2,64,128], index: 2, kind: output, shape index: {0}]   ;;  %s3369_s3 = inlined_call_operand.vmem [shape: f32[2,2,128], index: 3, kind: output, shape index: {1}]  }
   0x1 LB: > { %s2170_s13 = sadd.s32 4294967295, %s2941_s12   ;;  %p2174_p0 = scmp.ge.s32.totalorder %s2941_s12, 1  ;;  %s2941_s12 = sphi %s2963_s12, %s14_s12  }
   0x2   : > { %p140_p1 = scmp.lt.s32.totalorder %s2941_s12, 3 }
   0x4   : > { %p141_p2 = pnand %p2174_p0, %p140_p1 }
   0x6   : > { %144 = sbr.rel (%p141_p2) target bundleno = 402 (0x192), region = 28 }
   0xb   : > { %v2839_v0 = vld [vmem:[%s3367_s1 + $0x78] sm:$0xff]   ;;  %p168_p3 = scmp.lt.s32.totalorder %s2170_s13, 1  ;;  %v2841_v2 = vld [vmem:[%s3367_s1 + $0x70] sm:$0xff]   ;;  %v2843_v4 = vld [vmem:[%s3367_s1 + $0x68] sm:$0xff]   ;;  %vm523_vm0 = vsmask.f32 3328 }
   0xc   : > { %v2840_v1 = vld [vmem:[%s3367_s1 + $0x38] sm:$0xff]   ;;  %2598 = vmatprep.subr.bf16.mxu0 %v2839_v0  ;;  %v2842_v3 = vld [vmem:[%s3367_s1 + $0x30] sm:$0xff]   ;;  %v2844_v5 = vld [vmem:[%s3367_s1 + $0x28] sm:$0xff]   ;;  %vm524_vm1 = vsmask.f32 7440 }
   0xd   : > { %2622 = vmatprep.subr.bf16.mxu1 %v2840_v1  ;;  %2599 = vmatpush3.bf16.msra.mxu0 %v2839_v0  ;;  %s3387_s13 = smov (!%p168_p3, %s2170_s13), 1  ;;  %v2845_v6 = vld [vmem:[%s3367_s1 + $0x60] sm:$0xff]   ;;  %v2847_v8 = vld [vmem:[%s3367_s1 + $0x58] sm:$0xff]   ;;  %v2849_v10 = vld [vmem:[%s3367_s1 + $0x50] sm:$0xff]  }
   0xe   : > { %2623 = vmatpush3.bf16.msra.mxu1 %v2840_v1  ;;  %2600 = vmatprep.subr.bf16.mxu0 %v2841_v2  ;;  %v2846_v7 = vld [vmem:[%s3367_s1 + $0x20] sm:$0xff]   ;;  %s2830_s30 = smul.u32 288, %s3387_s13  ;;  %v2848_v9 = vld [vmem:[%s3367_s1 + $0x18] sm:$0xff]   ;;  %v2850_v11 = vld [vmem:[%s3367_s1 + $0x10] sm:$0xff]   ;;  %s2489_s16 = sshll.u32 %s3387_s13, 6 }
   0xf   : > { %2624 = vmatprep.subr.bf16.mxu1 %v2842_v3  ;;  %v2851_v14 = vld [vmem:[%s3367_s1 + $0x48] sm:$0xff]   ;;  %v2853_v16 = vld [vmem:[%s3367_s1 + $0x40] sm:$0xff]   ;;  %v2859_v19 = vld [vmem:[%s3367_s1 + $0xb8] sm:$0xff]   ;;  %s3346_s19 = scalar_lea.vmem %s3368_s2, %s2489_s16  ;;  %s2178_s20 = sshll.u32 %s3387_s13, 1 }
  0x10   : > { %s3007_s10 = scalar_lea.vmem %s3366_s0, %s2830_s30  ;;  %v2852_v15 = vld [vmem:[%s3367_s1 + $0x8] sm:$0xff]   ;;  %v2854_v17 = vld [vmem:[%s3367_s1] sm:$0xff]   ;;  %v2860_v20 = vld [vmem:[%s3367_s1 + $0xf8] sm:$0xff]   ;;  %s181_s23 = scalar_lea.vmem %s3369_s3, %s2178_s20 }
  0x11   : > { %2601 = vmatpush3.bf16.msra.mxu0 %v2841_v2  ;;  %v2855_v12 = vld [vmem:[%s3007_s10 + $0x48] ss:$8 sps:$4 sm:$0xff]   ;;  %v2857_v18 = vld [vmem:[%s3007_s10 + $0x58] ss:$8 sps:$4 sm:$0xff]   ;;  %v508_v33 = vld [vmem:[%s3007_s10 + $0x4] sm:$0x1] }
  0x12   : > { %2625 = vmatpush3.bf16.msra.mxu1 %v2842_v3  ;;  %2602 = vmatprep.subr.bf16.mxu0 %v2843_v4  ;;  %v2856_v13 = vld [vmem:[%s3007_s10] ss:$8 sps:$4 sm:$0xff]   ;;  %v2858_v21 = vld [vmem:[%s3007_s10 + $0x10] ss:$8 sps:$4 sm:$0xff]   ;;  %v510_v35 = vld [vmem:[%s3007_s10 + $0xc] sm:$0x1] }
  0x13   : > { %2626 = vmatprep.subr.bf16.mxu1 %v2844_v5  ;;  %2614 = vmatprep.mubr.bf16.mxu0 %v2855_v12  ;;  %v2861_v22 = vld [vmem:[%s3367_s1 + $0xb0] sm:$0xff]   ;;  %v2870_v25 = vld [vmem:[%s3007_s10 + $0x20] ss:$8 sps:$4 sm:$0xff]   ;;  %v2867_v36 = vld [vmem:[%s3367_s1 + $0x98] sm:$0xff]   ;;  %v536_v39 = vshll.u32 %v508_v33, 16  ;;  %v550_v44 = vshll.u32 %v510_v35, 16 }
  0x14   : > { %2638 = vmatprep.mubr.bf16.mxu1 %v2856_v13  ;;  %v2862_v23 = vld [vmem:[%s3367_s1 + $0xf0] sm:$0xff]   ;;  %v2863_v26 = vld [vmem:[%s3367_s1 + $0xa8] sm:$0xff]   ;;  %v2865_v28 = vld [vmem:[%s3367_s1 + $0xa0] sm:$0xff]  }
  0x15   : > { %2603 = vmatpush3.bf16.msra.mxu0 %v2843_v4  ;;  %v2869_v24 = vld [vmem:[%s3007_s10 + $0x68] ss:$8 sps:$4 sm:$0xff]   ;;  %v2871_v29 = vld [vmem:[%s3007_s10 + $0x78] ss:$8 sps:$4 sm:$0xff]   ;;  %v512_v45 = vld [vmem:[%s3007_s10 + $0x14] sm:$0x1] }
  0x16   : > { %2627 = vmatpush3.bf16.msra.mxu1 %v2844_v5  ;;  %2604 = vmatprep.subr.bf16.mxu0 %v2845_v6  ;;  %v2864_v27 = vld [vmem:[%s3367_s1 + $0xe8] sm:$0xff]   ;;  %v2866_v30 = vld [vmem:[%s3367_s1 + $0xe0] sm:$0xff]   ;;  %v2872_v31 = vld [vmem:[%s3007_s10 + $0x30] ss:$8 sps:$4 sm:$0xff]   ;;  %v538_v49 = vrot.slane %v536_v39, 5  ;;  %v552_v53 = vrot.slane %v550_v44, 5 }
  0x17   : > { %2628 = vmatprep.subr.bf16.mxu1 %v2846_v7  ;;  %v507_v32 = vld [vmem:[%s3007_s10] sm:$0xf]  ;;  %v509_v34 = vld [vmem:[%s3007_s10 + $0x8] sm:$0xf]  ;;  %v511_v41 = vld [vmem:[%s3007_s10 + $0x10] sm:$0xf] }
  0x18   : > { %v527_v37 = vshrl.u32 %v507_v32, 16  ;;  %v530_v38 = vshll.u32 %v507_v32, 16  ;;  %v541_v40 = vshrl.u32 %v509_v34, 16  ;;  %v2868_v42 = vld [vmem:[%s3367_s1 + $0xd8] sm:$0xff]   ;;  %v544_v43 = vshll.u32 %v509_v34, 16  ;;  %v2873_v60 = vld [vmem:[%s3367_s1 + $0x90] sm:$0xff]   ;;  %vm3078_vm2 = vmor %vm523_vm0, %vm524_vm1 }
  0x19   : > { %2605 = vmatpush3.bf16.msra.mxu0 %v2845_v6  ;;  %v513_v46 = vld [vmem:[%s3007_s10 + $0x18] sm:$0xf]  ;;  %v514_v51 = vld [vmem:[%s3007_s10 + $0x1c] sm:$0x1]  ;;  %v555_v54 = vshrl.u32 %v511_v41, 16  ;;  %v558_v55 = vshll.u32 %v511_v41, 16 }
  0x1a   : > { %2629 = vmatpush3.bf16.msra.mxu1 %v2846_v7  ;;  %2606 = vmatprep.subr.bf16.mxu0 %v2847_v8  ;;  %v529_v47 = vrot.slane %v527_v37, 4  ;;  %v532_v48 = vrot.slane %v530_v38, 5  ;;  %v543_v50 = vrot.slane %v541_v40, 4  ;;  %v546_v52 = vrot.slane %v544_v43, 5  ;;  %v2879_v2 = vld [vmem:[%s3007_s10 + $0x90] ss:$8 sps:$4 sm:$0xff]  }
  0x1b   : > { %2630 = vmatprep.subr.bf16.mxu1 %v2848_v9  ;;  %v564_v57 = vshll.u32 %v512_v45, 16  ;;  %v569_v58 = vshrl.u32 %v513_v46, 16  ;;  %v572_v59 = vshll.u32 %v513_v46, 16  ;;  %v557_v63 = vrot.slane %v555_v54, 4  ;;  %v2874_v3 = vld [vmem:[%s3367_s1 + $0xd0] sm:$0xff]   ;;  %v2875_v12 = vld [vmem:[%s3367_s1 + $0x88] sm:$0xff]  }
  0x1c   : > { %v533_v56 = vor.u32 %v532_v48, %v529_v47  ;;  %v547_v62 = vor.u32 %v546_v52, %v543_v50  ;;  %v560_v0 = vrot.slane %v558_v55, 5  ;;  %v578_v1 = vshll.u32 %v514_v51, 16  ;;  %v519_v32 = vld [vmem:[%s3007_s10 + $0x30] sm:$0xf]  ;;  %v521_v41 = vld [vmem:[%s3007_s10 + $0x38] sm:$0xf] }
  0x1d   : > { %2607 = vmatpush3.bf16.msra.mxu0 %v2847_v8  ;;  %v571_v5 = vrot.slane %v569_v58, 4  ;;  %v574_v6 = vrot.slane %v572_v59, 5  ;;  %v611_v37 = vshrl.u32 %v519_v32, 16  ;;  %v522_v45 = vld [vmem:[%s3007_s10 + $0x3c] sm:$0x1]  ;;  %v625_v50 = vshrl.u32 %v521_v41, 16 }
  0x1e   : > { %2631 = vmatpush3.bf16.msra.mxu1 %v2848_v9  ;;  %2608 = vmatprep.subr.bf16.mxu0 %v2849_v10  ;;  %v534_v4 = vrot.slane %v533_v56, 4  ;;  %v548_v7 = vrot.slane %v547_v62, 4  ;;  %v561_v8 = vor.u32 %v560_v0, %v557_v63  ;;  %v3086_v9 = vrot.slane %v564_v57, 5  ;;  %v2880_v52 = vld [vmem:[%s3367_s1 + $0x138] sm:$0xff]   ;;  %v2882_v56 = vld [vmem:[%s3007_s10 + $0xa0] ss:$8 sps:$4 sm:$0xff]  }
  0x1f   : > { %2632 = vmatprep.subr.bf16.mxu1 %v2850_v11  ;;  %v613_v46 = vrot.slane %v611_v37, 4  ;;  %v628_v51 = vshll.u32 %v521_v41, 16  ;;  %v634_v54 = vshll.u32 %v522_v45, 16  ;;  %v2881_v55 = vld [vmem:[%s3367_s1 + $0x178] sm:$0xff]   ;;  %v627_v59 = vrot.slane %v625_v50, 4 }
  0x20   : > { %v553_v13 = vsel %vm3078_vm2, %v548_v7, %v552_v53  ;;  %v2884_v7 = vld [vmem:[%s3367_s1 + $0x170] sm:$0xff]   ;;  %v2332_v41 = vld [vmem:[%s3007_s10 + $0xa4] sm:$0x1] }
  0x21   : > { %2609 = vmatpush3.bf16.msra.mxu0 %v2849_v10  ;;  %v539_v10 = vsel %vm3078_vm2, %v534_v4, %v538_v49 }
  0x22   : > { %2633 = vmatpush3.bf16.msra.mxu1 %v2850_v11  ;;  %2610 = vmatprep.subr.bf16.mxu0 %v2851_v14  ;;  %v575_v11 = vor.u32 %v574_v6, %v571_v5  ;;  %v636_v5 = vrot.slane %v634_v54, 5  ;;  %v2887_v6 = vld [vmem:[%s3007_s10 + $0xb0] ss:$8 sps:$4 sm:$0xff]  }
  0x23   : > { %2634 = vmatprep.subr.bf16.mxu1 %v2852_v15 }
  0x25   : > { %2611 = vmatpush3.bf16.msra.mxu0 %v2851_v14  ;;  %v562_v14 = vrot.slane %v561_v8, 4 }
  0x26   : > { %2635 = vmatpush3.bf16.msra.mxu1 %v2852_v15  ;;  %2612 = vmatprep.subr.bf16.mxu0 %v2853_v16  ;;  %v580_v15 = vrot.slane %v578_v1, 5  ;;  %v2883_v1 = vld [vmem:[%s3367_s1 + $0x130] sm:$0xff]  }
  0x27   : > { %2636 = vmatprep.subr.bf16.mxu1 %v2854_v17 }
  0x29   : > { %2613 = vmatpush3.bf16.msra.mxu0 %v2853_v16  ;;  %v2876_v16 = vld [vmem:[%s3367_s1 + $0xc8] sm:$0xff]  }
  0x2a   : > { %2637 = vmatpush3.bf16.msra.mxu1 %v2854_v17  ;;  %2646 = vmatprep.subr.bf16.mxu0 %v2859_v19  ;;  %v2243_v17 = vcombine.low %v539_v10, %v553_v13  ;;  %v2885_v10 = vld [vmem:[%s3367_s1 + $0x128] sm:$0xff]  }
  0x2b   : > { %2670 = vmatprep.subr.bf16.mxu1 %v2860_v20  ;;  %v2886_v13 = vld [vmem:[%s3367_s1 + $0x168] sm:$0xff]  }
  0x2c   : > { %2615 = vmatmul.mubr.bf16.vlgmr.msra.gmra.mxu0 %v2857_v18  ;;  %v576_v18 = vrot.slane %v575_v11, 4 }
  0x2d   : > { %2639 = vmatmul.mubr.bf16.vlgmr.msra.gmra.mxu1 %v2858_v21  ;;  %2647 = vmatpush3.bf16.msra.mxu0 %v2859_v19  ;;  %v515_v19 = vld [vmem:[%s3007_s10 + $0x20] sm:$0xf] }
  0x2e   : > { %2671 = vmatpush3.bf16.msra.mxu1 %v2860_v20  ;;  %2648 = vmatprep.subr.bf16.mxu0 %v2861_v22  ;;  %v516_v20 = vld [vmem:[%s3007_s10 + $0x24] sm:$0x1] }
  0x2f   : > { %2672 = vmatprep.subr.bf16.mxu1 %v2862_v23  ;;  %2618 = vmatprep.mubr.bf16.mxu0 %v2869_v24  ;;  %v2877_v21 = vld [vmem:[%s3367_s1 + $0x80] sm:$0xff]   ;;  %v518_v24 = vld [vmem:[%s3007_s10 + $0x2c] sm:$0x1] }
  0x30   : > { %2642 = vmatprep.mubr.bf16.mxu1 %v2870_v25  ;;  %v583_v25 = vshrl.u32 %v515_v19, 16  ;;  %v606_v35 = vshll.u32 %v518_v24, 16  ;;  %v2330_v24 = vld [vmem:[%s3007_s10 + $0x9c] sm:$0x1] }
  0x31   : > { %2649 = vmatpush3.bf16.msra.mxu0 %v2861_v22  ;;  %v567_v22 = vsel %vm3078_vm2, %v562_v14, %v3086_v9 }
  0x32   : > { %2673 = vmatpush3.bf16.msra.mxu1 %v2862_v23  ;;  %2650 = vmatprep.subr.bf16.mxu0 %v2863_v26  ;;  %v517_v23 = vld [vmem:[%s3007_s10 + $0x28] sm:$0xf]  ;;  %v585_v33 = vrot.slane %v583_v25, 4  ;;  %v608_v44 = vrot.slane %v606_v35, 5 }
  0x33   : > { %2674 = vmatprep.subr.bf16.mxu1 %v2864_v27 }
  0x34   : > { %2619 = vmatmul.mubr.bf16.gmra.mxu0 %v2871_v29  ;;  %v592_v29 = vshll.u32 %v516_v20, 16  ;;  %v2892_v20 = vld [vmem:[%s3367_s1 + $0x158] sm:$0xff]  }
  0x35   : > { %2651 = vmatpush3.bf16.msra.mxu0 %v2863_v26  ;;  %2643 = vmatmul.mubr.bf16.gmra.mxu1 %v2872_v31  ;;  %v586_v26 = vshll.u32 %v515_v19, 16  ;;  %v600_v31 = vshll.u32 %v517_v23, 16  ;;  %v2899_v19 = vld [vmem:[%s3007_s10 + $0xd8] ss:$8 sps:$4 sm:$0xff]  }
  0x36   : > { %2675 = vmatpush3.bf16.msra.mxu1 %v2864_v27  ;;  %2652 = vmatprep.subr.bf16.mxu0 %v2865_v28  ;;  %v2878_v27 = vld [vmem:[%s3367_s1 + $0xc0] sm:$0xff]   ;;  %v594_v38 = vrot.slane %v592_v29, 5 }
  0x37   : > { %2676 = vmatprep.subr.bf16.mxu1 %v2866_v30  ;;  %2686 = vmatprep.mubr.bf16.mxu1 %v2879_v2  ;;  %v588_v34 = vrot.slane %v586_v26, 5  ;;  %v602_v40 = vrot.slane %v600_v31, 5  ;;  %v2893_v31 = vld [vmem:[%s3367_s1 + $0x110] sm:$0xff]  }
  0x38   : > { %2662 = vmatprep.mubr.bf16.mxu0 %v2243_v17  ;;  %v2890_v17 = vld [vmem:[%s3367_s1 + $0x160] sm:$0xff]  }
  0x39   : > { %2653 = vmatpush3.bf16.msra.mxu0 %v2865_v28  ;;  %v581_v28 = vsel %vm3078_vm2, %v576_v18, %v580_v15  ;;  %v589_v43 = vor.u32 %v588_v34, %v585_v33  ;;  %v2888_v15 = vld [vmem:[%s3007_s10 + $0xc0] ss:$8 sps:$4 sm:$0xff]   ;;  %v2891_v18 = vld [vmem:[%s3367_s1 + $0x118] sm:$0xff]   ;;  %v2894_v34 = vld [vmem:[%s3367_s1 + $0x150] sm:$0xff]  }
  0x3a   : > { %2677 = vmatpush3.bf16.msra.mxu1 %v2866_v30  ;;  %2654 = vmatprep.subr.bf16.mxu0 %v2867_v36  ;;  %v597_v30 = vshrl.u32 %v517_v23, 16  ;;  %v2244_v62 = vcombine.low %v567_v22, %v581_v28  ;;  %v2328_v22 = vld [vmem:[%s3007_s10 + $0x94] sm:$0x1]  ;;  %v2329_v23 = vld [vmem:[%s3007_s10 + $0x98] sm:$0xf] }
  0x3b   : > { %2678 = vmatprep.subr.bf16.mxu1 %v2868_v42  ;;  %v590_v53 = vrot.slane %v589_v43, 4  ;;  %v1165_v28 = vshrl.u32 %v2329_v23, 16  ;;  %v1168_v29 = vshll.u32 %v2329_v23, 16  ;;  %v2333_v43 = vld [vmem:[%s3007_s10 + $0xa8] sm:$0xf] }
  0x3c   : > { %v599_v39 = vrot.slane %v597_v30, 4  ;;  %v1174_v30 = vshll.u32 %v2330_v24, 16  ;;  %v1196_v50 = vshll.u32 %v2333_v43, 16  ;;  %v2340_v24 = vld [vmem:[%s3007_s10 + $0xc4] sm:$0x1] }
  0x3d   : > { %2655 = vmatpush3.bf16.msra.mxu0 %v2867_v36  ;;  %v520_v36 = vld [vmem:[%s3007_s10 + $0x34] sm:$0x1]  ;;  %v595_v63 = vsel %vm3078_vm2, %v590_v53, %v594_v38  ;;  %v1170_v37 = vrot.slane %v1168_v29, 5  ;;  %v2341_v29 = vld [vmem:[%s3007_s10 + $0xc8] sm:$0xf] }
  0x3e   : > { %2679 = vmatpush3.bf16.msra.mxu1 %v2868_v42  ;;  %2656 = vmatprep.subr.bf16.mxu0 %v2873_v60  ;;  %v614_v42 = vshll.u32 %v519_v32, 16  ;;  %v620_v47 = vshll.u32 %v520_v36, 16  ;;  %v603_v48 = vor.u32 %v602_v40, %v599_v39  ;;  %v1167_v36 = vrot.slane %v1165_v28, 4  ;;  %v2331_v40 = vld [vmem:[%s3007_s10 + $0xa0] sm:$0xf] }
  0x3f   : > { %2680 = vmatprep.subr.bf16.mxu1 %v2874_v3  ;;  %v1176_v38 = vrot.slane %v1174_v30, 5  ;;  %v1179_v45 = vshrl.u32 %v2331_v40, 16 }
  0x40   : > { %v616_v49 = vrot.slane %v614_v42, 5  ;;  %v604_v57 = vrot.slane %v603_v48, 4  ;;  %v622_v0 = vrot.slane %v620_v47, 5  ;;  %v1171_v42 = vor.u32 %v1170_v37, %v1167_v36  ;;  %v2904_v37 = vld [vmem:[%s3367_s1 + $0x1f0] sm:$0xff]  }
  0x41   : > { %2657 = vmatpush3.bf16.msra.mxu0 %v2873_v60  ;;  %v630_v60 = vrot.slane %v628_v51, 5  ;;  %v1188_v48 = vshll.u32 %v2332_v41, 16  ;;  %v1249_v41 = vshrl.u32 %v2341_v29, 16 }
  0x42   : > { %2681 = vmatpush3.bf16.msra.mxu1 %v2874_v3  ;;  %2658 = vmatprep.subr.bf16.mxu0 %v2875_v12  ;;  %v617_v58 = vor.u32 %v616_v49, %v613_v46  ;;  %v609_v2 = vsel %vm3078_vm2, %v604_v57, %v608_v44  ;;  %v2334_v44 = vld [vmem:[%s3007_s10 + $0xac] sm:$0x1]  ;;  %v1182_v46 = vshll.u32 %v2331_v40, 16  ;;  %v1193_v49 = vshrl.u32 %v2333_v43, 16 }
  0x43   : > { %2682 = vmatprep.subr.bf16.mxu1 %v2876_v16  ;;  %v631_v4 = vor.u32 %v630_v60, %v627_v59  ;;  %v2245_v8 = vcombine.low %v595_v63, %v609_v2  ;;  %v1172_v51 = vrot.slane %v1171_v42, 4  ;;  %v1202_v54 = vshll.u32 %v2334_v44, 16  ;;  %v2896_v59 = vld [vmem:[%s3367_s1 + $0x148] sm:$0xff]  }
  0x44   : > { %v618_v3 = vrot.slane %v617_v58, 4  ;;  %v1184_v53 = vrot.slane %v1182_v46, 5  ;;  %v1195_v57 = vrot.slane %v1193_v49, 4  ;;  %v1198_v58 = vrot.slane %v1196_v50, 5  ;;  %v2907_v49 = vld [vmem:[%s3367_s1 + $0x1a8] sm:$0xff]  }
  0x45   : > { %2659 = vmatpush3.bf16.msra.mxu0 %v2875_v12  ;;  %v632_v9 = vrot.slane %v631_v4, 4  ;;  %v1177_v60 = vsel %vm3078_vm2, %v1172_v51, %v1176_v38  ;;  %v1190_v63 = vrot.slane %v1188_v48, 5  ;;  %v1204_v2 = vrot.slane %v1202_v54, 5 }
  0x46   : > { %2683 = vmatpush3.bf16.msra.mxu1 %v2876_v16  ;;  %2660 = vmatprep.subr.bf16.mxu0 %v2877_v21  ;;  %v623_v11 = vsel %vm3078_vm2, %v618_v3, %v622_v0  ;;  %v2889_v16 = vld [vmem:[%s3367_s1 + $0x120] sm:$0xff]   ;;  %v1244_v40 = vshll.u32 %v2340_v24, 16  ;;  %v1252_v43 = vshll.u32 %v2341_v29, 16  ;;  %v1251_v48 = vrot.slane %v1249_v41, 4  ;;  %v2451_v24 = vld [vmem:[%s3007_s10 + $0x28] sm:$0xf] }
  0x47   : > { %2684 = vmatprep.subr.bf16.mxu1 %v2878_v27  ;;  %v637_v12 = vsel %vm3078_vm2, %v632_v9, %v636_v5  ;;  %v2897_v3 = vld [vmem:[%s3367_s1 + $0x100] sm:$0xff]   ;;  %v2901_v9 = vld [vmem:[%s3367_s1 + $0x1b8] sm:$0xff]   ;;  %v2924_v41 = vld [vmem:[%s3367_s1 + $0x230] sm:$0xff]  }
  0x48   : > { %v2246_v14 = vcombine.low %v623_v11, %v637_v12  ;;  %v2898_v5 = vld [vmem:[%s3367_s1 + $0x140] sm:$0xff]   ;;  %v2336_v11 = vld [vmem:[%s3007_s10 + $0xb4] sm:$0x1]  ;;  %v2337_v12 = vld [vmem:[%s3007_s10 + $0xb8] sm:$0xf]  ;;  %v1246_v51 = vrot.slane %v1244_v40, 5 }
  0x49   : > { %2661 = vmatpush3.bf16.msra.mxu0 %v2877_v21  ;;  %v2327_v21 = vld [vmem:[%s3007_s10 + $0x90] sm:$0xf] }
  0x4a   : > { %2685 = vmatpush3.bf16.msra.mxu1 %v2878_v27  ;;  %2694 = vmatprep.subr.bf16.mxu0 %v2880_v52  ;;  %v1151_v25 = vshrl.u32 %v2327_v21, 16  ;;  %v1154_v26 = vshll.u32 %v2327_v21, 16  ;;  %v1160_v27 = vshll.u32 %v2328_v22, 16  ;;  %v1221_v21 = vshrl.u32 %v2337_v12, 16 }
  0x4b   : > { %2718 = vmatprep.subr.bf16.mxu1 %v2881_v55  ;;  %v1224_v22 = vshll.u32 %v2337_v12, 16  ;;  %v2917_v12 = vld [vmem:[%s3367_s1 + $0x180] sm:$0xff]  }
  0x4c   : > { %2663 = vmatmul.mubr.bf16.vlgmr.msra.gmra.mxu0 %v2244_v62  ;;  %v1153_v32 = vrot.slane %v1151_v25, 4  ;;  %v1156_v33 = vrot.slane %v1154_v26, 5  ;;  %v1162_v35 = vrot.slane %v1160_v27, 5 }
  0x4d   : > { %2687 = vmatmul.mubr.bf16.vlgmr.msra.gmra.mxu1 %v2882_v56  ;;  %2695 = vmatpush3.bf16.msra.mxu0 %v2880_v52  ;;  %v1181_v52 = vrot.slane %v1179_v45, 4  ;;  %v2905_v45 = vld [vmem:[%s3007_s10 + $0xf8] ss:$8 sps:$4 sm:$0xff]  }
  0x4e   : > { %2719 = vmatpush3.bf16.msra.mxu1 %v2881_v55  ;;  %2696 = vmatprep.subr.bf16.mxu0 %v2883_v1  ;;  %v1157_v39 = vor.u32 %v1156_v33, %v1153_v32  ;;  %v2895_v55 = vld [vmem:[%s3367_s1 + $0x108] sm:$0xff]   ;;  %v1223_v32 = vrot.slane %v1221_v21, 4  ;;  %v1226_v33 = vrot.slane %v1224_v22, 5  ;;  %v2920_v21 = vld [vmem:[%s3007_s10 + $0x18] ss:$8 sps:$4 sm:$0xff]  }
  0x4f   : > { %2720 = vmatprep.subr.bf16.mxu1 %v2884_v7  ;;  %2666 = vmatprep.mubr.bf16.mxu0 %v2245_v8  ;;  %v1185_v62 = vor.u32 %v1184_v53, %v1181_v52  ;;  %v2335_v8 = vld [vmem:[%s3007_s10 + $0xb0] sm:$0xf]  ;;  %v1254_v52 = vrot.slane %v1252_v43, 5  ;;  %v2922_v22 = vld [vmem:[%s3367_s1 + $0x238] sm:$0xff]  }
  0x50   : > { %2690 = vmatprep.mubr.bf16.mxu1 %v2887_v6  ;;  %v1158_v47 = vrot.slane %v1157_v39, 4  ;;  %v1227_v42 = vor.u32 %v1226_v33, %v1223_v32  ;;  %v2454_v33 = vld [vmem:[%s3007_s10 + $0x34] sm:$0x1] }
  0x51   : > { %2697 = vmatpush3.bf16.msra.mxu0 %v2883_v1  ;;  %v1199_v1 = vor.u32 %v1198_v58, %v1195_v57  ;;  %v1186_v4 = vrot.slane %v1185_v62, 4  ;;  %v1255_v58 = vor.u32 %v1254_v52, %v1251_v48 }
  0x52   : > { %2721 = vmatpush3.bf16.msra.mxu1 %v2884_v7  ;;  %2698 = vmatprep.subr.bf16.mxu0 %v2885_v10  ;;  %v1163_v56 = vsel %vm3078_vm2, %v1158_v47, %v1162_v35  ;;  %v2342_v35 = vld [vmem:[%s3007_s10 + $0xcc] sm:$0x1]  ;;  %v1228_v50 = vrot.slane %v1227_v42, 4 }
  0x53   : > { %2722 = vmatprep.subr.bf16.mxu1 %v2886_v13  ;;  %v2359_v0 = vcombine.low %v1163_v56, %v1177_v60  ;;  %v1200_v6 = vrot.slane %v1199_v1, 4  ;;  %v1191_v7 = vsel %vm3078_vm2, %v1186_v4, %v1190_v63  ;;  %v1258_v44 = vshll.u32 %v2342_v35, 16  ;;  %v2906_v56 = vld [vmem:[%s3007_s10 + $0x108] ss:$8 sps:$4 sm:$0xff]   ;;  %v2909_v1 = vld [vmem:[%s3367_s1 + $0x1a0] sm:$0xff]  }
  0x54   : > { %2667 = vmatmul.mubr.bf16.gmra.mxu0 %v2246_v14  ;;  %v2902_v14 = vld [vmem:[%s3367_s1 + $0x1f8] sm:$0xff]   ;;  %v1256_v63 = vrot.slane %v1255_v58, 4  ;;  %v2919_v4 = vld [vmem:[%s3007_s10 + $0x8] ss:$8 sps:$4 sm:$0xff]   ;;  %v1834_v35 = vshll.u32 %v2451_v24, 16 }
  0x55   : > { %2699 = vmatpush3.bf16.msra.mxu0 %v2885_v10  ;;  %2691 = vmatmul.mubr.bf16.gmra.mxu1 %v2888_v15  ;;  %v1205_v10 = vsel %vm3078_vm2, %v1200_v6, %v1204_v2  ;;  %v2921_v6 = vld [vmem:[%s3007_s10 + $0x50] ss:$8 sps:$4 sm:$0xff]   ;;  %v2927_v58 = vld [vmem:[%s3367_s1 + $0x228] sm:$0xff]  }
  0x56   : > { %2723 = vmatpush3.bf16.msra.mxu1 %v2886_v13  ;;  %2700 = vmatprep.subr.bf16.mxu0 %v2889_v16  ;;  %v2338_v13 = vld [vmem:[%s3007_s10 + $0xbc] sm:$0x1]  ;;  %v2360_v15 = vcombine.low %v1191_v7, %v1205_v10  ;;  %v2915_v10 = vld [vmem:[%s3367_s1 + $0x188] sm:$0xff]  }
  0x57   : > { %2724 = vmatprep.subr.bf16.mxu1 %v2890_v17  ;;  %2710 = vmatprep.mubr.bf16.mxu0 %v2899_v19  ;;  %v2339_v19 = vld [vmem:[%s3007_s10 + $0xc0] sm:$0xf]  ;;  %v1230_v23 = vshll.u32 %v2338_v13, 16  ;;  %v2912_v7 = vld [vmem:[%s3367_s1 + $0x1d8] sm:$0xff]  }
  0x58   : > { %2734 = vmatprep.mubr.bf16.mxu1 %v2359_v0  ;;  %v1235_v25 = vshrl.u32 %v2339_v19, 16  ;;  %v1238_v30 = vshll.u32 %v2339_v19, 16  ;;  %v2918_v13 = vld [vmem:[%s3367_s1 + $0x1c0] sm:$0xff]  }
  0x59   : > { %2701 = vmatpush3.bf16.msra.mxu0 %v2889_v16  ;;  %v1207_v16 = vshrl.u32 %v2335_v8, 16 }
  0x5a   : > { %2725 = vmatpush3.bf16.msra.mxu1 %v2890_v17  ;;  %2702 = vmatprep.subr.bf16.mxu0 %v2891_v18  ;;  %v1210_v17 = vshll.u32 %v2335_v8, 16  ;;  %v1237_v36 = vrot.slane %v1235_v25, 4  ;;  %v1240_v39 = vrot.slane %v1238_v30, 5  ;;  %v2913_v8 = vld [vmem:[%s3367_s1 + $0x190] sm:$0xff]   ;;  %v2452_v25 = vld [vmem:[%s3007_s10 + $0x2c] sm:$0x1] }
  0x5b   : > { %2726 = vmatprep.subr.bf16.mxu1 %v2892_v20  ;;  %v1209_v26 = vrot.slane %v1207_v16, 4  ;;  %v2445_v16 = vld [vmem:[%s3007_s10 + $0x10] sm:$0xf] }
  0x5c   : > { %v1212_v27 = vrot.slane %v1210_v17, 5  ;;  %v1241_v47 = vor.u32 %v1240_v39, %v1237_v36  ;;  %v2446_v17 = vld [vmem:[%s3007_s10 + $0x14] sm:$0x1]  ;;  %v2453_v30 = vld [vmem:[%s3007_s10 + $0x30] sm:$0xf] }
  0x5d   : > { %2703 = vmatpush3.bf16.msra.mxu0 %v2891_v18  ;;  %v1216_v18 = vshll.u32 %v2336_v11, 16  ;;  %v2916_v11 = vld [vmem:[%s3367_s1 + $0x1c8] sm:$0xff]   ;;  %v1798_v32 = vshll.u32 %v2446_v17, 16  ;;  %v1845_v39 = vshrl.u32 %v2453_v30, 16  ;;  %v1848_v40 = vshll.u32 %v2453_v30, 16 }
  0x5e   : > { %2727 = vmatpush3.bf16.msra.mxu1 %v2892_v20  ;;  %2704 = vmatprep.subr.bf16.mxu0 %v2893_v31  ;;  %v2900_v20 = vld [vmem:[%s3007_s10 + $0xe8] ss:$8 sps:$4 sm:$0xff]   ;;  %v1213_v38 = vor.u32 %v1212_v27, %v1209_v26  ;;  %v1242_v54 = vrot.slane %v1241_v47, 4 }
  0x5f   : > { %2728 = vmatprep.subr.bf16.mxu1 %v2894_v34  ;;  %v1218_v28 = vrot.slane %v1216_v18, 5  ;;  %v2923_v36 = vld [vmem:[%s3007_s10 + $0x60] ss:$8 sps:$4 sm:$0xff]   ;;  %v1847_v48 = vrot.slane %v1845_v39, 4 }
  0x60   : > { %v1214_v46 = vrot.slane %v1213_v38, 4  ;;  %v1247_v62 = vsel %vm3078_vm2, %v1242_v54, %v1246_v51  ;;  %v1840_v38 = vshll.u32 %v2452_v25, 16 }
  0x61   : > { %2705 = vmatpush3.bf16.msra.mxu0 %v2893_v31  ;;  %v2903_v31 = vld [vmem:[%s3367_s1 + $0x1b0] sm:$0xff]  }
  0x62   : > { %2729 = vmatpush3.bf16.msra.mxu1 %v2894_v34  ;;  %2706 = vmatprep.subr.bf16.mxu0 %v2895_v55  ;;  %v1232_v34 = vrot.slane %v1230_v23, 5  ;;  %v1219_v53 = vsel %vm3078_vm2, %v1214_v46, %v1218_v28  ;;  %v1792_v23 = vshll.u32 %v2445_v16, 16  ;;  %v2925_v46 = vld [vmem:[%s3007_s10 + $0x28] ss:$8 sps:$4 sm:$0xff]  }
  0x63   : > { %2730 = vmatprep.subr.bf16.mxu1 %v2896_v59 }
  0x64   : > { %v1233_v57 = vsel %vm3078_vm2, %v1228_v50, %v1232_v34  ;;  %v1831_v34 = vshrl.u32 %v2451_v24, 16  ;;  %v2928_v50 = vld [vmem:[%s3007_s10 + $0x70] ss:$8 sps:$4 sm:$0xff]  }
  0x65   : > { %2707 = vmatpush3.bf16.msra.mxu0 %v2895_v55  ;;  %v1260_v55 = vrot.slane %v1258_v44, 5  ;;  %v2361_v60 = vcombine.low %v1219_v53, %v1233_v57  ;;  %v1836_v44 = vrot.slane %v1834_v35, 5  ;;  %v1800_v53 = vrot.slane %v1798_v32, 5  ;;  %v2458_v32 = vld [vmem:[%s3007_s10 + $0x44] sm:$0x1] }
  0x66   : > { %2731 = vmatpush3.bf16.msra.mxu1 %v2896_v59  ;;  %2708 = vmatprep.subr.bf16.mxu0 %v2897_v3  ;;  %v2908_v59 = vld [vmem:[%s3367_s1 + $0x1e8] sm:$0xff]   ;;  %v1833_v43 = vrot.slane %v1831_v34, 4 }
  0x67   : > { %2732 = vmatprep.subr.bf16.mxu1 %v2898_v5  ;;  %v1261_v0 = vsel %vm3078_vm2, %v1256_v63, %v1260_v55  ;;  %v1842_v55 = vrot.slane %v1840_v38, 5 }
  0x68   : > { %v2362_v2 = vcombine.low %v1247_v62, %v1261_v0  ;;  %v1837_v54 = vor.u32 %v1836_v44, %v1833_v43  ;;  %v2926_v62 = vld [vmem:[%s3007_s10 + $0x38] ss:$8 sps:$4 sm:$0xff]  }
  0x69   : > { %2709 = vmatpush3.bf16.msra.mxu0 %v2897_v3  ;;  %v2910_v3 = vld [vmem:[%s3367_s1 + $0x1e0] sm:$0xff]  }
  0x6a   : > { %2733 = vmatpush3.bf16.msra.mxu1 %v2898_v5  ;;  %2742 = vmatprep.subr.bf16.mxu0 %v2901_v9  ;;  %v2911_v5 = vld [vmem:[%s3367_s1 + $0x198] sm:$0xff]  }
  0x6b   : > { %2766 = vmatprep.subr.bf16.mxu1 %v2902_v14 }
  0x6c   : > { %2711 = vmatmul.mubr.bf16.vlgmr.msra.gmra.mxu0 %v2900_v20  ;;  %v1789_v20 = vshrl.u32 %v2445_v16, 16 }
  0x6d   : > { %2735 = vmatmul.mubr.bf16.vlgmr.msra.gmra.mxu1 %v2360_v15  ;;  %2743 = vmatpush3.bf16.msra.mxu0 %v2901_v9  ;;  %v2914_v9 = vld [vmem:[%s3367_s1 + $0x1d0] sm:$0xff]   ;;  %v2444_v15 = vld [vmem:[%s3007_s10 + $0xc] sm:$0x1] }
  0x6e   : > { %2767 = vmatpush3.bf16.msra.mxu1 %v2902_v14  ;;  %2744 = vmatprep.subr.bf16.mxu0 %v2903_v31  ;;  %v2443_v14 = vld [vmem:[%s3007_s10 + $0x8] sm:$0xf]  ;;  %v1784_v28 = vshll.u32 %v2444_v15, 16  ;;  %v1791_v29 = vrot.slane %v1789_v20, 4  ;;  %v2931_v15 = vld [vmem:[%s3367_s1 + $0x218] sm:$0xff]   ;;  %v2932_v20 = vld [vmem:[%s3367_s1 + $0x210] sm:$0xff]  }
  0x6f   : > { %2768 = vmatprep.subr.bf16.mxu1 %v2904_v37  ;;  %2714 = vmatprep.mubr.bf16.mxu0 %v2905_v45  ;;  %v1775_v18 = vshrl.u32 %v2443_v14, 16  ;;  %v1778_v19 = vshll.u32 %v2443_v14, 16  ;;  %v1854_v45 = vshll.u32 %v2454_v33, 16 }
  0x70   : > { %2738 = vmatprep.mubr.bf16.mxu1 %v2361_v60  ;;  %v1786_v47 = vrot.slane %v1784_v28, 5 }
  0x71   : > { %2745 = vmatpush3.bf16.msra.mxu0 %v2903_v31  ;;  %v1777_v26 = vrot.slane %v1775_v18, 4  ;;  %v1780_v27 = vrot.slane %v1778_v19, 5  ;;  %v1794_v31 = vrot.slane %v1792_v23, 5  ;;  %v1856_v57 = vrot.slane %v1854_v45, 5 }
  0x72   : > { %2769 = vmatpush3.bf16.msra.mxu1 %v2904_v37  ;;  %2746 = vmatprep.subr.bf16.mxu0 %v2907_v49 }
  0x73   : > { %2770 = vmatprep.subr.bf16.mxu1 %v2908_v59  ;;  %v1781_v37 = vor.u32 %v1780_v27, %v1777_v26  ;;  %v1795_v42 = vor.u32 %v1794_v31, %v1791_v29  ;;  %v2450_v26 = vld [vmem:[%s3007_s10 + $0x24] sm:$0x1]  ;;  %v2456_v31 = vld [vmem:[%s3007_s10 + $0x3c] sm:$0x1] }
  0x74   : > { %2715 = vmatmul.mubr.bf16.gmra.mxu0 %v2906_v56  ;;  %v1868_v39 = vshll.u32 %v2456_v31, 16 }
  0x75   : > { %2747 = vmatpush3.bf16.msra.mxu0 %v2907_v49  ;;  %2739 = vmatmul.mubr.bf16.gmra.mxu1 %v2362_v2  ;;  %v1850_v49 = vrot.slane %v1848_v40, 5  ;;  %v1782_v51 = vrot.slane %v1781_v37, 4  ;;  %v1796_v52 = vrot.slane %v1795_v42, 4  ;;  %v2933_v37 = vld [vmem:[%s3367_s1 + $0x208] sm:$0xff]  }
  0x76   : > { %2771 = vmatpush3.bf16.msra.mxu1 %v2908_v59  ;;  %2748 = vmatprep.subr.bf16.mxu0 %v2909_v1  ;;  %v1838_v59 = vrot.slane %v1837_v54, 4 }
  0x77   : > { %2772 = vmatprep.subr.bf16.mxu1 %v2910_v3  ;;  %2758 = vmatprep.mubr.bf16.mxu0 %v2919_v4  ;;  %v1851_v56 = vor.u32 %v1850_v49, %v1847_v48  ;;  %v1787_v63 = vsel %vm3078_vm2, %v1782_v51, %v1786_v47  ;;  %v1801_v0 = vsel %vm3078_vm2, %v1796_v52, %v1800_v53  ;;  %v2930_v4 = vld [vmem:[%s3367_s1 + $0x220] sm:$0xff]   ;;  %v1870_v48 = vrot.slane %v1868_v39, 5 }
  0x78   : > { %2782 = vmatprep.mubr.bf16.mxu1 %v2921_v6  ;;  %v1843_v2 = vsel %vm3078_vm2, %v1838_v59, %v1842_v55  ;;  %v2449_v6 = vld [vmem:[%s3007_s10 + $0x20] sm:$0xf] }
  0x79   : > { %2749 = vmatpush3.bf16.msra.mxu0 %v2909_v1  ;;  %v1852_v60 = vrot.slane %v1851_v56, 4  ;;  %v2929_v1 = vld [vmem:[%s3007_s10 + $0x80] ss:$8 sps:$4 sm:$0xff]   ;;  %v1820_v14 = vshll.u32 %v2449_v6, 16 }
  0x7a   : > { %2773 = vmatpush3.bf16.msra.mxu1 %v2910_v3  ;;  %2750 = vmatprep.subr.bf16.mxu0 %v2911_v5 }
  0x7b   : > { %2774 = vmatprep.subr.bf16.mxu1 %v2912_v7  ;;  %v1857_v3 = vsel %vm3078_vm2, %v1852_v60, %v1856_v57  ;;  %v1822_v25 = vrot.slane %v1820_v14, 5 }
  0x7d   : > { %2751 = vmatpush3.bf16.msra.mxu0 %v2911_v5  ;;  %v2447_v5 = vld [vmem:[%s3007_s10 + $0x18] sm:$0xf] }
  0x7e   : > { %2775 = vmatpush3.bf16.msra.mxu1 %v2912_v7  ;;  %2752 = vmatprep.subr.bf16.mxu0 %v2913_v8  ;;  %v2475_v7 = vcombine.low %v1787_v63, %v1801_v0 }
  0x7f   : > { %2776 = vmatprep.subr.bf16.mxu1 %v2914_v9 }
  0x81   : > { %2753 = vmatpush3.bf16.msra.mxu0 %v2913_v8  ;;  %v2455_v8 = vld [vmem:[%s3007_s10 + $0x38] sm:$0xf] }
  0x82   : > { %2777 = vmatpush3.bf16.msra.mxu1 %v2914_v9  ;;  %2754 = vmatprep.subr.bf16.mxu0 %v2915_v10  ;;  %v2457_v9 = vld [vmem:[%s3007_s10 + $0x40] sm:$0xf]  ;;  %v1859_v16 = vshrl.u32 %v2455_v8, 16  ;;  %v1862_v17 = vshll.u32 %v2455_v8, 16 }
  0x83   : > { %2778 = vmatprep.subr.bf16.mxu1 %v2916_v11  ;;  %v1873_v18 = vshrl.u32 %v2457_v9, 16  ;;  %v1876_v19 = vshll.u32 %v2457_v9, 16 }
  0x84   : > { %v1861_v27 = vrot.slane %v1859_v16, 4  ;;  %v1864_v28 = vrot.slane %v1862_v17, 5 }
  0x85   : > { %2755 = vmatpush3.bf16.msra.mxu0 %v2915_v10  ;;  %v2477_v10 = vcombine.low %v1843_v2, %v1857_v3  ;;  %v1875_v29 = vrot.slane %v1873_v18, 4  ;;  %v1878_v30 = vrot.slane %v1876_v19, 5 }
  0x86   : > { %2779 = vmatpush3.bf16.msra.mxu1 %v2916_v11  ;;  %2756 = vmatprep.subr.bf16.mxu0 %v2917_v12  ;;  %v1803_v11 = vshrl.u32 %v2447_v5, 16  ;;  %v1865_v38 = vor.u32 %v1864_v28, %v1861_v27 }
  0x87   : > { %2780 = vmatprep.subr.bf16.mxu1 %v2918_v13  ;;  %v1879_v40 = vor.u32 %v1878_v30, %v1875_v29 }
  0x88   : > { %v1866_v47 = vrot.slane %v1865_v38, 4 }
  0x89   : > { %2757 = vmatpush3.bf16.msra.mxu0 %v2917_v12  ;;  %v1806_v12 = vshll.u32 %v2447_v5, 16  ;;  %v1880_v49 = vrot.slane %v1879_v40, 4 }
  0x8a   : > { %2781 = vmatpush3.bf16.msra.mxu1 %v2918_v13  ;;  %2790 = vmatprep.subr.bf16.mxu0 %v2922_v22  ;;  %v1817_v13 = vshrl.u32 %v2449_v6, 16  ;;  %v1871_v53 = vsel %vm3078_vm2, %v1866_v47, %v1870_v48 }
  0x8b   : > { %2814 = vmatprep.subr.bf16.mxu1 %v2922_v22  ;;  %v1808_v23 = vrot.slane %v1806_v12, 5 }
  0x8c   : > { %2759 = vmatmul.mubr.bf16.vlgmr.msra.gmra.mxu0 %v2920_v21  ;;  %v2448_v21 = vld [vmem:[%s3007_s10 + $0x1c] sm:$0x1]  ;;  %v1819_v24 = vrot.slane %v1817_v13, 4 }
  0x8d   : > { %2783 = vmatmul.mubr.bf16.vlgmr.msra.gmra.mxu1 %v2923_v36  ;;  %2791 = vmatpush3.bf16.msra.mxu0 %v2922_v22  ;;  %v1812_v34 = vshll.u32 %v2448_v21, 16  ;;  %v1826_v36 = vshll.u32 %v2450_v26, 16 }
  0x8e   : > { %2822 = vmatpush3.bf16.msra.mxu1 %v2922_v22  ;;  %2792 = vmatprep.subr.bf16.mxu0 %v2924_v41  ;;  %v1805_v22 = vrot.slane %v1803_v11, 4  ;;  %v1823_v35 = vor.u32 %v1822_v25, %v1819_v24 }
  0x8f   : > { %2815 = vmatprep.subr.bf16.mxu1 %v2924_v41  ;;  %2762 = vmatprep.mubr.bf16.mxu0 %v2925_v46  ;;  %v1814_v43 = vrot.slane %v1812_v34, 5  ;;  %v1828_v45 = vrot.slane %v1826_v36, 5  ;;  %v2934_v46 = vld [vmem:[%s3367_s1 + $0x200] sm:$0xff]  }
  0x90   : > { %2786 = vmatprep.mubr.bf16.mxu1 %v2928_v50  ;;  %v1809_v33 = vor.u32 %v1808_v23, %v1805_v22  ;;  %v1824_v44 = vrot.slane %v1823_v35, 4 }
  0x91   : > { %2793 = vmatpush3.bf16.msra.mxu0 %v2924_v41 }
  0x92   : > { %2823 = vmatpush3.bf16.msra.mxu1 %v2924_v41  ;;  %2794 = vmatprep.subr.bf16.mxu0 %v2927_v58  ;;  %v1882_v41 = vshll.u32 %v2458_v32, 16  ;;  %v1810_v42 = vrot.slane %v1809_v33, 4  ;;  %v1829_v52 = vsel %vm3078_vm2, %v1824_v44, %v1828_v45 }
  0x93   : > { %2816 = vmatprep.subr.bf16.mxu1 %v2927_v58 }
  0x94   : > { %2763 = vmatmul.mubr.bf16.gmra.mxu0 %v2926_v62  ;;  %v1884_v50 = vrot.slane %v1882_v41, 5  ;;  %v1815_v51 = vsel %vm3078_vm2, %v1810_v42, %v1814_v43 }
  0x95   : > { %2795 = vmatpush3.bf16.msra.mxu0 %v2927_v58  ;;  %2787 = vmatmul.mubr.bf16.gmra.mxu1 %v2929_v1  ;;  %v2476_v55 = vcombine.low %v1815_v51, %v1829_v52 }
  0x96   : > { %2824 = vmatpush3.bf16.msra.mxu1 %v2927_v58  ;;  %2796 = vmatprep.subr.bf16.mxu0 %v2930_v4  ;;  %v1885_v54 = vsel %vm3078_vm2, %v1880_v49, %v1884_v50 }
  0x97   : > { %2817 = vmatprep.subr.bf16.mxu1 %v2930_v4  ;;  %2806 = vmatprep.mubr.bf16.mxu0 %v2475_v7  ;;  %v2478_v56 = vcombine.low %v1871_v53, %v1885_v54 }
  0x98   : > { %2810 = vmatprep.mubr.bf16.mxu1 %v2477_v10 }
  0x99   : > { %2797 = vmatpush3.bf16.msra.mxu0 %v2930_v4 }
  0x9a   : > { %2825 = vmatpush3.bf16.msra.mxu1 %v2930_v4  ;;  %2798 = vmatprep.subr.bf16.mxu0 %v2931_v15 }
  0x9b   : > { %2818 = vmatprep.subr.bf16.mxu1 %v2931_v15 }
  0x9d   : > { %2799 = vmatpush3.bf16.msra.mxu0 %v2931_v15 }
  0x9e   : > { %2826 = vmatpush3.bf16.msra.mxu1 %v2931_v15  ;;  %2800 = vmatprep.subr.bf16.mxu0 %v2932_v20 }
  0x9f   : > { %2819 = vmatprep.subr.bf16.mxu1 %v2932_v20 }
  0xa1   : > { %2801 = vmatpush3.bf16.msra.mxu0 %v2932_v20 }
  0xa2   : > { %2827 = vmatpush3.bf16.msra.mxu1 %v2932_v20  ;;  %2802 = vmatprep.subr.bf16.mxu0 %v2933_v37 }
  0xa3   : > { %2820 = vmatprep.subr.bf16.mxu1 %v2933_v37 }
  0xa5   : > { %2803 = vmatpush3.bf16.msra.mxu0 %v2933_v37 }
  0xa6   : > { %2828 = vmatpush3.bf16.msra.mxu1 %v2933_v37  ;;  %2804 = vmatprep.subr.bf16.mxu0 %v2934_v46 }
  0xa7   : > { %2821 = vmatprep.subr.bf16.mxu1 %v2934_v46 }
  0xa9   : > { %2805 = vmatpush3.bf16.msra.mxu0 %v2934_v46 }
  0xaa   : > { %2829 = vmatpush3.bf16.msra.mxu1 %v2934_v46 }
  0xac   : > { %2807 = vmatmul.mubr.bf16.vlgmr.msra.gmra.mxu0 %v2476_v55 }
  0xad   : > { %2811 = vmatmul.mubr.bf16.vlgmr.msra.gmra.mxu1 %v2478_v56 }
  0xec   : > { %v2616_v57 = vpop.f32.mrf.mxu0 }
  0xed   : > { %v2640_v58 = vpop.f32.mrf.mxu1 }
  0xee   : > { %v339_v59 = vpop.f32.mrf.mxu0  ;;  %v485_v47 = vadd.f32 %v2640_v58, %v2616_v57 }
  0xef   : > { %v476_v60 = vpop.f32.mrf.mxu1 }
  0xf0   : > { %v2617_v62 = vpop.f32.mrf.mxu0  ;;  %v477_v50 = vadd.f32 %v476_v60, %v339_v59 }
  0xf1   : > { %v2641_v63 = vpop.f32.mrf.mxu1 }
  0xf2   : > { %v342_v0 = vpop.f32.mrf.mxu0  ;;  %v488_v55 = vadd.f32 %v2641_v63, %v2617_v62 }
  0xf3   : > { %v479_v1 = vpop.f32.mrf.mxu1 }
  0xf4   : > { %v2620_v2 = vpop.f32.mrf.mxu0 }
  0xf5   : > { %v2644_v3 = vpop.f32.mrf.mxu1 }
  0xf6   : > { %v355_v4 = vpop.f32.mrf.mxu0  ;;  %v501_v48 = vadd.f32 %v2644_v3, %v2620_v2 }
  0xf7   : > { %v492_v61 = vpop.f32.mrf.mxu1 }
  0xf8   : > { %v2621_v5 = vpop.f32.mrf.mxu0  ;;  %v493_v53 = vadd.f32 %v492_v61, %v355_v4 }
  0xf9   : > { %v2645_v6 = vpop.f32.mrf.mxu1 }
  0xfa   : > { %v358_v7 = vpop.f32.mrf.mxu0 }
  0xfb   : > { %v495_v8 = vpop.f32.mrf.mxu1 }
  0xfc   : > { %v496_v58 = vadd.f32 %v495_v8, %v358_v7 }
 0x10c   : > { %v2664_v9 = vpop.f32.mrf.mxu0 }
 0x10d   : > { %v2688_v10 = vpop.f32.mrf.mxu1  ;;  %v786_v51 = vadd.f32 %v2664_v9, %v485_v47 }
 0x10e   : > { %v753_v11 = vpop.f32.mrf.mxu0 }
 0x10f   : > { %v924_v12 = vpop.f32.mrf.mxu1  ;;  %v784_v56 = vadd.f32 %v753_v11, %v477_v50 }
 0x110   : > { %v2665_v13 = vpop.f32.mrf.mxu0 }
 0x111   : > { %v2689_v14 = vpop.f32.mrf.mxu1  ;;  %v955_v59 = vadd.f32 %v924_v12, %v784_v56 }
 0x112   : > { %v756_v15 = vpop.f32.mrf.mxu0 }
 0x113   : > { %v3324_v16 = vpop.f32.mrf.mxu1 }
 0x114   : > { %3372 = vst [vmem:[#allocation2_spill] sm:$0xff] %v3324_v16  ;;  %v2668_v17 = vpop.f32.mrf.mxu0  ;;  %v480_v16 = vadd.f32 %v479_v1, %v342_v0 }
 0x115   : > { %v2692_v18 = vpop.f32.mrf.mxu1  ;;  %v790_v54 = vadd.f32 %v2668_v17, %v501_v48 }
 0x116   : > { %v769_v19 = vpop.f32.mrf.mxu0  ;;  %v785_v60 = vadd.f32 %v756_v15, %v480_v16 }
 0x117   : > { %v940_v20 = vpop.f32.mrf.mxu1  ;;  %v961_v2 = vadd.f32 %v2692_v18, %v790_v54 }
 0x118   : > { %v2669_v21 = vpop.f32.mrf.mxu0 }
 0x119   : > { %v2693_v22 = vpop.f32.mrf.mxu1 }
 0x11a   : > { %v772_v23 = vpop.f32.mrf.mxu0 }
 0x11b   : > { %v943_v24 = vpop.f32.mrf.mxu1  ;;  %v3379_v11 = vld [vmem:[#allocation2_spill] sm:$0xff] }
 0x11c   : > { %v956_v0 = vadd.f32 %v3379_v11, %v785_v60 }
 0x12c   : > { %v2712_v25 = vpop.f32.mrf.mxu0 }
 0x12d   : > { %v2736_v26 = vpop.f32.mrf.mxu1 }
 0x12e   : > { %v1095_v27 = vpop.f32.mrf.mxu0 }
 0x12f   : > { %v1377_v28 = vpop.f32.mrf.mxu1  ;;  %v1126_v62 = vadd.f32 %v1095_v27, %v955_v59 }
 0x130   : > { %v2713_v29 = vpop.f32.mrf.mxu0 }
 0x131   : > { %v3326_v30 = vpop.f32.mrf.mxu1  ;;  %v1408_v15 = vadd.f32 %v1377_v28, %v1126_v62 }
 0x132   : > { %3373 = vst [vmem:[#allocation3_spill] sm:$0xff] %v3326_v30  ;;  %v1098_v31 = vpop.f32.mrf.mxu0 }
 0x133   : > { %v3328_v32 = vpop.f32.mrf.mxu1  ;;  %v1127_v16 = vadd.f32 %v1098_v31, %v956_v0 }
 0x134   : > { %3374 = vst [vmem:[#allocation4_spill] sm:$0xff] %v3328_v32  ;;  %v2716_v33 = vpop.f32.mrf.mxu0  ;;  %v788_v32 = vadd.f32 %v769_v19, %v493_v53 }
 0x135   : > { %v2740_v34 = vpop.f32.mrf.mxu1  ;;  %v1132_v4 = vadd.f32 %v2716_v33, %v961_v2 }
 0x136   : > { %v1111_v35 = vpop.f32.mrf.mxu0  ;;  %v959_v47 = vadd.f32 %v940_v20, %v788_v32 }
 0x137   : > { %v1393_v36 = vpop.f32.mrf.mxu1  ;;  %v1414_v8 = vadd.f32 %v2740_v34, %v1132_v4 }
 0x138   : > { %v2717_v37 = vpop.f32.mrf.mxu0 }
 0x139   : > { %v2741_v38 = vpop.f32.mrf.mxu1 }
 0x13a   : > { %v1114_v39 = vpop.f32.mrf.mxu0 }
 0x13b   : > { %v3330_v40 = vpop.f32.mrf.mxu1 }
 0x13c   : > { %3375 = vst [vmem:[#allocation5_spill] sm:$0xff] %v3330_v40  ;;  %v504_v40 = vadd.f32 %v2645_v6, %v2621_v5  ;;  %v1130_v6 = vadd.f32 %v1111_v35, %v959_v47 }
 0x13e   : > { %v791_v3 = vadd.f32 %v2669_v21, %v504_v40  ;;  %v1412_v20 = vadd.f32 %v1393_v36, %v1130_v6 }
 0x140   : > { %v962_v5 = vadd.f32 %v2693_v22, %v791_v3 }
 0x14c   : > { %v2760_v41 = vpop.f32.mrf.mxu0 }
 0x14d   : > { %v2784_v42 = vpop.f32.mrf.mxu1 }
 0x14e   : > { %v1548_v43 = vpop.f32.mrf.mxu0 }
 0x14f   : > { %v3332_v44 = vpop.f32.mrf.mxu1  ;;  %v1579_v22 = vadd.f32 %v1548_v43, %v1408_v15 }
 0x150   : > { %3376 = vst [vmem:[#allocation6_spill] sm:$0xff] %v3332_v44  ;;  %v2761_v45 = vpop.f32.mrf.mxu0  ;;  %v957_v44 = vadd.f32 %v2688_v10, %v786_v51 }
 0x151   : > { %v3334_v46 = vpop.f32.mrf.mxu1 }
 0x152   : > { %3377 = vst [vmem:[#allocation7_spill] sm:$0xff] %v3334_v46  ;;  %v1551_v49 = vpop.f32.mrf.mxu0  ;;  %v787_v46 = vadd.f32 %v2665_v13, %v488_v55  ;;  %v1128_v9 = vadd.f32 %v2712_v25, %v957_v44  ;;  %v1133_v13 = vadd.f32 %v2717_v37, %v962_v5  ;;  %v3382_v37 = vld [vmem:[#allocation5_spill] sm:$0xff] }
 0x153   : > { %v3336_v52 = vpop.f32.mrf.mxu1 }
 0x154   : > { %3378 = vst [vmem:[#allocation8_spill] sm:$0xff] %v3336_v52  ;;  %v2764_v30 = vpop.f32.mrf.mxu0  ;;  %v789_v52 = vadd.f32 %v772_v23, %v496_v58  ;;  %v958_v17 = vadd.f32 %v2689_v14, %v787_v46  ;;  %v1410_v1 = vadd.f32 %v2736_v26, %v1128_v9  ;;  %v3380_v23 = vld [vmem:[#allocation3_spill] sm:$0xff]  ;;  %v1415_v27 = vadd.f32 %v2741_v38, %v1133_v13  ;;  %v3381_v26 = vld [vmem:[#allocation4_spill] sm:$0xff] }
 0x155   : > { %v2788_v57 = vpop.f32.mrf.mxu1  ;;  %v1585_v14 = vadd.f32 %v2764_v30, %v1414_v8 }
 0x156   : > { %v1564_v61 = vpop.f32.mrf.mxu0  ;;  %v1129_v10 = vadd.f32 %v2713_v29, %v958_v17  ;;  %v960_v7 = vadd.f32 %v943_v24, %v789_v52  ;;  %v1581_v18 = vadd.f32 %v2760_v41, %v1410_v1  ;;  %v1409_v29 = vadd.f32 %v3381_v26, %v1127_v16 }
 0x157   : > { %v1735_v63 = vpop.f32.mrf.mxu1  ;;  %v1583_v32 = vadd.f32 %v1564_v61, %v1412_v20  ;;  %v1756_v31 = vadd.f32 %v2788_v57, %v1585_v14  ;;  %v3383_v36 = vld [vmem:[#allocation6_spill] sm:$0xff] }
 0x158   : > { %v2765_v12 = vpop.f32.mrf.mxu0  ;;  %v1131_v21 = vadd.f32 %v1114_v39, %v960_v7  ;;  %v1411_v25 = vadd.f32 %v3380_v23, %v1129_v10  ;;  %v1752_v24 = vadd.f32 %v2784_v42, %v1581_v18  ;;  %v1750_v38 = vadd.f32 %v3383_v36, %v1579_v22 }
 0x159   : > { %v2789_v19 = vpop.f32.mrf.mxu1  ;;  %v1586_v40 = vadd.f32 %v2765_v12, %v1415_v27  ;;  %v1580_v39 = vadd.f32 %v1551_v49, %v1409_v29  ;;  %v1754_v43 = vadd.f32 %v1735_v63, %v1583_v32  ;;  %v3384_v48 = vld [vmem:[#allocation7_spill] sm:$0xff] }
 0x15a   : > { %v1567_v33 = vpop.f32.mrf.mxu0  ;;  %v1582_v34 = vadd.f32 %v2761_v45, %v1411_v25  ;;  %v1413_v28 = vadd.f32 %v3382_v37, %v1131_v21 }
 0x15b   : > { %v1738_v35 = vpop.f32.mrf.mxu1  ;;  %v1757_v53 = vadd.f32 %v2789_v19, %v1586_v40  ;;  %v3385_v55 = vld [vmem:[#allocation8_spill] sm:$0xff] }
 0x15c   : > { %v1584_v44 = vadd.f32 %v1567_v33, %v1413_v28  ;;  %v1753_v50 = vadd.f32 %v3384_v48, %v1582_v34  ;;  %v1751_v56 = vadd.f32 %v3385_v55, %v1580_v39 }
 0x15e   : > { %v1755_v2 = vadd.f32 %v1738_v35, %v1584_v44 }
 0x16c   : > { %v2808_v30 = vpop.f32.mrf.mxu0 }
 0x16d   : > { %v2034_v41 = vadd.f32 %v2808_v30, %v1752_v24  ;;  %v2812_v42 = vpop.f32.mrf.mxu1 }
 0x16e   : > { %v2038_v45 = vadd.f32 %v2812_v42, %v1756_v31  ;;  %v2001_v46 = vpop.f32.mrf.mxu0 }
 0x16f   : > { %2042 = vst [vmem:[%s3346_s19 + $0x10] sm:$0xff] %v2034_v41  ;;  %v2032_v51 = vadd.f32 %v2001_v46, %v1750_v38  ;;  %v2017_v52 = vpop.f32.mrf.mxu1  ;;  %v2064_v62 = vmul.f32 %v2034_v41, %v2034_v41 }
 0x170   : > { %2046 = vst [vmem:[%s3346_s19 + $0x30] sm:$0xff] %v2038_v45  ;;  %v2036_v54 = vadd.f32 %v2017_v52, %v1754_v43  ;;  %v2809_v49 = vpop.f32.mrf.mxu0  ;;  %v2068_v15 = vmul.f32 %v2038_v45, %v2038_v45 }
 0x171   : > { %2040 = vst [vmem:[%s3346_s19] sm:$0xff] %v2032_v51  ;;  %v2035_v57 = vadd.f32 %v2809_v49, %v1753_v50  ;;  %v2813_v58 = vpop.f32.mrf.mxu1  ;;  %v2062_v4 = vmul.f32 %v2032_v51, %v2032_v51 }
 0x172   : > { %2044 = vst [vmem:[%s3346_s19 + $0x20] sm:$0xff] %v2036_v54  ;;  %v2039_v3 = vadd.f32 %v2813_v58, %v1757_v53  ;;  %v2004_v59 = vpop.f32.mrf.mxu0  ;;  %v2066_v1 = vmul.f32 %v2036_v54, %v2036_v54 }
 0x173   : > { %2043 = vst [vmem:[%s3346_s19 + $0x18] sm:$0xff] %v2035_v57  ;;  %v2033_v60 = vadd.f32 %v2004_v59, %v1751_v56  ;;  %v2020_v9 = vpop.f32.mrf.mxu1  ;;  %v2065_v6 = vmul.f32 %v2035_v57, %v2035_v57 }
 0x174   : > { %2047 = vst [vmem:[%s3346_s19 + $0x38] sm:$0xff] %v2039_v3  ;;  %v2037_v47 = vadd.f32 %v2020_v9, %v1755_v2  ;;  %v2069_v19 = vmul.f32 %v2039_v3, %v2039_v3 }
 0x175   : > { %2041 = vst [vmem:[%s3346_s19 + $0x8] sm:$0xff] %v2033_v60  ;;  %v2048_v61 = vadd.f32 %v2033_v60, %v2032_v51  ;;  %v2063_v17 = vmul.f32 %v2033_v60, %v2033_v60 }
 0x176   : > { %2045 = vst [vmem:[%s3346_s19 + $0x28] sm:$0xff] %v2037_v47  ;;  %v2067_v13 = vmul.f32 %v2037_v47, %v2037_v47 }
 0x177   : > { %v2049_v63 = vadd.f32 %v2048_v61, %v2034_v41  ;;  %v2070_v5 = vadd.f32 %v2063_v17, %v2062_v4 }
 0x179   : > { %v2071_v11 = vadd.f32 %v2070_v5, %v2064_v62  ;;  %v2050_v0 = vadd.f32 %v2049_v63, %v2035_v57 }
 0x17b   : > { %v2051_v10 = vadd.f32 %v2050_v0, %v2036_v54  ;;  %v2072_v7 = vadd.f32 %v2071_v11, %v2065_v6 }
 0x17d   : > { %v2052_v8 = vadd.f32 %v2051_v10, %v2037_v47  ;;  %v2073_v12 = vadd.f32 %v2072_v7, %v2066_v1 }
 0x17f   : > { %v2053_v16 = vadd.f32 %v2052_v8, %v2038_v45  ;;  %v2074_v18 = vadd.f32 %v2073_v12, %v2067_v13 }
 0x181   : > { %v2054_v20 = vadd.f32 %v2053_v16, %v2039_v3  ;;  %v2075_v21 = vadd.f32 %v2074_v18, %v2068_v15 }
 0x183   : > { %v2055_v14 = vrot.slane %v2054_v20, 4  ;;  %v2076_v23 = vadd.f32 %v2075_v21, %v2069_v19 }
 0x185   : > { %v2056_v25 = vadd.f32 %v2055_v14, %v2054_v20  ;;  %v2077_v22 = vrot.slane %v2076_v23, 4 }
 0x187   : > { %v2057_v27 = vrot.slane %v2056_v25, 2  ;;  %v2078_v32 = vadd.f32 %v2077_v22, %v2076_v23 }
 0x189   : > { %v2058_v33 = vadd.f32 %v2057_v27, %v2056_v25  ;;  %v2079_v26 = vrot.slane %v2078_v32, 2 }
 0x18b   : > { %v2059_v29 = vrot.slane %v2058_v33, 1  ;;  %v2080_v24 = vadd.f32 %v2079_v26, %v2078_v32 }
 0x18d   : > { %v2060_v34 = vadd.f32 %v2059_v29, %v2058_v33  ;;  %v2081_v35 = vrot.slane %v2080_v24, 1 }
 0x18f   : > { %2061 = vst [vmem:[%s181_s23] sm:$0x1] %v2060_v34  ;;  %v2082_v37 = vadd.f32 %v2081_v35, %v2080_v24 }
 0x191   : > { %2083 = vst [vmem:[%s181_s23 + $0x1] sm:$0x1] %v2082_v37 }
 0x192 PF: > { %s14_s12 = sadd.s32 1, %s2941_s12  }
 0x193   : > { %p11_p4 = scmp.ge.s32.totalorder %s14_s12, 4  }
 0x195   :  { %13 = sbr.rel (!%p11_p4) target bundleno = 1 (0x1), region = 83 }

// kernel: conv_block_forward.6
= control target key start
LH: loop header
LB: loop body
LE: loop exit
PB: predicated region body
PF: predicated region fallthrough
CT: control target
= control target key end

     0   :  { %s541_s1 = inlined_call_operand.vmem [shape: bf16[128,128], index: 1, kind: input, shape index: {}]   ;;  %s542_s0 = inlined_call_operand.vmem [shape: bf16[128,128], index: 0, kind: input, shape index: {}]   ;;  %s543_s2 = inlined_call_operand.vmem [shape: f32[128,128], index: 2, kind: output, shape index: {0}]   ;;  %s544_s3 = inlined_call_operand.vmem [shape: f32[1,2,128], index: 3, kind: output, shape index: {1}]  }
   0x1   :  { %v403_v0 = vld [vmem:[%s541_s1 + $0x38] sm:$0xff]   ;;  %v404_v1 = vld [vmem:[%s541_s1 + $0x30] sm:$0xff]   ;;  %v405_v2 = vld [vmem:[%s541_s1 + $0x28] sm:$0xff]  }
   0x2   :  { %355 = vmatprep.subr.bf16.mxu0 %v403_v0  ;;  %387 = vmatprep.subr.bf16.mxu1 %v403_v0  ;;  %v406_v3 = vld [vmem:[%s541_s1 + $0x20] sm:$0xff]   ;;  %v407_v5 = vld [vmem:[%s541_s1 + $0x18] sm:$0xff]   ;;  %v408_v7 = vld [vmem:[%s541_s1 + $0x10] sm:$0xff]  }
   0x3   :  { %356 = vmatpush3.bf16.msra.mxu0 %v403_v0  ;;  %395 = vmatpush3.bf16.msra.mxu1 %v403_v0  ;;  %v411_v4 = vld [vmem:[%s542_s0] sm:$0xff]   ;;  %v409_v8 = vld [vmem:[%s541_s1 + $0x8] sm:$0xff]   ;;  %v413_v12 = vld [vmem:[%s542_s0 + $0x10] sm:$0xff]  }
   0x4   :  { %357 = vmatprep.subr.bf16.mxu0 %v404_v1  ;;  %388 = vmatprep.subr.bf16.mxu1 %v404_v1  ;;  %v415_v6 = vld [vmem:[%s542_s0 + $0x20] sm:$0xff]   ;;  %v412_v10 = vld [vmem:[%s542_s0 + $0x8] sm:$0xff]   ;;  %v417_v13 = vld [vmem:[%s542_s0 + $0x30] sm:$0xff]  }
   0x5   :  { %371 = vmatprep.mubr.bf16.mxu0 %v411_v4  ;;  %379 = vmatprep.mubr.bf16.mxu1 %v415_v6  ;;  %v410_v9 = vld [vmem:[%s541_s1] sm:$0xff]   ;;  %v416_v11 = vld [vmem:[%s542_s0 + $0x28] sm:$0xff]   ;;  %v414_v14 = vld [vmem:[%s542_s0 + $0x18] sm:$0xff]  }
   0x6   :  { %v418_v15 = vld [vmem:[%s542_s0 + $0x38] sm:$0xff]  }
   0x7   :  { %358 = vmatpush3.bf16.msra.mxu0 %v404_v1  ;;  %396 = vmatpush3.bf16.msra.mxu1 %v404_v1 }
   0x8   :  { %359 = vmatprep.subr.bf16.mxu0 %v405_v2  ;;  %389 = vmatprep.subr.bf16.mxu1 %v405_v2 }
   0xb   :  { %360 = vmatpush3.bf16.msra.mxu0 %v405_v2  ;;  %397 = vmatpush3.bf16.msra.mxu1 %v405_v2 }
   0xc   :  { %361 = vmatprep.subr.bf16.mxu0 %v406_v3  ;;  %390 = vmatprep.subr.bf16.mxu1 %v406_v3 }
   0xf   :  { %362 = vmatpush3.bf16.msra.mxu0 %v406_v3  ;;  %398 = vmatpush3.bf16.msra.mxu1 %v406_v3 }
  0x10   :  { %363 = vmatprep.subr.bf16.mxu0 %v407_v5  ;;  %391 = vmatprep.subr.bf16.mxu1 %v407_v5 }
  0x13   :  { %364 = vmatpush3.bf16.msra.mxu0 %v407_v5  ;;  %399 = vmatpush3.bf16.msra.mxu1 %v407_v5 }
  0x14   :  { %365 = vmatprep.subr.bf16.mxu0 %v408_v7  ;;  %392 = vmatprep.subr.bf16.mxu1 %v408_v7 }
  0x17   :  { %366 = vmatpush3.bf16.msra.mxu0 %v408_v7  ;;  %400 = vmatpush3.bf16.msra.mxu1 %v408_v7 }
  0x18   :  { %367 = vmatprep.subr.bf16.mxu0 %v409_v8  ;;  %393 = vmatprep.subr.bf16.mxu1 %v409_v8 }
  0x1b   :  { %368 = vmatpush3.bf16.msra.mxu0 %v409_v8  ;;  %401 = vmatpush3.bf16.msra.mxu1 %v409_v8 }
  0x1c   :  { %369 = vmatprep.subr.bf16.mxu0 %v410_v9  ;;  %394 = vmatprep.subr.bf16.mxu1 %v410_v9 }
  0x1f   :  { %370 = vmatpush3.bf16.msra.mxu0 %v410_v9  ;;  %402 = vmatpush3.bf16.msra.mxu1 %v410_v9 }
  0x22   :  { %372 = vmatmul.mubr.bf16.vlgmr.msra.gmra.mxu0 %v412_v10  ;;  %380 = vmatmul.mubr.bf16.vlgmr.msra.gmra.mxu1 %v416_v11 }
  0x23   :  { %375 = vmatprep.mubr.bf16.mxu0 %v413_v12  ;;  %383 = vmatprep.mubr.bf16.mxu1 %v417_v13 }
  0x2a   :  { %376 = vmatmul.mubr.bf16.gmra.mxu0 %v414_v14  ;;  %384 = vmatmul.mubr.bf16.gmra.mxu1 %v418_v15 }
  0xe2   :  { %v373_v16 = vpop.f32.mrf.mxu0  ;;  %v381_v17 = vpop.f32.mrf.mxu1 }
  0xe3   :  { %241 = vst [vmem:[%s543_s2 + $0x10] sm:$0xff] %v373_v16  ;;  %249 = vst [vmem:[%s543_s2 + $0x50] sm:$0xff] %v381_v17  ;;  %v279_v29 = vmul.f32 %v373_v16, %v373_v16  ;;  %v287_v59 = vmul.f32 %v381_v17, %v381_v17 }
  0xe4   :  { %v176_v18 = vpop.f32.mrf.mxu0  ;;  %v208_v19 = vpop.f32.mrf.mxu1 }
  0xe5   :  { %239 = vst [vmem:[%s543_s2] sm:$0xff] %v176_v18  ;;  %247 = vst [vmem:[%s543_s2 + $0x40] sm:$0xff] %v208_v19  ;;  %v277_v24 = vmul.f32 %v176_v18, %v176_v18  ;;  %v285_v53 = vmul.f32 %v208_v19, %v208_v19 }
  0xe6   :  { %v374_v20 = vpop.f32.mrf.mxu0  ;;  %v382_v21 = vpop.f32.mrf.mxu1 }
  0xe7   :  { %242 = vst [vmem:[%s543_s2 + $0x18] sm:$0xff] %v374_v20  ;;  %250 = vst [vmem:[%s543_s2 + $0x58] sm:$0xff] %v382_v21  ;;  %v280_v34 = vmul.f32 %v374_v20, %v374_v20  ;;  %v288_v62 = vmul.f32 %v382_v21, %v382_v21 }
  0xe8   :  { %v179_v22 = vpop.f32.mrf.mxu0  ;;  %v211_v23 = vpop.f32.mrf.mxu1 }
  0xe9   :  { %240 = vst [vmem:[%s543_s2 + $0x8] sm:$0xff] %v179_v22  ;;  %v255_v25 = vadd.f32 %v179_v22, %v176_v18  ;;  %v278_v26 = vmul.f32 %v179_v22, %v179_v22  ;;  %248 = vst [vmem:[%s543_s2 + $0x48] sm:$0xff] %v211_v23  ;;  %v286_v57 = vmul.f32 %v211_v23, %v211_v23 }
  0xea   :  { %v377_v27 = vpop.f32.mrf.mxu0  ;;  %v385_v28 = vpop.f32.mrf.mxu1 }
  0xeb   :  { %v256_v30 = vadd.f32 %v373_v16, %v255_v25  ;;  %v293_v31 = vadd.f32 %v278_v26, %v277_v24  ;;  %245 = vst [vmem:[%s543_s2 + $0x30] sm:$0xff] %v377_v27  ;;  %253 = vst [vmem:[%s543_s2 + $0x70] sm:$0xff] %v385_v28  ;;  %v283_v47 = vmul.f32 %v377_v27, %v377_v27 }
  0xec   :  { %v192_v32 = vpop.f32.mrf.mxu0  ;;  %v224_v33 = vpop.f32.mrf.mxu1  ;;  %v291_v7 = vmul.f32 %v385_v28, %v385_v28 }
  0xed   :  { %v294_v35 = vadd.f32 %v293_v31, %v279_v29  ;;  %243 = vst [vmem:[%s543_s2 + $0x20] sm:$0xff] %v192_v32  ;;  %v257_v36 = vadd.f32 %v374_v20, %v256_v30  ;;  %251 = vst [vmem:[%s543_s2 + $0x60] sm:$0xff] %v224_v33  ;;  %v281_v40 = vmul.f32 %v192_v32, %v192_v32 }
  0xee   :  { %v378_v37 = vpop.f32.mrf.mxu0  ;;  %v386_v38 = vpop.f32.mrf.mxu1  ;;  %v289_v2 = vmul.f32 %v224_v33, %v224_v33 }
  0xef   :  { %v258_v39 = vadd.f32 %v257_v36, %v192_v32  ;;  %v295_v41 = vadd.f32 %v294_v35, %v280_v34  ;;  %246 = vst [vmem:[%s543_s2 + $0x38] sm:$0xff] %v378_v37  ;;  %254 = vst [vmem:[%s543_s2 + $0x78] sm:$0xff] %v386_v38  ;;  %v284_v50 = vmul.f32 %v378_v37, %v378_v37 }
  0xf0   :  { %v195_v42 = vpop.f32.mrf.mxu0  ;;  %v227_v43 = vpop.f32.mrf.mxu1  ;;  %v292_v10 = vmul.f32 %v386_v38, %v386_v38 }
  0xf1   :  { %v296_v44 = vadd.f32 %v295_v41, %v281_v40  ;;  %244 = vst [vmem:[%s543_s2 + $0x28] sm:$0xff] %v195_v42  ;;  %v259_v45 = vadd.f32 %v258_v39, %v195_v42  ;;  %v282_v46 = vmul.f32 %v195_v42, %v195_v42  ;;  %252 = vst [vmem:[%s543_s2 + $0x68] sm:$0xff] %v227_v43 }
  0xf2   :  { %v290_v6 = vmul.f32 %v227_v43, %v227_v43 }
  0xf3   :  { %v260_v48 = vadd.f32 %v377_v27, %v259_v45  ;;  %v297_v49 = vadd.f32 %v296_v44, %v282_v46 }
  0xf5   :  { %v261_v51 = vadd.f32 %v378_v37, %v260_v48  ;;  %v298_v52 = vadd.f32 %v297_v49, %v283_v47 }
  0xf7   :  { %v299_v54 = vadd.f32 %v298_v52, %v284_v50  ;;  %v262_v55 = vadd.f32 %v261_v51, %v208_v19 }
  0xf9   :  { %v263_v56 = vadd.f32 %v262_v55, %v211_v23  ;;  %v300_v58 = vadd.f32 %v299_v54, %v285_v53 }
  0xfb   :  { %v264_v60 = vadd.f32 %v381_v17, %v263_v56  ;;  %v301_v61 = vadd.f32 %v300_v58, %v286_v57 }
  0xfd   :  { %v302_v63 = vadd.f32 %v301_v61, %v287_v59  ;;  %v265_v0 = vadd.f32 %v382_v21, %v264_v60 }
  0xff   :  { %v266_v1 = vadd.f32 %v265_v0, %v224_v33  ;;  %v303_v3 = vadd.f32 %v302_v63, %v288_v62 }
 0x101   :  { %v304_v4 = vadd.f32 %v303_v3, %v289_v2  ;;  %v267_v5 = vadd.f32 %v266_v1, %v227_v43 }
 0x103   :  { %v268_v8 = vadd.f32 %v385_v28, %v267_v5  ;;  %v305_v9 = vadd.f32 %v304_v4, %v290_v6 }
 0x105   :  { %v269_v11 = vadd.f32 %v386_v38, %v268_v8  ;;  %v306_v12 = vadd.f32 %v305_v9, %v291_v7 }
 0x107   :  { %v270_v13 = vrot.slane %v269_v11, 4  ;;  %v307_v14 = vadd.f32 %v306_v12, %v292_v10 }
 0x109   :  { %v271_v15 = vadd.f32 %v270_v13, %v269_v11  ;;  %v308_v16 = vrot.slane %v307_v14, 4 }
 0x10b   :  { %v272_v17 = vrot.slane %v271_v15, 2  ;;  %v309_v18 = vadd.f32 %v308_v16, %v307_v14 }
 0x10d   :  { %v273_v19 = vadd.f32 %v272_v17, %v271_v15  ;;  %v310_v20 = vrot.slane %v309_v18, 2 }
 0x10f   :  { %v274_v21 = vrot.slane %v273_v19, 1  ;;  %v311_v22 = vadd.f32 %v310_v20, %v309_v18 }
 0x111   :  { %v275_v23 = vadd.f32 %v274_v21, %v273_v19  ;;  %v312_v24 = vrot.slane %v311_v22, 1 }
 0x113   :  { %276 = vst [vmem:[%s544_s3] sm:$0x1] %v275_v23  ;;  %v313_v25 = vadd.f32 %v312_v24, %v311_v22 }
 0x115   :  { %314 = vst [vmem:[%s544_s3 + $0x1] sm:$0x1] %v313_v25 }

// kernel: conv_block_forward.9
= control target key start
LH: loop header
LB: loop body
LE: loop exit
PB: predicated region body
PF: predicated region fallthrough
CT: control target
= control target key end

     0   :  { %s466_s0 = inlined_call_operand.vmem [shape: f32[128,128], index: 0, kind: input, shape index: {}]   ;;  %s467_s1 = inlined_call_operand.vmem [shape: f32[1,128], index: 1, kind: input, shape index: {}]   ;;  %s468_s2 = inlined_call_operand.vmem [shape: f32[1,128], index: 2, kind: input, shape index: {}]   ;;  %s469_s3 = inlined_call_operand.vmem [shape: f32[128,128], index: 3, kind: input, shape index: {}]   ;;  %s470_s4 = inlined_call_operand.vmem [shape: f32[1,128], index: 4, kind: input, shape index: {}]   ;;  %s471_s5 = inlined_call_operand.vmem [shape: f32[1,128], index: 5, kind: input, shape index: {}]   ;;  %s472_s6 = inlined_call_operand.vmem [shape: f32[128,128], index: 6, kind: output, shape index: {}]  }
   0x1   :  { %v23_v0 = vld [vmem:[%s466_s0] sm:$0xff]  ;;  %v24_v8 = vld [vmem:[%s466_s0 + $0x8] sm:$0xff]  ;;  %v25_v10 = vld [vmem:[%s466_s0 + $0x10] sm:$0xff] }
   0x2   :  { %v244_v1 = vld [vmem:[%s467_s1] ss:$0 sm:$0xff]  ;;  %v86_v9 = vld [vmem:[%s469_s3 + $0x8] sm:$0xff]  ;;  %v87_v15 = vld [vmem:[%s469_s3 + $0x10] sm:$0xff] }
   0x3   :  { %v249_v2 = vld [vmem:[%s468_s2] ss:$0 sm:$0xff]  ;;  %v46_v3 = vmul.f32 %v244_v1, %v23_v0  ;;  %v47_v12 = vmul.f32 %v244_v1, %v24_v8  ;;  %v48_v14 = vmul.f32 %v244_v1, %v25_v10  ;;  %v26_v16 = vld [vmem:[%s466_s0 + $0x18] sm:$0xff]  ;;  %v28_v24 = vld [vmem:[%s466_s0 + $0x28] sm:$0xff] }
   0x4   :  { %v85_v4 = vld [vmem:[%s469_s3] sm:$0xff]  ;;  %v88_v17 = vld [vmem:[%s469_s3 + $0x18] sm:$0xff]  ;;  %v49_v20 = vmul.f32 %v244_v1, %v26_v16  ;;  %v90_v29 = vld [vmem:[%s469_s3 + $0x28] sm:$0xff]  ;;  %v51_v38 = vmul.f32 %v244_v1, %v28_v24 }
   0x5   :  { %v258_v5 = vld [vmem:[%s470_s4] ss:$0 sm:$0xff]  ;;  %v69_v11 = vadd.f32 %v249_v2, %v46_v3  ;;  %v70_v25 = vadd.f32 %v249_v2, %v47_v12  ;;  %v71_v27 = vadd.f32 %v249_v2, %v48_v14  ;;  %v29_v34 = vld [vmem:[%s466_s0 + $0x30] sm:$0xff]  ;;  %v30_v44 = vld [vmem:[%s466_s0 + $0x38] sm:$0xff] }
   0x6   :  { %v263_v6 = vld [vmem:[%s471_s5] ss:$0 sm:$0xff]  ;;  %v108_v7 = vmul.f32 %v258_v5, %v85_v4  ;;  %v109_v13 = vmul.f32 %v258_v5, %v86_v9  ;;  %v110_v19 = vmul.f32 %v258_v5, %v87_v15  ;;  %v111_v21 = vmul.f32 %v258_v5, %v88_v17  ;;  %v91_v39 = vld [vmem:[%s469_s3 + $0x30] sm:$0xff]  ;;  %v92_v45 = vld [vmem:[%s469_s3 + $0x38] sm:$0xff] }
   0x7   :  { %v27_v22 = vld [vmem:[%s466_s0 + $0x20] sm:$0xff]  ;;  %v72_v32 = vadd.f32 %v249_v2, %v49_v20  ;;  %v113_v43 = vmul.f32 %v258_v5, %v90_v29  ;;  %v74_v48 = vadd.f32 %v249_v2, %v51_v38  ;;  %v52_v49 = vmul.f32 %v244_v1, %v29_v34  ;;  %v32_v56 = vld [vmem:[%s466_s0 + $0x48] sm:$0xff]  ;;  %v33_v4 = vld [vmem:[%s466_s0 + $0x50] sm:$0xff] }
   0x8   :  { %v131_v18 = vadd.f32 %v263_v6, %v108_v7  ;;  %v89_v23 = vld [vmem:[%s469_s3 + $0x20] sm:$0xff]  ;;  %v132_v26 = vadd.f32 %v263_v6, %v109_v13  ;;  %v50_v28 = vmul.f32 %v244_v1, %v27_v22  ;;  %v133_v31 = vadd.f32 %v263_v6, %v110_v19  ;;  %v94_v3 = vld [vmem:[%s469_s3 + $0x48] sm:$0xff]  ;;  %v34_v12 = vld [vmem:[%s466_s0 + $0x58] sm:$0xff] }
   0x9   :  { %v134_v33 = vadd.f32 %v263_v6, %v111_v21  ;;  %v112_v37 = vmul.f32 %v258_v5, %v89_v23  ;;  %v31_v50 = vld [vmem:[%s466_s0 + $0x40] sm:$0xff]  ;;  %v136_v54 = vadd.f32 %v263_v6, %v113_v43  ;;  %v114_v55 = vmul.f32 %v258_v5, %v91_v39  ;;  %v96_v17 = vld [vmem:[%s469_s3 + $0x58] sm:$0xff]  ;;  %v37_v34 = vld [vmem:[%s466_s0 + $0x70] sm:$0xff] }
   0xa   :  { %v147_v30 = vadd.f32 %v131_v18, %v69_v11  ;;  %v148_v35 = vadd.f32 %v132_v26, %v70_v25  ;;  %v73_v36 = vadd.f32 %v249_v2, %v50_v28  ;;  %v149_v41 = vadd.f32 %v133_v31, %v71_v27  ;;  %v93_v51 = vld [vmem:[%s469_s3 + $0x40] sm:$0xff]  ;;  %v95_v11 = vld [vmem:[%s469_s3 + $0x50] sm:$0xff]  ;;  %v36_v28 = vld [vmem:[%s466_s0 + $0x68] sm:$0xff] }
   0xb   :  { %v150_v42 = vadd.f32 %v134_v33, %v72_v32  ;;  %v135_v47 = vadd.f32 %v263_v6, %v112_v37  ;;  %v75_v58 = vadd.f32 %v249_v2, %v52_v49  ;;  %v53_v59 = vmul.f32 %v244_v1, %v30_v44  ;;  %v35_v22 = vld [vmem:[%s466_s0 + $0x60] sm:$0xff]  ;;  %v98_v33 = vld [vmem:[%s469_s3 + $0x68] sm:$0xff]  ;;  %v99_v43 = vld [vmem:[%s469_s3 + $0x70] sm:$0xff] }
   0xc   :  { %v163_v40 = vmax.f32 %v147_v30, 0.0  ;;  %v164_v46 = vmax.f32 %v148_v35, 0.0  ;;  %v165_v52 = vmax.f32 %v149_v41, 0.0  ;;  %v115_v60 = vmul.f32 %v258_v5, %v92_v45  ;;  %v97_v27 = vld [vmem:[%s469_s3 + $0x60] sm:$0xff]  ;;  %v100_v49 = vld [vmem:[%s469_s3 + $0x78] sm:$0xff] }
   0xd   :  { %v166_v53 = vmax.f32 %v150_v42, 0.0  ;;  %v151_v57 = vadd.f32 %v135_v47, %v73_v36  ;;  %v152_v61 = vadd.f32 %v136_v54, %v74_v48  ;;  %v137_v62 = vadd.f32 %v263_v6, %v114_v55  ;;  %v38_v48 = vld [vmem:[%s466_s0 + $0x78] sm:$0xff] }
   0xe   :  { %179 = vst [vmem:[%s472_s6] sm:$0xff] %v163_v40  ;;  %180 = vst [vmem:[%s472_s6 + $0x8] sm:$0xff] %v164_v46  ;;  %v54_v63 = vmul.f32 %v244_v1, %v31_v50  ;;  %v116_v0 = vmul.f32 %v258_v5, %v93_v51  ;;  %v76_v8 = vadd.f32 %v249_v2, %v53_v59 }
   0xf   :  { %181 = vst [vmem:[%s472_s6 + $0x10] sm:$0xff] %v165_v52  ;;  %182 = vst [vmem:[%s472_s6 + $0x18] sm:$0xff] %v166_v53  ;;  %v167_v7 = vmax.f32 %v151_v57, 0.0  ;;  %v138_v9 = vadd.f32 %v263_v6, %v115_v60  ;;  %v55_v10 = vmul.f32 %v244_v1, %v32_v56  ;;  %v168_v13 = vmax.f32 %v152_v61, 0.0 }
  0x10   :  { %v153_v14 = vadd.f32 %v137_v62, %v75_v58  ;;  %v77_v15 = vadd.f32 %v249_v2, %v54_v63  ;;  %v139_v16 = vadd.f32 %v263_v6, %v116_v0  ;;  %v117_v20 = vmul.f32 %v258_v5, %v94_v3 }
  0x11   :  { %183 = vst [vmem:[%s472_s6 + $0x20] sm:$0xff] %v167_v7  ;;  %v154_v18 = vadd.f32 %v138_v9, %v76_v8  ;;  %v78_v19 = vadd.f32 %v249_v2, %v55_v10  ;;  %v56_v21 = vmul.f32 %v244_v1, %v33_v4  ;;  %184 = vst [vmem:[%s472_s6 + $0x28] sm:$0xff] %v168_v13 }
  0x12   :  { %v169_v23 = vmax.f32 %v153_v14, 0.0  ;;  %v155_v24 = vadd.f32 %v139_v16, %v77_v15  ;;  %v118_v25 = vmul.f32 %v258_v5, %v95_v11  ;;  %v57_v26 = vmul.f32 %v244_v1, %v34_v12 }
  0x13   :  { %v170_v29 = vmax.f32 %v154_v18, 0.0  ;;  %v140_v30 = vadd.f32 %v263_v6, %v117_v20  ;;  %v79_v31 = vadd.f32 %v249_v2, %v56_v21  ;;  %v119_v32 = vmul.f32 %v258_v5, %v96_v17 }
  0x14   :  { %185 = vst [vmem:[%s472_s6 + $0x30] sm:$0xff] %v169_v23  ;;  %v171_v35 = vmax.f32 %v155_v24, 0.0  ;;  %v141_v36 = vadd.f32 %v263_v6, %v118_v25  ;;  %v80_v37 = vadd.f32 %v249_v2, %v57_v26  ;;  %v58_v38 = vmul.f32 %v244_v1, %v35_v22 }
  0x15   :  { %186 = vst [vmem:[%s472_s6 + $0x38] sm:$0xff] %v170_v29  ;;  %v156_v39 = vadd.f32 %v140_v30, %v78_v19  ;;  %v142_v40 = vadd.f32 %v263_v6, %v119_v32  ;;  %v120_v41 = vmul.f32 %v258_v5, %v97_v27  ;;  %v59_v42 = vmul.f32 %v244_v1, %v36_v28 }
  0x16   :  { %187 = vst [vmem:[%s472_s6 + $0x40] sm:$0xff] %v171_v35  ;;  %v157_v44 = vadd.f32 %v141_v36, %v79_v31  ;;  %v81_v45 = vadd.f32 %v249_v2, %v58_v38  ;;  %v121_v46 = vmul.f32 %v258_v5, %v98_v33  ;;  %v60_v47 = vmul.f32 %v244_v1, %v37_v34 }
  0x17   :  { %v172_v50 = vmax.f32 %v156_v39, 0.0  ;;  %v158_v51 = vadd.f32 %v142_v40, %v80_v37  ;;  %v143_v52 = vadd.f32 %v263_v6, %v120_v41  ;;  %v82_v53 = vadd.f32 %v249_v2, %v59_v42 }
  0x18   :  { %v173_v54 = vmax.f32 %v157_v44, 0.0  ;;  %v144_v55 = vadd.f32 %v263_v6, %v121_v46  ;;  %v83_v56 = vadd.f32 %v249_v2, %v60_v47  ;;  %v122_v57 = vmul.f32 %v258_v5, %v99_v43 }
  0x19   :  { %188 = vst [vmem:[%s472_s6 + $0x48] sm:$0xff] %v172_v50  ;;  %v174_v58 = vmax.f32 %v158_v51, 0.0  ;;  %v159_v59 = vadd.f32 %v143_v52, %v81_v45  ;;  %v61_v60 = vmul.f32 %v244_v1, %v38_v48  ;;  %v123_v61 = vmul.f32 %v258_v5, %v100_v49 }
  0x1a   :  { %189 = vst [vmem:[%s472_s6 + $0x50] sm:$0xff] %v173_v54  ;;  %v160_v62 = vadd.f32 %v144_v55, %v82_v53  ;;  %v145_v63 = vadd.f32 %v263_v6, %v122_v57 }
  0x1b   :  { %190 = vst [vmem:[%s472_s6 + $0x58] sm:$0xff] %v174_v58  ;;  %v175_v0 = vmax.f32 %v159_v59, 0.0  ;;  %v84_v3 = vadd.f32 %v249_v2, %v61_v60  ;;  %v146_v4 = vadd.f32 %v263_v6, %v123_v61 }
  0x1c   :  { %v176_v7 = vmax.f32 %v160_v62, 0.0  ;;  %v161_v1 = vadd.f32 %v145_v63, %v83_v56 }
  0x1d   :  { %191 = vst [vmem:[%s472_s6 + $0x60] sm:$0xff] %v175_v0  ;;  %v162_v5 = vadd.f32 %v146_v4, %v84_v3 }
  0x1e   :  { %192 = vst [vmem:[%s472_s6 + $0x68] sm:$0xff] %v176_v7  ;;  %v177_v8 = vmax.f32 %v161_v1, 0.0 }
  0x1f   :  { %v178_v9 = vmax.f32 %v162_v5, 0.0 }
  0x20   :  { %193 = vst [vmem:[%s472_s6 + $0x70] sm:$0xff] %v177_v8 }
  0x21   :  { %194 = vst [vmem:[%s472_s6 + $0x78] sm:$0xff] %v178_v9 }

</bundles_post_ra>
